<compile_context>
chip_gen: v7x
topology: tpu7x:2x2x1
jax: 0.10.0
libtpu: 0.0.40
codegen_flags: <defaults>
</compile_context>

<pallas_src>
import jax
import jax.numpy as jnp
from jax.experimental import pallas as pl
from jax.experimental.pallas import tpu as pltpu

LANE = 128   # lane width: pad I / H / O to this
SUBL = 8     # sublane width: pad B to a multiple of this


# -----------------------------------------------------------------------------
# Fused kernel: embedding output -> L LSTM layers -> Linear decoder.
# Everything lives in VMEM; grid is a single step.
# -----------------------------------------------------------------------------
def _rnn_fused_kernel(x_ref, wih_ref, whh_ref, b_ref, h0_ref, c0_ref,
                      wdec_ref, bdec_ref,
                      out_ref, hN_ref, cN_ref,
                      seq_sc, gx_sc):
    T, Bp, DP = x_ref.shape          # (time, padded batch, 128)
    L = h0_ref.shape[0]
    G = 4 * DP

    # Layer-input sequence slab, held in VMEM for the whole forward.
    seq_sc[...] = x_ref[...]

    for layer in range(L):           # L is a small static Python constant
        # Hoisted, time-independent input projection (+ bias folded in):
        #   gates_x = X @ W_ih + b   as ONE (T*Bp, DP) @ (DP, 4*DP) GEMM.
        xin = seq_sc[...].reshape(T * Bp, DP)
        gx = jnp.dot(xin, wih_ref[layer],
                     preferred_element_type=jnp.float32) + b_ref[layer]
        gx_sc[...] = gx.reshape(T, Bp, G)

        h = h0_ref[layer]            # (Bp, DP)
        c = c0_ref[layer]

        # Serial recurrence: only h @ W_hh per step.  T is small and static,
        # so we fully unroll at trace time (equivalent to fori_loop unroll=True)
        # which keeps every VMEM index static and gives the scheduler full
        # straight-line visibility.
        for t in range(T):
            gates = gx_sc[t] + jnp.dot(h, whh_ref[layer],
                                       preferred_element_type=jnp.float32)
            # PyTorch gate order i, f, g, o; each slice is a full 128-lane vreg.
            ig = jax.nn.sigmoid(gates[:, 0 * DP:1 * DP])
            fg = jax.nn.sigmoid(gates[:, 1 * DP:2 * DP])
            gg = jnp.tanh(gates[:, 2 * DP:3 * DP])
            og = jax.nn.sigmoid(gates[:, 3 * DP:4 * DP])
            c = fg * c + ig * gg
            h = og * jnp.tanh(c)
            seq_sc[t] = h            # becomes next layer's input / final output

        hN_ref[layer] = h
        cN_ref[layer] = c

    # Fused decoder: one lane-dense (T*Bp, DP) @ (DP, OP) GEMM + bias.
    hseq = seq_sc[...].reshape(T * Bp, DP)
    out_ref[...] = (jnp.dot(hseq, wdec_ref[...],
                            preferred_element_type=jnp.float32)
                    + bdec_ref[...])


def rnn_fused_call(x_p, w_ih_p, w_hh_p, b_p, h0_p, c0_p, dec_w_p, dec_b_p):
    T, Bp, DP = x_p.shape
    L = w_ih_p.shape[0]
    G = 4 * DP
    OP = dec_w_p.shape[-1]

    out_shapes = (
        jax.ShapeDtypeStruct((T * Bp, OP), jnp.float32),   # decoder output slab
        jax.ShapeDtypeStruct((L, Bp, DP), jnp.float32),    # h_n (padded)
        jax.ShapeDtypeStruct((L, Bp, DP), jnp.float32),    # c_n (padded)
    )
    return pl.pallas_call(
        _rnn_fused_kernel,
        out_shape=out_shapes,
        grid_spec=pltpu.PrefetchScalarGridSpec(
            num_scalar_prefetch=0,
            grid=(1,),
            in_specs=[
                pl.BlockSpec((T, Bp, DP), lambda i: (0, 0, 0)),   # x (padded)
                pl.BlockSpec((L, DP, G), lambda i: (0, 0, 0)),    # W_ih stacked
                pl.BlockSpec((L, DP, G), lambda i: (0, 0, 0)),    # W_hh stacked
                pl.BlockSpec((L, 1, G), lambda i: (0, 0, 0)),     # bias stacked
                pl.BlockSpec((L, Bp, DP), lambda i: (0, 0, 0)),   # h0
                pl.BlockSpec((L, Bp, DP), lambda i: (0, 0, 0)),   # c0
                pl.BlockSpec((DP, OP), lambda i: (0, 0)),         # decoder W
                pl.BlockSpec((1, OP), lambda i: (0, 0)),          # decoder b
            ],
            out_specs=[
                pl.BlockSpec((T * Bp, OP), lambda i: (0, 0)),
                pl.BlockSpec((L, Bp, DP), lambda i: (0, 0, 0)),
                pl.BlockSpec((L, Bp, DP), lambda i: (0, 0, 0)),
            ],
            scratch_shapes=[
                pltpu.VMEM((T, Bp, DP), jnp.float32),       # layer activations
                pltpu.VMEM((T, Bp, 4 * DP), jnp.float32),   # precomputed x-gates
            ],
        ),
        compiler_params=pltpu.CompilerParams(
            dimension_semantics=("arbitrary",)),
    )(x_p, w_ih_p, w_hh_p, b_p, h0_p, c0_p, dec_w_p, dec_b_p)


# -----------------------------------------------------------------------------
# Parameter init (deterministic, mirrors PyTorch shapes; weights pre-transposed)
# -----------------------------------------------------------------------------
def init_params(key, input_size, output_size, hidden_size, num_layers):
    params = {}
    k_emb, k_rest = jax.random.split(key)
    params["embedding"] = jax.random.normal(
        k_emb, (input_size, input_size), jnp.float32)

    bound = 1.0 / jnp.sqrt(hidden_size)
    layers = []
    for layer in range(num_layers):
        k_rest, k1, k2, k3, k4 = jax.random.split(k_rest, 5)
        in_dim = input_size if layer == 0 else hidden_size
        w_ih = jax.random.uniform(k1, (in_dim, 4 * hidden_size), jnp.float32,
                                  -bound, bound)
        w_hh = jax.random.uniform(k2, (hidden_size, 4 * hidden_size),
                                  jnp.float32, -bound, bound)
        b_ih = jax.random.uniform(k3, (4 * hidden_size,), jnp.float32,
                                  -bound, bound)
        b_hh = jax.random.uniform(k4, (4 * hidden_size,), jnp.float32,
                                  -bound, bound)
        layers.append({"w_ih": w_ih, "w_hh": w_hh,
                       "b": (b_ih + b_hh).reshape(1, 4 * hidden_size)})
    params["lstm"] = layers

    k_rest, kw, kb = jax.random.split(k_rest, 3)
    params["dec_w"] = jax.random.uniform(kw, (hidden_size, output_size),
                                         jnp.float32, -bound, bound)
    params["dec_b"] = jax.random.uniform(kb, (1, output_size), jnp.float32,
                                         -bound, bound)
    return params


# -----------------------------------------------------------------------------
# One-time packing: pad/scatter weights into 128-lane-aligned gate slots.
# Zero padding keeps the math exact on the real lanes (padded h/c stay 0).
# -----------------------------------------------------------------------------
def pack_params(params, input_size, output_size, hidden_size):
    DP = LANE
    assert input_size <= DP and hidden_size <= DP and output_size <= DP
    H = hidden_size
    G = 4 * DP

    def scatter_gate_cols(w, in_dim):
        out = jnp.zeros((DP, G), jnp.float32)
        for k in range(4):
            out = out.at[:in_dim, k * DP:k * DP + H].set(w[:, k * H:(k + 1) * H])
        return out

    w_ih_p, w_hh_p, b_p = [], [], []
    for layer, p in enumerate(params["lstm"]):
        in_dim = input_size if layer == 0 else hidden_size
        w_ih_p.append(scatter_gate_cols(p["w_ih"], in_dim))
        w_hh_p.append(scatter_gate_cols(p["w_hh"], hidden_size))
        b_vec = p["b"].reshape(-1)
        b_pad = jnp.zeros((G,), jnp.float32)
        for k in range(4):
            b_pad = b_pad.at[k * DP:k * DP + H].set(b_vec[k * H:(k + 1) * H])
        b_p.append(b_pad.reshape(1, G))

    dec_w_p = jnp.zeros((DP, DP), jnp.float32).at[:H, :output_size].set(
        params["dec_w"])
    dec_b_p = jnp.zeros((1, DP), jnp.float32).at[:, :output_size].set(
        params["dec_b"])

    return {
        "embedding": params["embedding"],
        "w_ih": jnp.stack(w_ih_p, 0),      # (L, 128, 512)
        "w_hh": jnp.stack(w_hh_p, 0),      # (L, 128, 512)
        "b": jnp.stack(b_p, 0),            # (L, 1, 512)
        "dec_w": dec_w_p,                  # (128, 128)
        "dec_b": dec_b_p,                  # (1, 128)
    }


# -----------------------------------------------------------------------------
# Forward pass equivalent to RNN.forward(input_seq, hidden_state)
# -----------------------------------------------------------------------------
def rnn_forward(packed, input_seq, hidden_state, output_size):
    h0, c0 = hidden_state                  # each (L, B, H)
    T, B = input_seq.shape
    L, _, H = h0.shape
    DP = packed["w_hh"].shape[1]
    OP = packed["dec_w"].shape[-1]
    Bp = ((B + SUBL - 1) // SUBL) * SUBL

    # Embedding gather (plain-JAX glue), then pad batch->Bp and features->128.
    x = packed["embedding"][input_seq]     # (T, B, I)
    I = x.shape[-1]
    x_p = jnp.zeros((T, Bp, DP), jnp.float32).at[:, :B, :I].set(x)
    h0_p = jnp.zeros((L, Bp, DP), jnp.float32).at[:, :B, :H].set(h0)
    c0_p = jnp.zeros((L, Bp, DP), jnp.float32).at[:, :B, :H].set(c0)

    out2d, hN, cN = rnn_fused_call(
        x_p, packed["w_ih"], packed["w_hh"], packed["b"],
        h0_p, c0_p, packed["dec_w"], packed["dec_b"])

    output = out2d.reshape(T, Bp, OP)[:, :B, :output_size]
    h_n = hN[:, :B, :H]
    c_n = cN[:, :B, :H]
    # .detach() equivalent
    return output, (jax.lax.stop_gradient(h_n), jax.lax.stop_gradient(c_n))


# -----------------------------------------------------------------------------
# Plain-JAX reference (same math, unpadded) for a sanity check.
# -----------------------------------------------------------------------------
def rnn_reference(params, input_seq, hidden_state):
    h0, c0 = hidden_state
    x = params["embedding"][input_seq]
    T = x.shape[0]
    hs, cs = [], []
    for layer, p in enumerate(params["lstm"]):
        h, c = h0[layer], c0[layer]
        H = h.shape[-1]
        ys = []
        for t in range(T):
            gates = x[t] @ p["w_ih"] + h @ p["w_hh"] + p["b"]
            ig = jax.nn.sigmoid(gates[:, 0 * H:1 * H])
            fg = jax.nn.sigmoid(gates[:, 1 * H:2 * H])
            gg = jnp.tanh(gates[:, 2 * H:3 * H])
            og = jax.nn.sigmoid(gates[:, 3 * H:4 * H])
            c = fg * c + ig * gg
            h = og * jnp.tanh(c)
            ys.append(h)
        x = jnp.stack(ys, 0)
        hs.append(h)
        cs.append(c)
    out = x @ params["dec_w"] + params["dec_b"]
    return out, (jnp.stack(hs, 0), jnp.stack(cs, 0))


if __name__ == "__main__":
    input_size = 16      # vocab size == embedding dim
    output_size = 16
    hidden_size = 32
    num_layers = 2
    T, B = 8, 2

    key = jax.random.PRNGKey(0)
    k_params, k_seq, k_h, k_c = jax.random.split(key, 4)

    params = init_params(k_params, input_size, output_size, hidden_size,
                         num_layers)
    packed = pack_params(params, input_size, output_size, hidden_size)

    input_seq = jax.random.randint(k_seq, (T, B), 0, input_size, jnp.int32)
    h0 = jax.random.normal(k_h, (num_layers, B, hidden_size), jnp.float32)
    c0 = jax.random.normal(k_c, (num_layers, B, hidden_size), jnp.float32)

    output, (h_n, c_n) = rnn_forward(packed, input_seq, (h0, c0), output_size)
    jax.block_until_ready((output, h_n, c_n))

    assert output.shape == (T, B, output_size)
    assert h_n.shape == (num_layers, B, hidden_size)
    assert c_n.shape == (num_layers, B, hidden_size)

    # Sanity check vs. plain-JAX reference (loose tol for MXU f32 precision).
    ref_out, (ref_h, ref_c) = rnn_reference(params, input_seq, (h0, c0))
    err = max(float(jnp.max(jnp.abs(output - ref_out))),
              float(jnp.max(jnp.abs(h_n - ref_h))),
              float(jnp.max(jnp.abs(c_n - ref_c))))
    assert err < 2e-2, f"mismatch vs reference: max abs err {err}"

    print("KERNEL_OK")
</pallas_src>

<mosaic_0001>
module attributes {stable_mosaic.version = 11 : i64} {
  func.func @_rnn_fused_kernel(%arg0: i32, %arg1: memref<8x8x128xf32, #tpu.memory_space<vmem>>, %arg2: memref<2x128x512xf32, #tpu.memory_space<vmem>>, %arg3: memref<2x128x512xf32, #tpu.memory_space<vmem>>, %arg4: memref<2x1x512xf32, #tpu.memory_space<vmem>>, %arg5: memref<2x8x128xf32, #tpu.memory_space<vmem>>, %arg6: memref<2x8x128xf32, #tpu.memory_space<vmem>>, %arg7: memref<128x128xf32, #tpu.memory_space<vmem>>, %arg8: memref<1x128xf32, #tpu.memory_space<vmem>>, %arg9: memref<64x128xf32, #tpu.memory_space<vmem>>, %arg10: memref<2x8x128xf32, #tpu.memory_space<vmem>>, %arg11: memref<2x8x128xf32, #tpu.memory_space<vmem>>, %arg12: memref<8x8x128xf32, #tpu.memory_space<vmem>>, %arg13: memref<8x8x512xf32, #tpu.memory_space<vmem>>) attributes {dimension_semantics = [#tpu.dimension_semantics<arbitrary>], iteration_bounds = array<i64: 1>, scalar_prefetch = 0 : i64, scratch_operands = 2 : i64, tpu.core_type = #tpu.core_type<tc>, window_params = [{pipeline_mode = #tpu.pipeline_mode<synchronous>, transform_indices = @transform_0, window_bounds = array<i64: 8, 8, 128>}, {pipeline_mode = #tpu.pipeline_mode<synchronous>, transform_indices = @transform_1, window_bounds = array<i64: 2, 128, 512>}, {pipeline_mode = #tpu.pipeline_mode<synchronous>, transform_indices = @transform_2, window_bounds = array<i64: 2, 128, 512>}, {pipeline_mode = #tpu.pipeline_mode<synchronous>, transform_indices = @transform_3, window_bounds = array<i64: 2, 1, 512>}, {pipeline_mode = #tpu.pipeline_mode<synchronous>, transform_indices = @transform_4, window_bounds = array<i64: 2, 8, 128>}, {pipeline_mode = #tpu.pipeline_mode<synchronous>, transform_indices = @transform_5, window_bounds = array<i64: 2, 8, 128>}, {pipeline_mode = #tpu.pipeline_mode<synchronous>, transform_indices = @transform_6, window_bounds = array<i64: 128, 128>}, {pipeline_mode = #tpu.pipeline_mode<synchronous>, transform_indices = @transform_7, window_bounds = array<i64: 1, 128>}, {pipeline_mode = #tpu.pipeline_mode<synchronous>, transform_indices = @transform_8, window_bounds = array<i64: 64, 128>}, {pipeline_mode = #tpu.pipeline_mode<synchronous>, transform_indices = @transform_9, window_bounds = array<i64: 2, 8, 128>}, {pipeline_mode = #tpu.pipeline_mode<synchronous>, transform_indices = @transform_10, window_bounds = array<i64: 2, 8, 128>}]} {
    %c0 = arith.constant 0 : index
    %c0_0 = arith.constant 0 : index
    %c0_1 = arith.constant 0 : index
    %0 = vector.load %arg1[%c0, %c0_0, %c0_1] : memref<8x8x128xf32, #tpu.memory_space<vmem>>, vector<8x8x128xf32>
    %c0_2 = arith.constant 0 : index
    %c0_3 = arith.constant 0 : index
    %c0_4 = arith.constant 0 : index
    %1 = vector.load %arg12[%c0_2, %c0_3, %c0_4] : memref<8x8x128xf32, #tpu.memory_space<vmem>>, vector<8x8x128xf32>
    tpu.vector_store %arg12[%c0_2, %c0_3, %c0_4], %0 {strides = array<i32>} : memref<8x8x128xf32, #tpu.memory_space<vmem>>, vector<8x8x128xf32>,
    %c0_5 = arith.constant 0 : index
    %c0_6 = arith.constant 0 : index
    %c0_7 = arith.constant 0 : index
    %2 = vector.load %arg12[%c0_5, %c0_6, %c0_7] : memref<8x8x128xf32, #tpu.memory_space<vmem>>, vector<8x8x128xf32>
    %3 = vector.shape_cast %2 : vector<8x8x128xf32> to vector<64x128xf32>
    %c0_8 = arith.constant 0 : index
    %c0_9 = arith.constant 0 : index
    %c0_10 = arith.constant 0 : index
    %4 = vector.load %arg2[%c0_8, %c0_9, %c0_10] : memref<2x128x512xf32, #tpu.memory_space<vmem>>, vector<1x128x512xf32>
    %5 = vector.shape_cast %4 : vector<1x128x512xf32> to vector<128x512xf32>
    %cst = arith.constant dense<0.000000e+00> : vector<64x512xf32>
    %6 = tpu.matmul %3, %5, %cst {dimension_numbers = #tpu.dot_dimension_numbers<[1], [0], [0], [1], [0, 0, 1, 1], [], []>} : vector<64x128xf32>, vector<128x512xf32>, vector<64x512xf32> -> vector<64x512xf32>
    %c0_11 = arith.constant 0 : index
    %c0_12 = arith.constant 0 : index
    %c0_13 = arith.constant 0 : index
    %7 = vector.load %arg4[%c0_11, %c0_12, %c0_13] : memref<2x1x512xf32, #tpu.memory_space<vmem>>, vector<1x1x512xf32>
    %8 = vector.shape_cast %7 : vector<1x1x512xf32> to vector<1x512xf32>
    %9 = vector.broadcast %8 : vector<1x512xf32> to vector<64x512xf32>
    %10 = arith.addf %6, %9 : vector<64x512xf32>
    %11 = vector.shape_cast %10 : vector<64x512xf32> to vector<8x8x512xf32>
    %c0_14 = arith.constant 0 : index
    %c0_15 = arith.constant 0 : index
    %c0_16 = arith.constant 0 : index
    %12 = vector.load %arg13[%c0_14, %c0_15, %c0_16] : memref<8x8x512xf32, #tpu.memory_space<vmem>>, vector<8x8x512xf32>
    tpu.vector_store %arg13[%c0_14, %c0_15, %c0_16], %11 {strides = array<i32>} : memref<8x8x512xf32, #tpu.memory_space<vmem>>, vector<8x8x512xf32>,
    %c0_17 = arith.constant 0 : index
    %c0_18 = arith.constant 0 : index
    %c0_19 = arith.constant 0 : index
    %13 = vector.load %arg5[%c0_17, %c0_18, %c0_19] : memref<2x8x128xf32, #tpu.memory_space<vmem>>, vector<1x8x128xf32>
    %14 = vector.shape_cast %13 : vector<1x8x128xf32> to vector<8x128xf32>
    %c0_20 = arith.constant 0 : index
    %c0_21 = arith.constant 0 : index
    %c0_22 = arith.constant 0 : index
    %15 = vector.load %arg6[%c0_20, %c0_21, %c0_22] : memref<2x8x128xf32, #tpu.memory_space<vmem>>, vector<1x8x128xf32>
    %16 = vector.shape_cast %15 : vector<1x8x128xf32> to vector<8x128xf32>
    %c0_23 = arith.constant 0 : index
    %c0_24 = arith.constant 0 : index
    %c0_25 = arith.constant 0 : index
    %17 = vector.load %arg13[%c0_23, %c0_24, %c0_25] : memref<8x8x512xf32, #tpu.memory_space<vmem>>, vector<1x8x512xf32>
    %18 = vector.shape_cast %17 : vector<1x8x512xf32> to vector<8x512xf32>
    %c0_26 = arith.constant 0 : index
    %c0_27 = arith.constant 0 : index
    %c0_28 = arith.constant 0 : index
    %19 = vector.load %arg3[%c0_26, %c0_27, %c0_28] : memref<2x128x512xf32, #tpu.memory_space<vmem>>, vector<1x128x512xf32>
    %20 = vector.shape_cast %19 : vector<1x128x512xf32> to vector<128x512xf32>
    %cst_29 = arith.constant dense<0.000000e+00> : vector<8x512xf32>
    %21 = tpu.matmul %14, %20, %cst_29 {dimension_numbers = #tpu.dot_dimension_numbers<[1], [0], [0], [1], [0, 0, 1, 1], [], []>} : vector<8x128xf32>, vector<128x512xf32>, vector<8x512xf32> -> vector<8x512xf32>
    %22 = arith.addf %18, %21 : vector<8x512xf32>
    %23 = vector.extract_strided_slice %22 {offsets = [0, 0], sizes = [8, 128], strides = [1, 1]} : vector<8x512xf32> to vector<8x128xf32>
    %24 = arith.negf %23 : vector<8x128xf32>
    %25 = math.exp %24 : vector<8x128xf32>
    %cst_30 = arith.constant 1.000000e+00 : f32
    %26 = vector.broadcast %cst_30 : f32 to vector<8x128xf32>
    %27 = arith.addf %26, %25 : vector<8x128xf32>
    %28 = arith.divf %26, %27 : vector<8x128xf32>
    %29 = vector.extract_strided_slice %22 {offsets = [0, 128], sizes = [8, 128], strides = [1, 1]} : vector<8x512xf32> to vector<8x128xf32>
    %30 = arith.negf %29 : vector<8x128xf32>
    %31 = math.exp %30 : vector<8x128xf32>
    %cst_31 = arith.constant 1.000000e+00 : f32
    %32 = vector.broadcast %cst_31 : f32 to vector<8x128xf32>
    %33 = arith.addf %32, %31 : vector<8x128xf32>
    %34 = arith.divf %32, %33 : vector<8x128xf32>
    %35 = vector.extract_strided_slice %22 {offsets = [0, 256], sizes = [8, 128], strides = [1, 1]} : vector<8x512xf32> to vector<8x128xf32>
    %36 = math.tanh %35 : vector<8x128xf32>
    %37 = vector.extract_strided_slice %22 {offsets = [0, 384], sizes = [8, 128], strides = [1, 1]} : vector<8x512xf32> to vector<8x128xf32>
    %38 = arith.negf %37 : vector<8x128xf32>
    %39 = math.exp %38 : vector<8x128xf32>
    %cst_32 = arith.constant 1.000000e+00 : f32
    %40 = vector.broadcast %cst_32 : f32 to vector<8x128xf32>
    %41 = arith.addf %40, %39 : vector<8x128xf32>
    %42 = arith.divf %40, %41 : vector<8x128xf32>
    %43 = arith.mulf %34, %16 : vector<8x128xf32>
    %44 = arith.mulf %28, %36 : vector<8x128xf32>
    %45 = arith.addf %43, %44 : vector<8x128xf32>
    %46 = math.tanh %45 : vector<8x128xf32>
    %47 = arith.mulf %42, %46 : vector<8x128xf32>
    %c0_33 = arith.constant 0 : index
    %c0_34 = arith.constant 0 : index
    %c0_35 = arith.constant 0 : index
    %48 = vector.load %arg12[%c0_33, %c0_34, %c0_35] : memref<8x8x128xf32, #tpu.memory_space<vmem>>, vector<1x8x128xf32>
    %49 = vector.shape_cast %48 : vector<1x8x128xf32> to vector<8x128xf32>
    %50 = vector.shape_cast %47 : vector<8x128xf32> to vector<1x8x128xf32>
    tpu.vector_store %arg12[%c0_33, %c0_34, %c0_35], %50 {strides = array<i32>} : memref<8x8x128xf32, #tpu.memory_space<vmem>>, vector<1x8x128xf32>,
    %c1 = arith.constant 1 : index
    %c0_36 = arith.constant 0 : index
    %c0_37 = arith.constant 0 : index
    %51 = vector.load %arg13[%c1, %c0_36, %c0_37] : memref<8x8x512xf32, #tpu.memory_space<vmem>>, vector<1x8x512xf32>
    %52 = vector.shape_cast %51 : vector<1x8x512xf32> to vector<8x512xf32>
    %c0_38 = arith.constant 0 : index
    %c0_39 = arith.constant 0 : index
    %c0_40 = arith.constant 0 : index
    %53 = vector.load %arg3[%c0_38, %c0_39, %c0_40] : memref<2x128x512xf32, #tpu.memory_space<vmem>>, vector<1x128x512xf32>
    %54 = vector.shape_cast %53 : vector<1x128x512xf32> to vector<128x512xf32>
    %cst_41 = arith.constant dense<0.000000e+00> : vector<8x512xf32>
    %55 = tpu.matmul %47, %54, %cst_41 {dimension_numbers = #tpu.dot_dimension_numbers<[1], [0], [0], [1], [0, 0, 1, 1], [], []>} : vector<8x128xf32>, vector<128x512xf32>, vector<8x512xf32> -> vector<8x512xf32>
    %56 = arith.addf %52, %55 : vector<8x512xf32>
    %57 = vector.extract_strided_slice %56 {offsets = [0, 0], sizes = [8, 128], strides = [1, 1]} : vector<8x512xf32> to vector<8x128xf32>
    %58 = arith.negf %57 : vector<8x128xf32>
    %59 = math.exp %58 : vector<8x128xf32>
    %cst_42 = arith.constant 1.000000e+00 : f32
    %60 = vector.broadcast %cst_42 : f32 to vector<8x128xf32>
    %61 = arith.addf %60, %59 : vector<8x128xf32>
    %62 = arith.divf %60, %61 : vector<8x128xf32>
    %63 = vector.extract_strided_slice %56 {offsets = [0, 128], sizes = [8, 128], strides = [1, 1]} : vector<8x512xf32> to vector<8x128xf32>
    %64 = arith.negf %63 : vector<8x128xf32>
    %65 = math.exp %64 : vector<8x128xf32>
    %cst_43 = arith.constant 1.000000e+00 : f32
    %66 = vector.broadcast %cst_43 : f32 to vector<8x128xf32>
    %67 = arith.addf %66, %65 : vector<8x128xf32>
    %68 = arith.divf %66, %67 : vector<8x128xf32>
    %69 = vector.extract_strided_slice %56 {offsets = [0, 256], sizes = [8, 128], strides = [1, 1]} : vector<8x512xf32> to vector<8x128xf32>
    %70 = math.tanh %69 : vector<8x128xf32>
    %71 = vector.extract_strided_slice %56 {offsets = [0, 384], sizes = [8, 128], strides = [1, 1]} : vector<8x512xf32> to vector<8x128xf32>
    %72 = arith.negf %71 : vector<8x128xf32>
    %73 = math.exp %72 : vector<8x128xf32>
    %cst_44 = arith.constant 1.000000e+00 : f32
    %74 = vector.broadcast %cst_44 : f32 to vector<8x128xf32>
    %75 = arith.addf %74, %73 : vector<8x128xf32>
    %76 = arith.divf %74, %75 : vector<8x128xf32>
    %77 = arith.mulf %68, %45 : vector<8x128xf32>
    %78 = arith.mulf %62, %70 : vector<8x128xf32>
    %79 = arith.addf %77, %78 : vector<8x128xf32>
    %80 = math.tanh %79 : vector<8x128xf32>
    %81 = arith.mulf %76, %80 : vector<8x128xf32>
    %c1_45 = arith.constant 1 : index
    %c0_46 = arith.constant 0 : index
    %c0_47 = arith.constant 0 : index
    %82 = vector.load %arg12[%c1_45, %c0_46, %c0_47] : memref<8x8x128xf32, #tpu.memory_space<vmem>>, vector<1x8x128xf32>
    %83 = vector.shape_cast %82 : vector<1x8x128xf32> to vector<8x128xf32>
    %84 = vector.shape_cast %81 : vector<8x128xf32> to vector<1x8x128xf32>
    tpu.vector_store %arg12[%c1_45, %c0_46, %c0_47], %84 {strides = array<i32>} : memref<8x8x128xf32, #tpu.memory_space<vmem>>, vector<1x8x128xf32>,
    %c2 = arith.constant 2 : index
    %c0_48 = arith.constant 0 : index
    %c0_49 = arith.constant 0 : index
    %85 = vector.load %arg13[%c2, %c0_48, %c0_49] : memref<8x8x512xf32, #tpu.memory_space<vmem>>, vector<1x8x512xf32>
    %86 = vector.shape_cast %85 : vector<1x8x512xf32> to vector<8x512xf32>
    %c0_50 = arith.constant 0 : index
    %c0_51 = arith.constant 0 : index
    %c0_52 = arith.constant 0 : index
    %87 = vector.load %arg3[%c0_50, %c0_51, %c0_52] : memref<2x128x512xf32, #tpu.memory_space<vmem>>, vector<1x128x512xf32>
    %88 = vector.shape_cast %87 : vector<1x128x512xf32> to vector<128x512xf32>
    %cst_53 = arith.constant dense<0.000000e+00> : vector<8x512xf32>
    %89 = tpu.matmul %81, %88, %cst_53 {dimension_numbers = #tpu.dot_dimension_numbers<[1], [0], [0], [1], [0, 0, 1, 1], [], []>} : vector<8x128xf32>, vector<128x512xf32>, vector<8x512xf32> -> vector<8x512xf32>
    %90 = arith.addf %86, %89 : vector<8x512xf32>
    %91 = vector.extract_strided_slice %90 {offsets = [0, 0], sizes = [8, 128], strides = [1, 1]} : vector<8x512xf32> to vector<8x128xf32>
    %92 = arith.negf %91 : vector<8x128xf32>
    %93 = math.exp %92 : vector<8x128xf32>
    %cst_54 = arith.constant 1.000000e+00 : f32
    %94 = vector.broadcast %cst_54 : f32 to vector<8x128xf32>
    %95 = arith.addf %94, %93 : vector<8x128xf32>
    %96 = arith.divf %94, %95 : vector<8x128xf32>
    %97 = vector.extract_strided_slice %90 {offsets = [0, 128], sizes = [8, 128], strides = [1, 1]} : vector<8x512xf32> to vector<8x128xf32>
    %98 = arith.negf %97 : vector<8x128xf32>
    %99 = math.exp %98 : vector<8x128xf32>
    %cst_55 = arith.constant 1.000000e+00 : f32
    %100 = vector.broadcast %cst_55 : f32 to vector<8x128xf32>
    %101 = arith.addf %100, %99 : vector<8x128xf32>
    %102 = arith.divf %100, %101 : vector<8x128xf32>
    %103 = vector.extract_strided_slice %90 {offsets = [0, 256], sizes = [8, 128], strides = [1, 1]} : vector<8x512xf32> to vector<8x128xf32>
    %104 = math.tanh %103 : vector<8x128xf32>
    %105 = vector.extract_strided_slice %90 {offsets = [0, 384], sizes = [8, 128], strides = [1, 1]} : vector<8x512xf32> to vector<8x128xf32>
    %106 = arith.negf %105 : vector<8x128xf32>
    %107 = math.exp %106 : vector<8x128xf32>
    %cst_56 = arith.constant 1.000000e+00 : f32
    %108 = vector.broadcast %cst_56 : f32 to vector<8x128xf32>
    %109 = arith.addf %108, %107 : vector<8x128xf32>
    %110 = arith.divf %108, %109 : vector<8x128xf32>
    %111 = arith.mulf %102, %79 : vector<8x128xf32>
    %112 = arith.mulf %96, %104 : vector<8x128xf32>
    %113 = arith.addf %111, %112 : vector<8x128xf32>
    %114 = math.tanh %113 : vector<8x128xf32>
    %115 = arith.mulf %110, %114 : vector<8x128xf32>
    %c2_57 = arith.constant 2 : index
    %c0_58 = arith.constant 0 : index
    %c0_59 = arith.constant 0 : index
    %116 = vector.load %arg12[%c2_57, %c0_58, %c0_59] : memref<8x8x128xf32, #tpu.memory_space<vmem>>, vector<1x8x128xf32>
    %117 = vector.shape_cast %116 : vector<1x8x128xf32> to vector<8x128xf32>
    %118 = vector.shape_cast %115 : vector<8x128xf32> to vector<1x8x128xf32>
    tpu.vector_store %arg12[%c2_57, %c0_58, %c0_59], %118 {strides = array<i32>} : memref<8x8x128xf32, #tpu.memory_space<vmem>>, vector<1x8x128xf32>,
    %c3 = arith.constant 3 : index
    %c0_60 = arith.constant 0 : index
    %c0_61 = arith.constant 0 : index
    %119 = vector.load %arg13[%c3, %c0_60, %c0_61] : memref<8x8x512xf32, #tpu.memory_space<vmem>>, vector<1x8x512xf32>
    %120 = vector.shape_cast %119 : vector<1x8x512xf32> to vector<8x512xf32>
    %c0_62 = arith.constant 0 : index
    %c0_63 = arith.constant 0 : index
    %c0_64 = arith.constant 0 : index
    %121 = vector.load %arg3[%c0_62, %c0_63, %c0_64] : memref<2x128x512xf32, #tpu.memory_space<vmem>>, vector<1x128x512xf32>
    %122 = vector.shape_cast %121 : vector<1x128x512xf32> to vector<128x512xf32>
    %cst_65 = arith.constant dense<0.000000e+00> : vector<8x512xf32>
    %123 = tpu.matmul %115, %122, %cst_65 {dimension_numbers = #tpu.dot_dimension_numbers<[1], [0], [0], [1], [0, 0, 1, 1], [], []>} : vector<8x128xf32>, vector<128x512xf32>, vector<8x512xf32> -> vector<8x512xf32>
    %124 = arith.addf %120, %123 : vector<8x512xf32>
    %125 = vector.extract_strided_slice %124 {offsets = [0, 0], sizes = [8, 128], strides = [1, 1]} : vector<8x512xf32> to vector<8x128xf32>
    %126 = arith.negf %125 : vector<8x128xf32>
    %127 = math.exp %126 : vector<8x128xf32>
    %cst_66 = arith.constant 1.000000e+00 : f32
    %128 = vector.broadcast %cst_66 : f32 to vector<8x128xf32>
    %129 = arith.addf %128, %127 : vector<8x128xf32>
    %130 = arith.divf %128, %129 : vector<8x128xf32>
    %131 = vector.extract_strided_slice %124 {offsets = [0, 128], sizes = [8, 128], strides = [1, 1]} : vector<8x512xf32> to vector<8x128xf32>
    %132 = arith.negf %131 : vector<8x128xf32>
    %133 = math.exp %132 : vector<8x128xf32>
    %cst_67 = arith.constant 1.000000e+00 : f32
    %134 = vector.broadcast %cst_67 : f32 to vector<8x128xf32>
    %135 = arith.addf %134, %133 : vector<8x128xf32>
    %136 = arith.divf %134, %135 : vector<8x128xf32>
    %137 = vector.extract_strided_slice %124 {offsets = [0, 256], sizes = [8, 128], strides = [1, 1]} : vector<8x512xf32> to vector<8x128xf32>
    %138 = math.tanh %137 : vector<8x128xf32>
    %139 = vector.extract_strided_slice %124 {offsets = [0, 384], sizes = [8, 128], strides = [1, 1]} : vector<8x512xf32> to vector<8x128xf32>
    %140 = arith.negf %139 : vector<8x128xf32>
    %141 = math.exp %140 : vector<8x128xf32>
    %cst_68 = arith.constant 1.000000e+00 : f32
    %142 = vector.broadcast %cst_68 : f32 to vector<8x128xf32>
    %143 = arith.addf %142, %141 : vector<8x128xf32>
    %144 = arith.divf %142, %143 : vector<8x128xf32>
    %145 = arith.mulf %136, %113 : vector<8x128xf32>
    %146 = arith.mulf %130, %138 : vector<8x128xf32>
    %147 = arith.addf %145, %146 : vector<8x128xf32>
    %148 = math.tanh %147 : vector<8x128xf32>
    %149 = arith.mulf %144, %148 : vector<8x128xf32>
    %c3_69 = arith.constant 3 : index
    %c0_70 = arith.constant 0 : index
    %c0_71 = arith.constant 0 : index
    %150 = vector.load %arg12[%c3_69, %c0_70, %c0_71] : memref<8x8x128xf32, #tpu.memory_space<vmem>>, vector<1x8x128xf32>
    %151 = vector.shape_cast %150 : vector<1x8x128xf32> to vector<8x128xf32>
    %152 = vector.shape_cast %149 : vector<8x128xf32> to vector<1x8x128xf32>
    tpu.vector_store %arg12[%c3_69, %c0_70, %c0_71], %152 {strides = array<i32>} : memref<8x8x128xf32, #tpu.memory_space<vmem>>, vector<1x8x128xf32>,
    %c4 = arith.constant 4 : index
    %c0_72 = arith.constant 0 : index
    %c0_73 = arith.constant 0 : index
    %153 = vector.load %arg13[%c4, %c0_72, %c0_73] : memref<8x8x512xf32, #tpu.memory_space<vmem>>, vector<1x8x512xf32>
    %154 = vector.shape_cast %153 : vector<1x8x512xf32> to vector<8x512xf32>
    %c0_74 = arith.constant 0 : index
    %c0_75 = arith.constant 0 : index
    %c0_76 = arith.constant 0 : index
    %155 = vector.load %arg3[%c0_74, %c0_75, %c0_76] : memref<2x128x512xf32, #tpu.memory_space<vmem>>, vector<1x128x512xf32>
    %156 = vector.shape_cast %155 : vector<1x128x512xf32> to vector<128x512xf32>
    %cst_77 = arith.constant dense<0.000000e+00> : vector<8x512xf32>
    %157 = tpu.matmul %149, %156, %cst_77 {dimension_numbers = #tpu.dot_dimension_numbers<[1], [0], [0], [1], [0, 0, 1, 1], [], []>} : vector<8x128xf32>, vector<128x512xf32>, vector<8x512xf32> -> vector<8x512xf32>
    %158 = arith.addf %154, %157 : vector<8x512xf32>
    %159 = vector.extract_strided_slice %158 {offsets = [0, 0], sizes = [8, 128], strides = [1, 1]} : vector<8x512xf32> to vector<8x128xf32>
    %160 = arith.negf %159 : vector<8x128xf32>
    %161 = math.exp %160 : vector<8x128xf32>
    %cst_78 = arith.constant 1.000000e+00 : f32
    %162 = vector.broadcast %cst_78 : f32 to vector<8x128xf32>
    %163 = arith.addf %162, %161 : vector<8x128xf32>
    %164 = arith.divf %162, %163 : vector<8x128xf32>
    %165 = vector.extract_strided_slice %158 {offsets = [0, 128], sizes = [8, 128], strides = [1, 1]} : vector<8x512xf32> to vector<8x128xf32>
    %166 = arith.negf %165 : vector<8x128xf32>
    %167 = math.exp %166 : vector<8x128xf32>
    %cst_79 = arith.constant 1.000000e+00 : f32
    %168 = vector.broadcast %cst_79 : f32 to vector<8x128xf32>
    %169 = arith.addf %168, %167 : vector<8x128xf32>
    %170 = arith.divf %168, %169 : vector<8x128xf32>
    %171 = vector.extract_strided_slice %158 {offsets = [0, 256], sizes = [8, 128], strides = [1, 1]} : vector<8x512xf32> to vector<8x128xf32>
    %172 = math.tanh %171 : vector<8x128xf32>
    %173 = vector.extract_strided_slice %158 {offsets = [0, 384], sizes = [8, 128], strides = [1, 1]} : vector<8x512xf32> to vector<8x128xf32>
    %174 = arith.negf %173 : vector<8x128xf32>
    %175 = math.exp %174 : vector<8x128xf32>
    %cst_80 = arith.constant 1.000000e+00 : f32
    %176 = vector.broadcast %cst_80 : f32 to vector<8x128xf32>
    %177 = arith.addf %176, %175 : vector<8x128xf32>
    %178 = arith.divf %176, %177 : vector<8x128xf32>
    %179 = arith.mulf %170, %147 : vector<8x128xf32>
    %180 = arith.mulf %164, %172 : vector<8x128xf32>
    %181 = arith.addf %179, %180 : vector<8x128xf32>
    %182 = math.tanh %181 : vector<8x128xf32>
    %183 = arith.mulf %178, %182 : vector<8x128xf32>
    %c4_81 = arith.constant 4 : index
    %c0_82 = arith.constant 0 : index
    %c0_83 = arith.constant 0 : index
    %184 = vector.load %arg12[%c4_81, %c0_82, %c0_83] : memref<8x8x128xf32, #tpu.memory_space<vmem>>, vector<1x8x128xf32>
    %185 = vector.shape_cast %184 : vector<1x8x128xf32> to vector<8x128xf32>
    %186 = vector.shape_cast %183 : vector<8x128xf32> to vector<1x8x128xf32>
    tpu.vector_store %arg12[%c4_81, %c0_82, %c0_83], %186 {strides = array<i32>} : memref<8x8x128xf32, #tpu.memory_space<vmem>>, vector<1x8x128xf32>,
    %c5 = arith.constant 5 : index
    %c0_84 = arith.constant 0 : index
    %c0_85 = arith.constant 0 : index
    %187 = vector.load %arg13[%c5, %c0_84, %c0_85] : memref<8x8x512xf32, #tpu.memory_space<vmem>>, vector<1x8x512xf32>
    %188 = vector.shape_cast %187 : vector<1x8x512xf32> to vector<8x512xf32>
    %c0_86 = arith.constant 0 : index
    %c0_87 = arith.constant 0 : index
    %c0_88 = arith.constant 0 : index
    %189 = vector.load %arg3[%c0_86, %c0_87, %c0_88] : memref<2x128x512xf32, #tpu.memory_space<vmem>>, vector<1x128x512xf32>
    %190 = vector.shape_cast %189 : vector<1x128x512xf32> to vector<128x512xf32>
    %cst_89 = arith.constant dense<0.000000e+00> : vector<8x512xf32>
    %191 = tpu.matmul %183, %190, %cst_89 {dimension_numbers = #tpu.dot_dimension_numbers<[1], [0], [0], [1], [0, 0, 1, 1], [], []>} : vector<8x128xf32>, vector<128x512xf32>, vector<8x512xf32> -> vector<8x512xf32>
    %192 = arith.addf %188, %191 : vector<8x512xf32>
    %193 = vector.extract_strided_slice %192 {offsets = [0, 0], sizes = [8, 128], strides = [1, 1]} : vector<8x512xf32> to vector<8x128xf32>
    %194 = arith.negf %193 : vector<8x128xf32>
    %195 = math.exp %194 : vector<8x128xf32>
    %cst_90 = arith.constant 1.000000e+00 : f32
    %196 = vector.broadcast %cst_90 : f32 to vector<8x128xf32>
    %197 = arith.addf %196, %195 : vector<8x128xf32>
    %198 = arith.divf %196, %197 : vector<8x128xf32>
    %199 = vector.extract_strided_slice %192 {offsets = [0, 128], sizes = [8, 128], strides = [1, 1]} : vector<8x512xf32> to vector<8x128xf32>
    %200 = arith.negf %199 : vector<8x128xf32>
    %201 = math.exp %200 : vector<8x128xf32>
    %cst_91 = arith.constant 1.000000e+00 : f32
    %202 = vector.broadcast %cst_91 : f32 to vector<8x128xf32>
    %203 = arith.addf %202, %201 : vector<8x128xf32>
    %204 = arith.divf %202, %203 : vector<8x128xf32>
    %205 = vector.extract_strided_slice %192 {offsets = [0, 256], sizes = [8, 128], strides = [1, 1]} : vector<8x512xf32> to vector<8x128xf32>
    %206 = math.tanh %205 : vector<8x128xf32>
    %207 = vector.extract_strided_slice %192 {offsets = [0, 384], sizes = [8, 128], strides = [1, 1]} : vector<8x512xf32> to vector<8x128xf32>
    %208 = arith.negf %207 : vector<8x128xf32>
    %209 = math.exp %208 : vector<8x128xf32>
    %cst_92 = arith.constant 1.000000e+00 : f32
    %210 = vector.broadcast %cst_92 : f32 to vector<8x128xf32>
    %211 = arith.addf %210, %209 : vector<8x128xf32>
    %212 = arith.divf %210, %211 : vector<8x128xf32>
    %213 = arith.mulf %204, %181 : vector<8x128xf32>
    %214 = arith.mulf %198, %206 : vector<8x128xf32>
    %215 = arith.addf %213, %214 : vector<8x128xf32>
    %216 = math.tanh %215 : vector<8x128xf32>
    %217 = arith.mulf %212, %216 : vector<8x128xf32>
    %c5_93 = arith.constant 5 : index
    %c0_94 = arith.constant 0 : index
    %c0_95 = arith.constant 0 : index
    %218 = vector.load %arg12[%c5_93, %c0_94, %c0_95] : memref<8x8x128xf32, #tpu.memory_space<vmem>>, vector<1x8x128xf32>
    %219 = vector.shape_cast %218 : vector<1x8x128xf32> to vector<8x128xf32>
    %220 = vector.shape_cast %217 : vector<8x128xf32> to vector<1x8x128xf32>
    tpu.vector_store %arg12[%c5_93, %c0_94, %c0_95], %220 {strides = array<i32>} : memref<8x8x128xf32, #tpu.memory_space<vmem>>, vector<1x8x128xf32>,
    %c6 = arith.constant 6 : index
    %c0_96 = arith.constant 0 : index
    %c0_97 = arith.constant 0 : index
    %221 = vector.load %arg13[%c6, %c0_96, %c0_97] : memref<8x8x512xf32, #tpu.memory_space<vmem>>, vector<1x8x512xf32>
    %222 = vector.shape_cast %221 : vector<1x8x512xf32> to vector<8x512xf32>
    %c0_98 = arith.constant 0 : index
    %c0_99 = arith.constant 0 : index
    %c0_100 = arith.constant 0 : index
    %223 = vector.load %arg3[%c0_98, %c0_99, %c0_100] : memref<2x128x512xf32, #tpu.memory_space<vmem>>, vector<1x128x512xf32>
    %224 = vector.shape_cast %223 : vector<1x128x512xf32> to vector<128x512xf32>
    %cst_101 = arith.constant dense<0.000000e+00> : vector<8x512xf32>
    %225 = tpu.matmul %217, %224, %cst_101 {dimension_numbers = #tpu.dot_dimension_numbers<[1], [0], [0], [1], [0, 0, 1, 1], [], []>} : vector<8x128xf32>, vector<128x512xf32>, vector<8x512xf32> -> vector<8x512xf32>
    %226 = arith.addf %222, %225 : vector<8x512xf32>
    %227 = vector.extract_strided_slice %226 {offsets = [0, 0], sizes = [8, 128], strides = [1, 1]} : vector<8x512xf32> to vector<8x128xf32>
    %228 = arith.negf %227 : vector<8x128xf32>
    %229 = math.exp %228 : vector<8x128xf32>
    %cst_102 = arith.constant 1.000000e+00 : f32
    %230 = vector.broadcast %cst_102 : f32 to vector<8x128xf32>
    %231 = arith.addf %230, %229 : vector<8x128xf32>
    %232 = arith.divf %230, %231 : vector<8x128xf32>
    %233 = vector.extract_strided_slice %226 {offsets = [0, 128], sizes = [8, 128], strides = [1, 1]} : vector<8x512xf32> to vector<8x128xf32>
    %234 = arith.negf %233 : vector<8x128xf32>
    %235 = math.exp %234 : vector<8x128xf32>
    %cst_103 = arith.constant 1.000000e+00 : f32
    %236 = vector.broadcast %cst_103 : f32 to vector<8x128xf32>
    %237 = arith.addf %236, %235 : vector<8x128xf32>
    %238 = arith.divf %236, %237 : vector<8x128xf32>
    %239 = vector.extract_strided_slice %226 {offsets = [0, 256], sizes = [8, 128], strides = [1, 1]} : vector<8x512xf32> to vector<8x128xf32>
    %240 = math.tanh %239 : vector<8x128xf32>
    %241 = vector.extract_strided_slice %226 {offsets = [0, 384], sizes = [8, 128], strides = [1, 1]} : vector<8x512xf32> to vector<8x128xf32>
    %242 = arith.negf %241 : vector<8x128xf32>
    %243 = math.exp %242 : vector<8x128xf32>
    %cst_104 = arith.constant 1.000000e+00 : f32
    %244 = vector.broadcast %cst_104 : f32 to vector<8x128xf32>
    %245 = arith.addf %244, %243 : vector<8x128xf32>
    %246 = arith.divf %244, %245 : vector<8x128xf32>
    %247 = arith.mulf %238, %215 : vector<8x128xf32>
    %248 = arith.mulf %232, %240 : vector<8x128xf32>
    %249 = arith.addf %247, %248 : vector<8x128xf32>
    %250 = math.tanh %249 : vector<8x128xf32>
    %251 = arith.mulf %246, %250 : vector<8x128xf32>
    %c6_105 = arith.constant 6 : index
    %c0_106 = arith.constant 0 : index
    %c0_107 = arith.constant 0 : index
    %252 = vector.load %arg12[%c6_105, %c0_106, %c0_107] : memref<8x8x128xf32, #tpu.memory_space<vmem>>, vector<1x8x128xf32>
    %253 = vector.shape_cast %252 : vector<1x8x128xf32> to vector<8x128xf32>
    %254 = vector.shape_cast %251 : vector<8x128xf32> to vector<1x8x128xf32>
    tpu.vector_store %arg12[%c6_105, %c0_106, %c0_107], %254 {strides = array<i32>} : memref<8x8x128xf32, #tpu.memory_space<vmem>>, vector<1x8x128xf32>,
    %c7 = arith.constant 7 : index
    %c0_108 = arith.constant 0 : index
    %c0_109 = arith.constant 0 : index
    %255 = vector.load %arg13[%c7, %c0_108, %c0_109] : memref<8x8x512xf32, #tpu.memory_space<vmem>>, vector<1x8x512xf32>
    %256 = vector.shape_cast %255 : vector<1x8x512xf32> to vector<8x512xf32>
    %c0_110 = arith.constant 0 : index
    %c0_111 = arith.constant 0 : index
    %c0_112 = arith.constant 0 : index
    %257 = vector.load %arg3[%c0_110, %c0_111, %c0_112] : memref<2x128x512xf32, #tpu.memory_space<vmem>>, vector<1x128x512xf32>
    %258 = vector.shape_cast %257 : vector<1x128x512xf32> to vector<128x512xf32>
    %cst_113 = arith.constant dense<0.000000e+00> : vector<8x512xf32>
    %259 = tpu.matmul %251, %258, %cst_113 {dimension_numbers = #tpu.dot_dimension_numbers<[1], [0], [0], [1], [0, 0, 1, 1], [], []>} : vector<8x128xf32>, vector<128x512xf32>, vector<8x512xf32> -> vector<8x512xf32>
    %260 = arith.addf %256, %259 : vector<8x512xf32>
    %261 = vector.extract_strided_slice %260 {offsets = [0, 0], sizes = [8, 128], strides = [1, 1]} : vector<8x512xf32> to vector<8x128xf32>
    %262 = arith.negf %261 : vector<8x128xf32>
    %263 = math.exp %262 : vector<8x128xf32>
    %cst_114 = arith.constant 1.000000e+00 : f32
    %264 = vector.broadcast %cst_114 : f32 to vector<8x128xf32>
    %265 = arith.addf %264, %263 : vector<8x128xf32>
    %266 = arith.divf %264, %265 : vector<8x128xf32>
    %267 = vector.extract_strided_slice %260 {offsets = [0, 128], sizes = [8, 128], strides = [1, 1]} : vector<8x512xf32> to vector<8x128xf32>
    %268 = arith.negf %267 : vector<8x128xf32>
    %269 = math.exp %268 : vector<8x128xf32>
    %cst_115 = arith.constant 1.000000e+00 : f32
    %270 = vector.broadcast %cst_115 : f32 to vector<8x128xf32>
    %271 = arith.addf %270, %269 : vector<8x128xf32>
    %272 = arith.divf %270, %271 : vector<8x128xf32>
    %273 = vector.extract_strided_slice %260 {offsets = [0, 256], sizes = [8, 128], strides = [1, 1]} : vector<8x512xf32> to vector<8x128xf32>
    %274 = math.tanh %273 : vector<8x128xf32>
    %275 = vector.extract_strided_slice %260 {offsets = [0, 384], sizes = [8, 128], strides = [1, 1]} : vector<8x512xf32> to vector<8x128xf32>
    %276 = arith.negf %275 : vector<8x128xf32>
    %277 = math.exp %276 : vector<8x128xf32>
    %cst_116 = arith.constant 1.000000e+00 : f32
    %278 = vector.broadcast %cst_116 : f32 to vector<8x128xf32>
    %279 = arith.addf %278, %277 : vector<8x128xf32>
    %280 = arith.divf %278, %279 : vector<8x128xf32>
    %281 = arith.mulf %272, %249 : vector<8x128xf32>
    %282 = arith.mulf %266, %274 : vector<8x128xf32>
    %283 = arith.addf %281, %282 : vector<8x128xf32>
    %284 = math.tanh %283 : vector<8x128xf32>
    %285 = arith.mulf %280, %284 : vector<8x128xf32>
    %c7_117 = arith.constant 7 : index
    %c0_118 = arith.constant 0 : index
    %c0_119 = arith.constant 0 : index
    %286 = vector.load %arg12[%c7_117, %c0_118, %c0_119] : memref<8x8x128xf32, #tpu.memory_space<vmem>>, vector<1x8x128xf32>
    %287 = vector.shape_cast %286 : vector<1x8x128xf32> to vector<8x128xf32>
    %288 = vector.shape_cast %285 : vector<8x128xf32> to vector<1x8x128xf32>
    tpu.vector_store %arg12[%c7_117, %c0_118, %c0_119], %288 {strides = array<i32>} : memref<8x8x128xf32, #tpu.memory_space<vmem>>, vector<1x8x128xf32>,
    %c0_120 = arith.constant 0 : index
    %c0_121 = arith.constant 0 : index
    %c0_122 = arith.constant 0 : index
    %289 = vector.load %arg10[%c0_120, %c0_121, %c0_122] : memref<2x8x128xf32, #tpu.memory_space<vmem>>, vector<1x8x128xf32>
    %290 = vector.shape_cast %289 : vector<1x8x128xf32> to vector<8x128xf32>
    %291 = vector.shape_cast %285 : vector<8x128xf32> to vector<1x8x128xf32>
    tpu.vector_store %arg10[%c0_120, %c0_121, %c0_122], %291 {strides = array<i32>} : memref<2x8x128xf32, #tpu.memory_space<vmem>>, vector<1x8x128xf32>,
    %c0_123 = arith.constant 0 : index
    %c0_124 = arith.constant 0 : index
    %c0_125 = arith.constant 0 : index
    %292 = vector.load %arg11[%c0_123, %c0_124, %c0_125] : memref<2x8x128xf32, #tpu.memory_space<vmem>>, vector<1x8x128xf32>
    %293 = vector.shape_cast %292 : vector<1x8x128xf32> to vector<8x128xf32>
    %294 = vector.shape_cast %283 : vector<8x128xf32> to vector<1x8x128xf32>
    tpu.vector_store %arg11[%c0_123, %c0_124, %c0_125], %294 {strides = array<i32>} : memref<2x8x128xf32, #tpu.memory_space<vmem>>, vector<1x8x128xf32>,
    %c0_126 = arith.constant 0 : index
    %c0_127 = arith.constant 0 : index
    %c0_128 = arith.constant 0 : index
    %295 = vector.load %arg12[%c0_126, %c0_127, %c0_128] : memref<8x8x128xf32, #tpu.memory_space<vmem>>, vector<8x8x128xf32>
    %296 = vector.shape_cast %295 : vector<8x8x128xf32> to vector<64x128xf32>
    %c1_129 = arith.constant 1 : index
    %c0_130 = arith.constant 0 : index
    %c0_131 = arith.constant 0 : index
    %297 = vector.load %arg2[%c1_129, %c0_130, %c0_131] : memref<2x128x512xf32, #tpu.memory_space<vmem>>, vector<1x128x512xf32>
    %298 = vector.shape_cast %297 : vector<1x128x512xf32> to vector<128x512xf32>
    %cst_132 = arith.constant dense<0.000000e+00> : vector<64x512xf32>
    %299 = tpu.matmul %296, %298, %cst_132 {dimension_numbers = #tpu.dot_dimension_numbers<[1], [0], [0], [1], [0, 0, 1, 1], [], []>} : vector<64x128xf32>, vector<128x512xf32>, vector<64x512xf32> -> vector<64x512xf32>
    %c1_133 = arith.constant 1 : index
    %c0_134 = arith.constant 0 : index
    %c0_135 = arith.constant 0 : index
    %300 = vector.load %arg4[%c1_133, %c0_134, %c0_135] : memref<2x1x512xf32, #tpu.memory_space<vmem>>, vector<1x1x512xf32>
    %301 = vector.shape_cast %300 : vector<1x1x512xf32> to vector<1x512xf32>
    %302 = vector.broadcast %301 : vector<1x512xf32> to vector<64x512xf32>
    %303 = arith.addf %299, %302 : vector<64x512xf32>
    %304 = vector.shape_cast %303 : vector<64x512xf32> to vector<8x8x512xf32>
    %c0_136 = arith.constant 0 : index
    %c0_137 = arith.constant 0 : index
    %c0_138 = arith.constant 0 : index
    %305 = vector.load %arg13[%c0_136, %c0_137, %c0_138] : memref<8x8x512xf32, #tpu.memory_space<vmem>>, vector<8x8x512xf32>
    tpu.vector_store %arg13[%c0_136, %c0_137, %c0_138], %304 {strides = array<i32>} : memref<8x8x512xf32, #tpu.memory_space<vmem>>, vector<8x8x512xf32>,
    %c1_139 = arith.constant 1 : index
    %c0_140 = arith.constant 0 : index
    %c0_141 = arith.constant 0 : index
    %306 = vector.load %arg5[%c1_139, %c0_140, %c0_141] : memref<2x8x128xf32, #tpu.memory_space<vmem>>, vector<1x8x128xf32>
    %307 = vector.shape_cast %306 : vector<1x8x128xf32> to vector<8x128xf32>
    %c1_142 = arith.constant 1 : index
    %c0_143 = arith.constant 0 : index
    %c0_144 = arith.constant 0 : index
    %308 = vector.load %arg6[%c1_142, %c0_143, %c0_144] : memref<2x8x128xf32, #tpu.memory_space<vmem>>, vector<1x8x128xf32>
    %309 = vector.shape_cast %308 : vector<1x8x128xf32> to vector<8x128xf32>
    %c0_145 = arith.constant 0 : index
    %c0_146 = arith.constant 0 : index
    %c0_147 = arith.constant 0 : index
    %310 = vector.load %arg13[%c0_145, %c0_146, %c0_147] : memref<8x8x512xf32, #tpu.memory_space<vmem>>, vector<1x8x512xf32>
    %311 = vector.shape_cast %310 : vector<1x8x512xf32> to vector<8x512xf32>
    %c1_148 = arith.constant 1 : index
    %c0_149 = arith.constant 0 : index
    %c0_150 = arith.constant 0 : index
    %312 = vector.load %arg3[%c1_148, %c0_149, %c0_150] : memref<2x128x512xf32, #tpu.memory_space<vmem>>, vector<1x128x512xf32>
    %313 = vector.shape_cast %312 : vector<1x128x512xf32> to vector<128x512xf32>
    %cst_151 = arith.constant dense<0.000000e+00> : vector<8x512xf32>
    %314 = tpu.matmul %307, %313, %cst_151 {dimension_numbers = #tpu.dot_dimension_numbers<[1], [0], [0], [1], [0, 0, 1, 1], [], []>} : vector<8x128xf32>, vector<128x512xf32>, vector<8x512xf32> -> vector<8x512xf32>
    %315 = arith.addf %311, %314 : vector<8x512xf32>
    %316 = vector.extract_strided_slice %315 {offsets = [0, 0], sizes = [8, 128], strides = [1, 1]} : vector<8x512xf32> to vector<8x128xf32>
    %317 = arith.negf %316 : vector<8x128xf32>
    %318 = math.exp %317 : vector<8x128xf32>
    %cst_152 = arith.constant 1.000000e+00 : f32
    %319 = vector.broadcast %cst_152 : f32 to vector<8x128xf32>
    %320 = arith.addf %319, %318 : vector<8x128xf32>
    %321 = arith.divf %319, %320 : vector<8x128xf32>
    %322 = vector.extract_strided_slice %315 {offsets = [0, 128], sizes = [8, 128], strides = [1, 1]} : vector<8x512xf32> to vector<8x128xf32>
    %323 = arith.negf %322 : vector<8x128xf32>
    %324 = math.exp %323 : vector<8x128xf32>
    %cst_153 = arith.constant 1.000000e+00 : f32
    %325 = vector.broadcast %cst_153 : f32 to vector<8x128xf32>
    %326 = arith.addf %325, %324 : vector<8x128xf32>
    %327 = arith.divf %325, %326 : vector<8x128xf32>
    %328 = vector.extract_strided_slice %315 {offsets = [0, 256], sizes = [8, 128], strides = [1, 1]} : vector<8x512xf32> to vector<8x128xf32>
    %329 = math.tanh %328 : vector<8x128xf32>
    %330 = vector.extract_strided_slice %315 {offsets = [0, 384], sizes = [8, 128], strides = [1, 1]} : vector<8x512xf32> to vector<8x128xf32>
    %331 = arith.negf %330 : vector<8x128xf32>
    %332 = math.exp %331 : vector<8x128xf32>
    %cst_154 = arith.constant 1.000000e+00 : f32
    %333 = vector.broadcast %cst_154 : f32 to vector<8x128xf32>
    %334 = arith.addf %333, %332 : vector<8x128xf32>
    %335 = arith.divf %333, %334 : vector<8x128xf32>
    %336 = arith.mulf %327, %309 : vector<8x128xf32>
    %337 = arith.mulf %321, %329 : vector<8x128xf32>
    %338 = arith.addf %336, %337 : vector<8x128xf32>
    %339 = math.tanh %338 : vector<8x128xf32>
    %340 = arith.mulf %335, %339 : vector<8x128xf32>
    %c0_155 = arith.constant 0 : index
    %c0_156 = arith.constant 0 : index
    %c0_157 = arith.constant 0 : index
    %341 = vector.load %arg12[%c0_155, %c0_156, %c0_157] : memref<8x8x128xf32, #tpu.memory_space<vmem>>, vector<1x8x128xf32>
    %342 = vector.shape_cast %341 : vector<1x8x128xf32> to vector<8x128xf32>
    %343 = vector.shape_cast %340 : vector<8x128xf32> to vector<1x8x128xf32>
    tpu.vector_store %arg12[%c0_155, %c0_156, %c0_157], %343 {strides = array<i32>} : memref<8x8x128xf32, #tpu.memory_space<vmem>>, vector<1x8x128xf32>,
    %c1_158 = arith.constant 1 : index
    %c0_159 = arith.constant 0 : index
    %c0_160 = arith.constant 0 : index
    %344 = vector.load %arg13[%c1_158, %c0_159, %c0_160] : memref<8x8x512xf32, #tpu.memory_space<vmem>>, vector<1x8x512xf32>
    %345 = vector.shape_cast %344 : vector<1x8x512xf32> to vector<8x512xf32>
    %c1_161 = arith.constant 1 : index
    %c0_162 = arith.constant 0 : index
    %c0_163 = arith.constant 0 : index
    %346 = vector.load %arg3[%c1_161, %c0_162, %c0_163] : memref<2x128x512xf32, #tpu.memory_space<vmem>>, vector<1x128x512xf32>
    %347 = vector.shape_cast %346 : vector<1x128x512xf32> to vector<128x512xf32>
    %cst_164 = arith.constant dense<0.000000e+00> : vector<8x512xf32>
    %348 = tpu.matmul %340, %347, %cst_164 {dimension_numbers = #tpu.dot_dimension_numbers<[1], [0], [0], [1], [0, 0, 1, 1], [], []>} : vector<8x128xf32>, vector<128x512xf32>, vector<8x512xf32> -> vector<8x512xf32>
    %349 = arith.addf %345, %348 : vector<8x512xf32>
    %350 = vector.extract_strided_slice %349 {offsets = [0, 0], sizes = [8, 128], strides = [1, 1]} : vector<8x512xf32> to vector<8x128xf32>
    %351 = arith.negf %350 : vector<8x128xf32>
    %352 = math.exp %351 : vector<8x128xf32>
    %cst_165 = arith.constant 1.000000e+00 : f32
    %353 = vector.broadcast %cst_165 : f32 to vector<8x128xf32>
    %354 = arith.addf %353, %352 : vector<8x128xf32>
    %355 = arith.divf %353, %354 : vector<8x128xf32>
    %356 = vector.extract_strided_slice %349 {offsets = [0, 128], sizes = [8, 128], strides = [1, 1]} : vector<8x512xf32> to vector<8x128xf32>
    %357 = arith.negf %356 : vector<8x128xf32>
    %358 = math.exp %357 : vector<8x128xf32>
    %cst_166 = arith.constant 1.000000e+00 : f32
    %359 = vector.broadcast %cst_166 : f32 to vector<8x128xf32>
    %360 = arith.addf %359, %358 : vector<8x128xf32>
    %361 = arith.divf %359, %360 : vector<8x128xf32>
    %362 = vector.extract_strided_slice %349 {offsets = [0, 256], sizes = [8, 128], strides = [1, 1]} : vector<8x512xf32> to vector<8x128xf32>
    %363 = math.tanh %362 : vector<8x128xf32>
    %364 = vector.extract_strided_slice %349 {offsets = [0, 384], sizes = [8, 128], strides = [1, 1]} : vector<8x512xf32> to vector<8x128xf32>
    %365 = arith.negf %364 : vector<8x128xf32>
    %366 = math.exp %365 : vector<8x128xf32>
    %cst_167 = arith.constant 1.000000e+00 : f32
    %367 = vector.broadcast %cst_167 : f32 to vector<8x128xf32>
    %368 = arith.addf %367, %366 : vector<8x128xf32>
    %369 = arith.divf %367, %368 : vector<8x128xf32>
    %370 = arith.mulf %361, %338 : vector<8x128xf32>
    %371 = arith.mulf %355, %363 : vector<8x128xf32>
    %372 = arith.addf %370, %371 : vector<8x128xf32>
    %373 = math.tanh %372 : vector<8x128xf32>
    %374 = arith.mulf %369, %373 : vector<8x128xf32>
    %c1_168 = arith.constant 1 : index
    %c0_169 = arith.constant 0 : index
    %c0_170 = arith.constant 0 : index
    %375 = vector.load %arg12[%c1_168, %c0_169, %c0_170] : memref<8x8x128xf32, #tpu.memory_space<vmem>>, vector<1x8x128xf32>
    %376 = vector.shape_cast %375 : vector<1x8x128xf32> to vector<8x128xf32>
    %377 = vector.shape_cast %374 : vector<8x128xf32> to vector<1x8x128xf32>
    tpu.vector_store %arg12[%c1_168, %c0_169, %c0_170], %377 {strides = array<i32>} : memref<8x8x128xf32, #tpu.memory_space<vmem>>, vector<1x8x128xf32>,
    %c2_171 = arith.constant 2 : index
    %c0_172 = arith.constant 0 : index
    %c0_173 = arith.constant 0 : index
    %378 = vector.load %arg13[%c2_171, %c0_172, %c0_173] : memref<8x8x512xf32, #tpu.memory_space<vmem>>, vector<1x8x512xf32>
    %379 = vector.shape_cast %378 : vector<1x8x512xf32> to vector<8x512xf32>
    %c1_174 = arith.constant 1 : index
    %c0_175 = arith.constant 0 : index
    %c0_176 = arith.constant 0 : index
    %380 = vector.load %arg3[%c1_174, %c0_175, %c0_176] : memref<2x128x512xf32, #tpu.memory_space<vmem>>, vector<1x128x512xf32>
    %381 = vector.shape_cast %380 : vector<1x128x512xf32> to vector<128x512xf32>
    %cst_177 = arith.constant dense<0.000000e+00> : vector<8x512xf32>
    %382 = tpu.matmul %374, %381, %cst_177 {dimension_numbers = #tpu.dot_dimension_numbers<[1], [0], [0], [1], [0, 0, 1, 1], [], []>} : vector<8x128xf32>, vector<128x512xf32>, vector<8x512xf32> -> vector<8x512xf32>
    %383 = arith.addf %379, %382 : vector<8x512xf32>
    %384 = vector.extract_strided_slice %383 {offsets = [0, 0], sizes = [8, 128], strides = [1, 1]} : vector<8x512xf32> to vector<8x128xf32>
    %385 = arith.negf %384 : vector<8x128xf32>
    %386 = math.exp %385 : vector<8x128xf32>
    %cst_178 = arith.constant 1.000000e+00 : f32
    %387 = vector.broadcast %cst_178 : f32 to vector<8x128xf32>
    %388 = arith.addf %387, %386 : vector<8x128xf32>
    %389 = arith.divf %387, %388 : vector<8x128xf32>
    %390 = vector.extract_strided_slice %383 {offsets = [0, 128], sizes = [8, 128], strides = [1, 1]} : vector<8x512xf32> to vector<8x128xf32>
    %391 = arith.negf %390 : vector<8x128xf32>
    %392 = math.exp %391 : vector<8x128xf32>
    %cst_179 = arith.constant 1.000000e+00 : f32
    %393 = vector.broadcast %cst_179 : f32 to vector<8x128xf32>
    %394 = arith.addf %393, %392 : vector<8x128xf32>
    %395 = arith.divf %393, %394 : vector<8x128xf32>
    %396 = vector.extract_strided_slice %383 {offsets = [0, 256], sizes = [8, 128], strides = [1, 1]} : vector<8x512xf32> to vector<8x128xf32>
    %397 = math.tanh %396 : vector<8x128xf32>
    %398 = vector.extract_strided_slice %383 {offsets = [0, 384], sizes = [8, 128], strides = [1, 1]} : vector<8x512xf32> to vector<8x128xf32>
    %399 = arith.negf %398 : vector<8x128xf32>
    %400 = math.exp %399 : vector<8x128xf32>
    %cst_180 = arith.constant 1.000000e+00 : f32
    %401 = vector.broadcast %cst_180 : f32 to vector<8x128xf32>
    %402 = arith.addf %401, %400 : vector<8x128xf32>
    %403 = arith.divf %401, %402 : vector<8x128xf32>
    %404 = arith.mulf %395, %372 : vector<8x128xf32>
    %405 = arith.mulf %389, %397 : vector<8x128xf32>
    %406 = arith.addf %404, %405 : vector<8x128xf32>
    %407 = math.tanh %406 : vector<8x128xf32>
    %408 = arith.mulf %403, %407 : vector<8x128xf32>
    %c2_181 = arith.constant 2 : index
    %c0_182 = arith.constant 0 : index
    %c0_183 = arith.constant 0 : index
    %409 = vector.load %arg12[%c2_181, %c0_182, %c0_183] : memref<8x8x128xf32, #tpu.memory_space<vmem>>, vector<1x8x128xf32>
    %410 = vector.shape_cast %409 : vector<1x8x128xf32> to vector<8x128xf32>
    %411 = vector.shape_cast %408 : vector<8x128xf32> to vector<1x8x128xf32>
    tpu.vector_store %arg12[%c2_181, %c0_182, %c0_183], %411 {strides = array<i32>} : memref<8x8x128xf32, #tpu.memory_space<vmem>>, vector<1x8x128xf32>,
    %c3_184 = arith.constant 3 : index
    %c0_185 = arith.constant 0 : index
    %c0_186 = arith.constant 0 : index
    %412 = vector.load %arg13[%c3_184, %c0_185, %c0_186] : memref<8x8x512xf32, #tpu.memory_space<vmem>>, vector<1x8x512xf32>
    %413 = vector.shape_cast %412 : vector<1x8x512xf32> to vector<8x512xf32>
    %c1_187 = arith.constant 1 : index
    %c0_188 = arith.constant 0 : index
    %c0_189 = arith.constant 0 : index
    %414 = vector.load %arg3[%c1_187, %c0_188, %c0_189] : memref<2x128x512xf32, #tpu.memory_space<vmem>>, vector<1x128x512xf32>
    %415 = vector.shape_cast %414 : vector<1x128x512xf32> to vector<128x512xf32>
    %cst_190 = arith.constant dense<0.000000e+00> : vector<8x512xf32>
    %416 = tpu.matmul %408, %415, %cst_190 {dimension_numbers = #tpu.dot_dimension_numbers<[1], [0], [0], [1], [0, 0, 1, 1], [], []>} : vector<8x128xf32>, vector<128x512xf32>, vector<8x512xf32> -> vector<8x512xf32>
    %417 = arith.addf %413, %416 : vector<8x512xf32>
    %418 = vector.extract_strided_slice %417 {offsets = [0, 0], sizes = [8, 128], strides = [1, 1]} : vector<8x512xf32> to vector<8x128xf32>
    %419 = arith.negf %418 : vector<8x128xf32>
    %420 = math.exp %419 : vector<8x128xf32>
    %cst_191 = arith.constant 1.000000e+00 : f32
    %421 = vector.broadcast %cst_191 : f32 to vector<8x128xf32>
    %422 = arith.addf %421, %420 : vector<8x128xf32>
    %423 = arith.divf %421, %422 : vector<8x128xf32>
    %424 = vector.extract_strided_slice %417 {offsets = [0, 128], sizes = [8, 128], strides = [1, 1]} : vector<8x512xf32> to vector<8x128xf32>
    %425 = arith.negf %424 : vector<8x128xf32>
    %426 = math.exp %425 : vector<8x128xf32>
    %cst_192 = arith.constant 1.000000e+00 : f32
    %427 = vector.broadcast %cst_192 : f32 to vector<8x128xf32>
    %428 = arith.addf %427, %426 : vector<8x128xf32>
    %429 = arith.divf %427, %428 : vector<8x128xf32>
    %430 = vector.extract_strided_slice %417 {offsets = [0, 256], sizes = [8, 128], strides = [1, 1]} : vector<8x512xf32> to vector<8x128xf32>
    %431 = math.tanh %430 : vector<8x128xf32>
    %432 = vector.extract_strided_slice %417 {offsets = [0, 384], sizes = [8, 128], strides = [1, 1]} : vector<8x512xf32> to vector<8x128xf32>
    %433 = arith.negf %432 : vector<8x128xf32>
    %434 = math.exp %433 : vector<8x128xf32>
    %cst_193 = arith.constant 1.000000e+00 : f32
    %435 = vector.broadcast %cst_193 : f32 to vector<8x128xf32>
    %436 = arith.addf %435, %434 : vector<8x128xf32>
    %437 = arith.divf %435, %436 : vector<8x128xf32>
    %438 = arith.mulf %429, %406 : vector<8x128xf32>
    %439 = arith.mulf %423, %431 : vector<8x128xf32>
    %440 = arith.addf %438, %439 : vector<8x128xf32>
    %441 = math.tanh %440 : vector<8x128xf32>
    %442 = arith.mulf %437, %441 : vector<8x128xf32>
    %c3_194 = arith.constant 3 : index
    %c0_195 = arith.constant 0 : index
    %c0_196 = arith.constant 0 : index
    %443 = vector.load %arg12[%c3_194, %c0_195, %c0_196] : memref<8x8x128xf32, #tpu.memory_space<vmem>>, vector<1x8x128xf32>
    %444 = vector.shape_cast %443 : vector<1x8x128xf32> to vector<8x128xf32>
    %445 = vector.shape_cast %442 : vector<8x128xf32> to vector<1x8x128xf32>
    tpu.vector_store %arg12[%c3_194, %c0_195, %c0_196], %445 {strides = array<i32>} : memref<8x8x128xf32, #tpu.memory_space<vmem>>, vector<1x8x128xf32>,
    %c4_197 = arith.constant 4 : index
    %c0_198 = arith.constant 0 : index
    %c0_199 = arith.constant 0 : index
    %446 = vector.load %arg13[%c4_197, %c0_198, %c0_199] : memref<8x8x512xf32, #tpu.memory_space<vmem>>, vector<1x8x512xf32>
    %447 = vector.shape_cast %446 : vector<1x8x512xf32> to vector<8x512xf32>
    %c1_200 = arith.constant 1 : index
    %c0_201 = arith.constant 0 : index
    %c0_202 = arith.constant 0 : index
    %448 = vector.load %arg3[%c1_200, %c0_201, %c0_202] : memref<2x128x512xf32, #tpu.memory_space<vmem>>, vector<1x128x512xf32>
    %449 = vector.shape_cast %448 : vector<1x128x512xf32> to vector<128x512xf32>
    %cst_203 = arith.constant dense<0.000000e+00> : vector<8x512xf32>
    %450 = tpu.matmul %442, %449, %cst_203 {dimension_numbers = #tpu.dot_dimension_numbers<[1], [0], [0], [1], [0, 0, 1, 1], [], []>} : vector<8x128xf32>, vector<128x512xf32>, vector<8x512xf32> -> vector<8x512xf32>
    %451 = arith.addf %447, %450 : vector<8x512xf32>
    %452 = vector.extract_strided_slice %451 {offsets = [0, 0], sizes = [8, 128], strides = [1, 1]} : vector<8x512xf32> to vector<8x128xf32>
    %453 = arith.negf %452 : vector<8x128xf32>
    %454 = math.exp %453 : vector<8x128xf32>
    %cst_204 = arith.constant 1.000000e+00 : f32
    %455 = vector.broadcast %cst_204 : f32 to vector<8x128xf32>
    %456 = arith.addf %455, %454 : vector<8x128xf32>
    %457 = arith.divf %455, %456 : vector<8x128xf32>
    %458 = vector.extract_strided_slice %451 {offsets = [0, 128], sizes = [8, 128], strides = [1, 1]} : vector<8x512xf32> to vector<8x128xf32>
    %459 = arith.negf %458 : vector<8x128xf32>
    %460 = math.exp %459 : vector<8x128xf32>
    %cst_205 = arith.constant 1.000000e+00 : f32
    %461 = vector.broadcast %cst_205 : f32 to vector<8x128xf32>
    %462 = arith.addf %461, %460 : vector<8x128xf32>
    %463 = arith.divf %461, %462 : vector<8x128xf32>
    %464 = vector.extract_strided_slice %451 {offsets = [0, 256], sizes = [8, 128], strides = [1, 1]} : vector<8x512xf32> to vector<8x128xf32>
    %465 = math.tanh %464 : vector<8x128xf32>
    %466 = vector.extract_strided_slice %451 {offsets = [0, 384], sizes = [8, 128], strides = [1, 1]} : vector<8x512xf32> to vector<8x128xf32>
    %467 = arith.negf %466 : vector<8x128xf32>
    %468 = math.exp %467 : vector<8x128xf32>
    %cst_206 = arith.constant 1.000000e+00 : f32
    %469 = vector.broadcast %cst_206 : f32 to vector<8x128xf32>
    %470 = arith.addf %469, %468 : vector<8x128xf32>
    %471 = arith.divf %469, %470 : vector<8x128xf32>
    %472 = arith.mulf %463, %440 : vector<8x128xf32>
    %473 = arith.mulf %457, %465 : vector<8x128xf32>
    %474 = arith.addf %472, %473 : vector<8x128xf32>
    %475 = math.tanh %474 : vector<8x128xf32>
    %476 = arith.mulf %471, %475 : vector<8x128xf32>
    %c4_207 = arith.constant 4 : index
    %c0_208 = arith.constant 0 : index
    %c0_209 = arith.constant 0 : index
    %477 = vector.load %arg12[%c4_207, %c0_208, %c0_209] : memref<8x8x128xf32, #tpu.memory_space<vmem>>, vector<1x8x128xf32>
    %478 = vector.shape_cast %477 : vector<1x8x128xf32> to vector<8x128xf32>
    %479 = vector.shape_cast %476 : vector<8x128xf32> to vector<1x8x128xf32>
    tpu.vector_store %arg12[%c4_207, %c0_208, %c0_209], %479 {strides = array<i32>} : memref<8x8x128xf32, #tpu.memory_space<vmem>>, vector<1x8x128xf32>,
    %c5_210 = arith.constant 5 : index
    %c0_211 = arith.constant 0 : index
    %c0_212 = arith.constant 0 : index
    %480 = vector.load %arg13[%c5_210, %c0_211, %c0_212] : memref<8x8x512xf32, #tpu.memory_space<vmem>>, vector<1x8x512xf32>
    %481 = vector.shape_cast %480 : vector<1x8x512xf32> to vector<8x512xf32>
    %c1_213 = arith.constant 1 : index
    %c0_214 = arith.constant 0 : index
    %c0_215 = arith.constant 0 : index
    %482 = vector.load %arg3[%c1_213, %c0_214, %c0_215] : memref<2x128x512xf32, #tpu.memory_space<vmem>>, vector<1x128x512xf32>
    %483 = vector.shape_cast %482 : vector<1x128x512xf32> to vector<128x512xf32>
    %cst_216 = arith.constant dense<0.000000e+00> : vector<8x512xf32>
    %484 = tpu.matmul %476, %483, %cst_216 {dimension_numbers = #tpu.dot_dimension_numbers<[1], [0], [0], [1], [0, 0, 1, 1], [], []>} : vector<8x128xf32>, vector<128x512xf32>, vector<8x512xf32> -> vector<8x512xf32>
    %485 = arith.addf %481, %484 : vector<8x512xf32>
    %486 = vector.extract_strided_slice %485 {offsets = [0, 0], sizes = [8, 128], strides = [1, 1]} : vector<8x512xf32> to vector<8x128xf32>
    %487 = arith.negf %486 : vector<8x128xf32>
    %488 = math.exp %487 : vector<8x128xf32>
    %cst_217 = arith.constant 1.000000e+00 : f32
    %489 = vector.broadcast %cst_217 : f32 to vector<8x128xf32>
    %490 = arith.addf %489, %488 : vector<8x128xf32>
    %491 = arith.divf %489, %490 : vector<8x128xf32>
    %492 = vector.extract_strided_slice %485 {offsets = [0, 128], sizes = [8, 128], strides = [1, 1]} : vector<8x512xf32> to vector<8x128xf32>
    %493 = arith.negf %492 : vector<8x128xf32>
    %494 = math.exp %493 : vector<8x128xf32>
    %cst_218 = arith.constant 1.000000e+00 : f32
    %495 = vector.broadcast %cst_218 : f32 to vector<8x128xf32>
    %496 = arith.addf %495, %494 : vector<8x128xf32>
    %497 = arith.divf %495, %496 : vector<8x128xf32>
    %498 = vector.extract_strided_slice %485 {offsets = [0, 256], sizes = [8, 128], strides = [1, 1]} : vector<8x512xf32> to vector<8x128xf32>
    %499 = math.tanh %498 : vector<8x128xf32>
    %500 = vector.extract_strided_slice %485 {offsets = [0, 384], sizes = [8, 128], strides = [1, 1]} : vector<8x512xf32> to vector<8x128xf32>
    %501 = arith.negf %500 : vector<8x128xf32>
    %502 = math.exp %501 : vector<8x128xf32>
    %cst_219 = arith.constant 1.000000e+00 : f32
    %503 = vector.broadcast %cst_219 : f32 to vector<8x128xf32>
    %504 = arith.addf %503, %502 : vector<8x128xf32>
    %505 = arith.divf %503, %504 : vector<8x128xf32>
    %506 = arith.mulf %497, %474 : vector<8x128xf32>
    %507 = arith.mulf %491, %499 : vector<8x128xf32>
    %508 = arith.addf %506, %507 : vector<8x128xf32>
    %509 = math.tanh %508 : vector<8x128xf32>
    %510 = arith.mulf %505, %509 : vector<8x128xf32>
    %c5_220 = arith.constant 5 : index
    %c0_221 = arith.constant 0 : index
    %c0_222 = arith.constant 0 : index
    %511 = vector.load %arg12[%c5_220, %c0_221, %c0_222] : memref<8x8x128xf32, #tpu.memory_space<vmem>>, vector<1x8x128xf32>
    %512 = vector.shape_cast %511 : vector<1x8x128xf32> to vector<8x128xf32>
    %513 = vector.shape_cast %510 : vector<8x128xf32> to vector<1x8x128xf32>
    tpu.vector_store %arg12[%c5_220, %c0_221, %c0_222], %513 {strides = array<i32>} : memref<8x8x128xf32, #tpu.memory_space<vmem>>, vector<1x8x128xf32>,
    %c6_223 = arith.constant 6 : index
    %c0_224 = arith.constant 0 : index
    %c0_225 = arith.constant 0 : index
    %514 = vector.load %arg13[%c6_223, %c0_224, %c0_225] : memref<8x8x512xf32, #tpu.memory_space<vmem>>, vector<1x8x512xf32>
    %515 = vector.shape_cast %514 : vector<1x8x512xf32> to vector<8x512xf32>
    %c1_226 = arith.constant 1 : index
    %c0_227 = arith.constant 0 : index
    %c0_228 = arith.constant 0 : index
    %516 = vector.load %arg3[%c1_226, %c0_227, %c0_228] : memref<2x128x512xf32, #tpu.memory_space<vmem>>, vector<1x128x512xf32>
    %517 = vector.shape_cast %516 : vector<1x128x512xf32> to vector<128x512xf32>
    %cst_229 = arith.constant dense<0.000000e+00> : vector<8x512xf32>
    %518 = tpu.matmul %510, %517, %cst_229 {dimension_numbers = #tpu.dot_dimension_numbers<[1], [0], [0], [1], [0, 0, 1, 1], [], []>} : vector<8x128xf32>, vector<128x512xf32>, vector<8x512xf32> -> vector<8x512xf32>
    %519 = arith.addf %515, %518 : vector<8x512xf32>
    %520 = vector.extract_strided_slice %519 {offsets = [0, 0], sizes = [8, 128], strides = [1, 1]} : vector<8x512xf32> to vector<8x128xf32>
    %521 = arith.negf %520 : vector<8x128xf32>
    %522 = math.exp %521 : vector<8x128xf32>
    %cst_230 = arith.constant 1.000000e+00 : f32
    %523 = vector.broadcast %cst_230 : f32 to vector<8x128xf32>
    %524 = arith.addf %523, %522 : vector<8x128xf32>
    %525 = arith.divf %523, %524 : vector<8x128xf32>
    %526 = vector.extract_strided_slice %519 {offsets = [0, 128], sizes = [8, 128], strides = [1, 1]} : vector<8x512xf32> to vector<8x128xf32>
    %527 = arith.negf %526 : vector<8x128xf32>
    %528 = math.exp %527 : vector<8x128xf32>
    %cst_231 = arith.constant 1.000000e+00 : f32
    %529 = vector.broadcast %cst_231 : f32 to vector<8x128xf32>
    %530 = arith.addf %529, %528 : vector<8x128xf32>
    %531 = arith.divf %529, %530 : vector<8x128xf32>
    %532 = vector.extract_strided_slice %519 {offsets = [0, 256], sizes = [8, 128], strides = [1, 1]} : vector<8x512xf32> to vector<8x128xf32>
    %533 = math.tanh %532 : vector<8x128xf32>
    %534 = vector.extract_strided_slice %519 {offsets = [0, 384], sizes = [8, 128], strides = [1, 1]} : vector<8x512xf32> to vector<8x128xf32>
    %535 = arith.negf %534 : vector<8x128xf32>
    %536 = math.exp %535 : vector<8x128xf32>
    %cst_232 = arith.constant 1.000000e+00 : f32
    %537 = vector.broadcast %cst_232 : f32 to vector<8x128xf32>
    %538 = arith.addf %537, %536 : vector<8x128xf32>
    %539 = arith.divf %537, %538 : vector<8x128xf32>
    %540 = arith.mulf %531, %508 : vector<8x128xf32>
    %541 = arith.mulf %525, %533 : vector<8x128xf32>
    %542 = arith.addf %540, %541 : vector<8x128xf32>
    %543 = math.tanh %542 : vector<8x128xf32>
    %544 = arith.mulf %539, %543 : vector<8x128xf32>
    %c6_233 = arith.constant 6 : index
    %c0_234 = arith.constant 0 : index
    %c0_235 = arith.constant 0 : index
    %545 = vector.load %arg12[%c6_233, %c0_234, %c0_235] : memref<8x8x128xf32, #tpu.memory_space<vmem>>, vector<1x8x128xf32>
    %546 = vector.shape_cast %545 : vector<1x8x128xf32> to vector<8x128xf32>
    %547 = vector.shape_cast %544 : vector<8x128xf32> to vector<1x8x128xf32>
    tpu.vector_store %arg12[%c6_233, %c0_234, %c0_235], %547 {strides = array<i32>} : memref<8x8x128xf32, #tpu.memory_space<vmem>>, vector<1x8x128xf32>,
    %c7_236 = arith.constant 7 : index
    %c0_237 = arith.constant 0 : index
    %c0_238 = arith.constant 0 : index
    %548 = vector.load %arg13[%c7_236, %c0_237, %c0_238] : memref<8x8x512xf32, #tpu.memory_space<vmem>>, vector<1x8x512xf32>
    %549 = vector.shape_cast %548 : vector<1x8x512xf32> to vector<8x512xf32>
    %c1_239 = arith.constant 1 : index
    %c0_240 = arith.constant 0 : index
    %c0_241 = arith.constant 0 : index
    %550 = vector.load %arg3[%c1_239, %c0_240, %c0_241] : memref<2x128x512xf32, #tpu.memory_space<vmem>>, vector<1x128x512xf32>
    %551 = vector.shape_cast %550 : vector<1x128x512xf32> to vector<128x512xf32>
    %cst_242 = arith.constant dense<0.000000e+00> : vector<8x512xf32>
    %552 = tpu.matmul %544, %551, %cst_242 {dimension_numbers = #tpu.dot_dimension_numbers<[1], [0], [0], [1], [0, 0, 1, 1], [], []>} : vector<8x128xf32>, vector<128x512xf32>, vector<8x512xf32> -> vector<8x512xf32>
    %553 = arith.addf %549, %552 : vector<8x512xf32>
    %554 = vector.extract_strided_slice %553 {offsets = [0, 0], sizes = [8, 128], strides = [1, 1]} : vector<8x512xf32> to vector<8x128xf32>
    %555 = arith.negf %554 : vector<8x128xf32>
    %556 = math.exp %555 : vector<8x128xf32>
    %cst_243 = arith.constant 1.000000e+00 : f32
    %557 = vector.broadcast %cst_243 : f32 to vector<8x128xf32>
    %558 = arith.addf %557, %556 : vector<8x128xf32>
    %559 = arith.divf %557, %558 : vector<8x128xf32>
    %560 = vector.extract_strided_slice %553 {offsets = [0, 128], sizes = [8, 128], strides = [1, 1]} : vector<8x512xf32> to vector<8x128xf32>
    %561 = arith.negf %560 : vector<8x128xf32>
    %562 = math.exp %561 : vector<8x128xf32>
    %cst_244 = arith.constant 1.000000e+00 : f32
    %563 = vector.broadcast %cst_244 : f32 to vector<8x128xf32>
    %564 = arith.addf %563, %562 : vector<8x128xf32>
    %565 = arith.divf %563, %564 : vector<8x128xf32>
    %566 = vector.extract_strided_slice %553 {offsets = [0, 256], sizes = [8, 128], strides = [1, 1]} : vector<8x512xf32> to vector<8x128xf32>
    %567 = math.tanh %566 : vector<8x128xf32>
    %568 = vector.extract_strided_slice %553 {offsets = [0, 384], sizes = [8, 128], strides = [1, 1]} : vector<8x512xf32> to vector<8x128xf32>
    %569 = arith.negf %568 : vector<8x128xf32>
    %570 = math.exp %569 : vector<8x128xf32>
    %cst_245 = arith.constant 1.000000e+00 : f32
    %571 = vector.broadcast %cst_245 : f32 to vector<8x128xf32>
    %572 = arith.addf %571, %570 : vector<8x128xf32>
    %573 = arith.divf %571, %572 : vector<8x128xf32>
    %574 = arith.mulf %565, %542 : vector<8x128xf32>
    %575 = arith.mulf %559, %567 : vector<8x128xf32>
    %576 = arith.addf %574, %575 : vector<8x128xf32>
    %577 = math.tanh %576 : vector<8x128xf32>
    %578 = arith.mulf %573, %577 : vector<8x128xf32>
    %c7_246 = arith.constant 7 : index
    %c0_247 = arith.constant 0 : index
    %c0_248 = arith.constant 0 : index
    %579 = vector.load %arg12[%c7_246, %c0_247, %c0_248] : memref<8x8x128xf32, #tpu.memory_space<vmem>>, vector<1x8x128xf32>
    %580 = vector.shape_cast %579 : vector<1x8x128xf32> to vector<8x128xf32>
    %581 = vector.shape_cast %578 : vector<8x128xf32> to vector<1x8x128xf32>
    tpu.vector_store %arg12[%c7_246, %c0_247, %c0_248], %581 {strides = array<i32>} : memref<8x8x128xf32, #tpu.memory_space<vmem>>, vector<1x8x128xf32>,
    %c1_249 = arith.constant 1 : index
    %c0_250 = arith.constant 0 : index
    %c0_251 = arith.constant 0 : index
    %582 = vector.load %arg10[%c1_249, %c0_250, %c0_251] : memref<2x8x128xf32, #tpu.memory_space<vmem>>, vector<1x8x128xf32>
    %583 = vector.shape_cast %582 : vector<1x8x128xf32> to vector<8x128xf32>
    %584 = vector.shape_cast %578 : vector<8x128xf32> to vector<1x8x128xf32>
    tpu.vector_store %arg10[%c1_249, %c0_250, %c0_251], %584 {strides = array<i32>} : memref<2x8x128xf32, #tpu.memory_space<vmem>>, vector<1x8x128xf32>,
    %c1_252 = arith.constant 1 : index
    %c0_253 = arith.constant 0 : index
    %c0_254 = arith.constant 0 : index
    %585 = vector.load %arg11[%c1_252, %c0_253, %c0_254] : memref<2x8x128xf32, #tpu.memory_space<vmem>>, vector<1x8x128xf32>
    %586 = vector.shape_cast %585 : vector<1x8x128xf32> to vector<8x128xf32>
    %587 = vector.shape_cast %576 : vector<8x128xf32> to vector<1x8x128xf32>
    tpu.vector_store %arg11[%c1_252, %c0_253, %c0_254], %587 {strides = array<i32>} : memref<2x8x128xf32, #tpu.memory_space<vmem>>, vector<1x8x128xf32>,
    %c0_255 = arith.constant 0 : index
    %c0_256 = arith.constant 0 : index
    %c0_257 = arith.constant 0 : index
    %588 = vector.load %arg12[%c0_255, %c0_256, %c0_257] : memref<8x8x128xf32, #tpu.memory_space<vmem>>, vector<8x8x128xf32>
    %589 = vector.shape_cast %588 : vector<8x8x128xf32> to vector<64x128xf32>
    %c0_258 = arith.constant 0 : index
    %c0_259 = arith.constant 0 : index
    %590 = vector.load %arg7[%c0_258, %c0_259] : memref<128x128xf32, #tpu.memory_space<vmem>>, vector<128x128xf32>
    %cst_260 = arith.constant dense<0.000000e+00> : vector<64x128xf32>
    %591 = tpu.matmul %589, %590, %cst_260 {dimension_numbers = #tpu.dot_dimension_numbers<[1], [0], [0], [1], [0, 0, 1, 1], [], []>} : vector<64x128xf32>, vector<128x128xf32>, vector<64x128xf32> -> vector<64x128xf32>
    %c0_261 = arith.constant 0 : index
    %c0_262 = arith.constant 0 : index
    %592 = vector.load %arg8[%c0_261, %c0_262] : memref<1x128xf32, #tpu.memory_space<vmem>>, vector<1x128xf32>
    %593 = vector.broadcast %592 : vector<1x128xf32> to vector<64x128xf32>
    %594 = arith.addf %591, %593 : vector<64x128xf32>
    %c0_263 = arith.constant 0 : index
    %c0_264 = arith.constant 0 : index
    %595 = vector.load %arg9[%c0_263, %c0_264] : memref<64x128xf32, #tpu.memory_space<vmem>>, vector<64x128xf32>
    tpu.vector_store %arg9[%c0_263, %c0_264], %594 {strides = array<i32>} : memref<64x128xf32, #tpu.memory_space<vmem>>, vector<64x128xf32>,
    return
  }
  func.func @transform_0(%arg0: i32) -> (i32, i32, i32) {
    %c0_i32 = arith.constant 0 : i32
    %c0_i32_0 = arith.constant 0 : i32
    %c0_i32_1 = arith.constant 0 : i32
    %c0_i32_2 = arith.constant 0 : i32
    return %c0_i32, %c0_i32_0, %c0_i32_1 : i32, i32, i32
  }
  func.func @transform_1(%arg0: i32) -> (i32, i32, i32) {
    %c0_i32 = arith.constant 0 : i32
    %c0_i32_0 = arith.constant 0 : i32
    %c0_i32_1 = arith.constant 0 : i32
    %c0_i32_2 = arith.constant 0 : i32
    return %c0_i32, %c0_i32_0, %c0_i32_1 : i32, i32, i32
  }
  func.func @transform_2(%arg0: i32) -> (i32, i32, i32) {
    %c0_i32 = arith.constant 0 : i32
    %c0_i32_0 = arith.constant 0 : i32
    %c0_i32_1 = arith.constant 0 : i32
    %c0_i32_2 = arith.constant 0 : i32
    return %c0_i32, %c0_i32_0, %c0_i32_1 : i32, i32, i32
  }
  func.func @transform_3(%arg0: i32) -> (i32, i32, i32) {
    %c0_i32 = arith.constant 0 : i32
    %c0_i32_0 = arith.constant 0 : i32
    %c0_i32_1 = arith.constant 0 : i32
    %c0_i32_2 = arith.constant 0 : i32
    return %c0_i32, %c0_i32_0, %c0_i32_1 : i32, i32, i32
  }
  func.func @transform_4(%arg0: i32) -> (i32, i32, i32) {
    %c0_i32 = arith.constant 0 : i32
    %c0_i32_0 = arith.constant 0 : i32
    %c0_i32_1 = arith.constant 0 : i32
    %c0_i32_2 = arith.constant 0 : i32
    return %c0_i32, %c0_i32_0, %c0_i32_1 : i32, i32, i32
  }
  func.func @transform_5(%arg0: i32) -> (i32, i32, i32) {
    %c0_i32 = arith.constant 0 : i32
    %c0_i32_0 = arith.constant 0 : i32
    %c0_i32_1 = arith.constant 0 : i32
    %c0_i32_2 = arith.constant 0 : i32
    return %c0_i32, %c0_i32_0, %c0_i32_1 : i32, i32, i32
  }
  func.func @transform_6(%arg0: i32) -> (i32, i32) {
    %c0_i32 = arith.constant 0 : i32
    %c0_i32_0 = arith.constant 0 : i32
    %c0_i32_1 = arith.constant 0 : i32
    return %c0_i32, %c0_i32_0 : i32, i32
  }
  func.func @transform_7(%arg0: i32) -> (i32, i32) {
    %c0_i32 = arith.constant 0 : i32
    %c0_i32_0 = arith.constant 0 : i32
    %c0_i32_1 = arith.constant 0 : i32
    return %c0_i32, %c0_i32_0 : i32, i32
  }
  func.func @transform_8(%arg0: i32) -> (i32, i32) {
    %c0_i32 = arith.constant 0 : i32
    %c0_i32_0 = arith.constant 0 : i32
    %c0_i32_1 = arith.constant 0 : i32
    return %c0_i32, %c0_i32_0 : i32, i32
  }
  func.func @transform_9(%arg0: i32) -> (i32, i32, i32) {
    %c0_i32 = arith.constant 0 : i32
    %c0_i32_0 = arith.constant 0 : i32
    %c0_i32_1 = arith.constant 0 : i32
    %c0_i32_2 = arith.constant 0 : i32
    return %c0_i32, %c0_i32_0, %c0_i32_1 : i32, i32, i32
  }
  func.func @transform_10(%arg0: i32) -> (i32, i32, i32) {
    %c0_i32 = arith.constant 0 : i32
    %c0_i32_0 = arith.constant 0 : i32
    %c0_i32_1 = arith.constant 0 : i32
    %c0_i32_2 = arith.constant 0 : i32
    return %c0_i32, %c0_i32_0, %c0_i32_1 : i32, i32, i32
  }
}

</mosaic_0001>

<bundles_post_ra>
// kernel: tpu_custom_call.1
= control target key start
LH: loop header
LB: loop body
LE: loop exit
PB: predicated region body
PF: predicated region fallthrough
CT: control target
= control target key end

     0   :  { %16 = vsyncpa [#allocation5], 0  ;;  %s8165_s0 = inlined_call_operand.hbm [shape: f32[8,8,128], index: 0, kind: input, shape index: {}]   ;;  %s8166_s1 = inlined_call_operand.hbm [shape: f32[2,128,512], index: 1, kind: input, shape index: {}]   ;;  %s8167_s2 = inlined_call_operand.hbm [shape: f32[2,128,512], index: 2, kind: input, shape index: {}]   ;;  %s8168_s3 = inlined_call_operand.hbm [shape: f32[2,1,512], index: 3, kind: input, shape index: {}]   ;;  %s8169_s4 = inlined_call_operand.hbm [shape: f32[2,8,128], index: 4, kind: input, shape index: {}]   ;;  %s8170_s5 = inlined_call_operand.vmem [shape: f32[2,8,128], index: 5, kind: input, shape index: {}]   ;;  %s8171_s6 = inlined_call_operand.hbm [shape: f32[128,128], index: 6, kind: input, shape index: {}]   ;;  %s8172_s7 = inlined_call_operand.vmem [shape: f32[1,128], index: 7, kind: input, shape index: {}]   ;;  %s8173_s8 = inlined_call_operand.hbm [shape: f32[64,128], index: 8, kind: output, shape index: {0}]   ;;  %s8174_s9 = inlined_call_operand.hbm [shape: f32[2,8,128], index: 9, kind: output, shape index: {1}]   ;;  %s8175_s10 = inlined_call_operand.hbm [shape: f32[2,8,128], index: 10, kind: output, shape index: {2}]  }
   0x1   :  { %17 = vsyncpa [#allocation8], 0 }
   0x2   :  { %18 = vsyncpa [#allocation11], 0 }
   0x3   :  { %19 = vsyncpa [#allocation14], 0 }
   0x4   :  { %20 = vsyncpa [#allocation6], 0 }
   0x5   :  { %21 = vsyncpa [#allocation17], 0  ;;  %s6796_s13 = smov [#allocation7]   ;;  %s6586_s17 = scalar_lea.hbm %s8166_s1, 16384 }
   0x6   :  { %s39_s14 = sshll.u32 %s6796_s13, 4  ;;  %p6587_p0 = scmp.ne.s32.totalorder %s8166_s1, %s6586_s17  ;;  %s40_s14 = int_to_ptr.vmem [resolvable:$true] %s39_s14 }
   0x7   :  { %p6590_p1 = scmp.lt.u32.totalorder %s6586_s17, %s8166_s1 }
   0x9   :  { %p6592_p2 = pnand %p6590_p1, %p6587_p0 }
   0xb   :  { %6595 = shalt.err (!%p6592_p2)
}
   0xc   :  { %s6596_s22 = scalar_lea.vmem %s40_s14, 16384  ;;  %p6601_p4 = scmp.lt.s32.totalorder %s40_s14, %s40_s14 }
   0xd   :  { %p6597_p3 = scmp.ne.s32.totalorder %s40_s14, %s6596_s22  ;;  %p6602_p5 = scmp.lt.s32.totalorder %s6596_s22, %s6596_s22 }
   0xf   :  { %p6603_p6 = por %p6602_p5, %p6601_p4 }
  0x11   :  { %p6604_p7 = pnand %p6603_p6, %p6597_p3 }
  0x13   :  { %6607 = shalt.err (!%p6604_p7)
}
  0x14   :  { %s6797_s23 = smov 512   ;;  %s6798_s24 = smov 32  }
  0x15   :  { %45 = dma.hbm_to_vmem [thread:$0]  %s8166_s1, 16384, %s40_s14, [#allocation8], %s6797_s23, %s6797_s23, %s6798_s24  }
  0x16   :  { %s6799_s27 = smov [#allocation10]   ;;  %s6608_s11 = scalar_lea.hbm %s8168_s3, 128 }
  0x17   :  { %s63_s28 = sshll.u32 %s6799_s27, 4  ;;  %p6609_p8 = scmp.ne.s32.totalorder %s8168_s3, %s6608_s11  ;;  %s64_s28 = int_to_ptr.vmem [resolvable:$true] %s63_s28 }
  0x18   :  { %p6612_p9 = scmp.lt.u32.totalorder %s6608_s11, %s8168_s3 }
  0x1a   :  { %p6614_p10 = pnand %p6612_p9, %p6609_p8 }
  0x1c   :  { %6617 = shalt.err (!%p6614_p10)
}
  0x1d   :  { %s6618_s17 = scalar_lea.vmem %s64_s28, 128  ;;  %p6623_p12 = scmp.lt.s32.totalorder %s64_s28, %s64_s28 }
  0x1e   :  { %p6619_p11 = scmp.ne.s32.totalorder %s64_s28, %s6618_s17  ;;  %p6624_p13 = scmp.lt.s32.totalorder %s6618_s17, %s6618_s17 }
  0x20   :  { %p6625_p0 = por %p6624_p13, %p6623_p12 }
  0x22   :  { %p6626_p1 = pnand %p6625_p0, %p6619_p11 }
  0x24   :  { %6629 = shalt.err (!%p6626_p1)
}
  0x25   :  { %s6800_s1 = smov 64   ;;  %s6801_s14 = smov 4  }
  0x26   :  { %69 = dma.hbm_to_vmem [thread:$0]  %s8168_s3, 128, %s64_s28, [#allocation11], %s6800_s1, %s6800_s1, %s6801_s14  }
  0x27   :  { %s6802_s20 = smov [#allocation4]   ;;  %s6630_s26 = scalar_lea.hbm %s8165_s0, 1024 }
  0x28   :  { %s27_s21 = sshll.u32 %s6802_s20, 4  ;;  %p6631_p2 = scmp.ne.s32.totalorder %s8165_s0, %s6630_s26  ;;  %s28_s21 = int_to_ptr.vmem [resolvable:$true] %s27_s21 }
  0x29   :  { %p6634_p3 = scmp.lt.u32.totalorder %s6630_s26, %s8165_s0 }
  0x2b   :  { %p6636_p4 = pnand %p6634_p3, %p6631_p2 }
  0x2d   :  { %6639 = shalt.err (!%p6636_p4)
}
  0x2e   :  { %s6640_s12 = scalar_lea.vmem %s28_s21, 1024  ;;  %p6645_p6 = scmp.lt.s32.totalorder %s28_s21, %s28_s21 }
  0x2f   :  { %p6641_p5 = scmp.ne.s32.totalorder %s28_s21, %s6640_s12  ;;  %p6646_p7 = scmp.lt.s32.totalorder %s6640_s12, %s6640_s12 }
  0x31   :  { %p6647_p8 = por %p6646_p7, %p6645_p6 }
  0x33   :  { %p6648_p9 = pnand %p6647_p8, %p6641_p5 }
  0x35   :  { %6651 = shalt.err (!%p6648_p9)
}
  0x36   :  { %s6803_s3 = smov 128   ;;  %s6804_s28 = smov 8  }
  0x37   :  { %33 = dma.hbm_to_vmem [thread:$0]  %s8165_s0, 1024, %s28_s21, [#allocation5], %s6803_s3, %s6803_s3, %s6804_s28  }
  0x38   :  { %s6805_s16 = smov [#allocation9]   ;;  %s6806_s1 = smov [#allocation12]  }
  0x39   :  { %s51_s17 = sshll.u32 %s6805_s16, 4  ;;  %s75_s14 = sshll.u32 %s6806_s1, 4  ;;  %s52_s17 = int_to_ptr.vmem [resolvable:$true] %s51_s17  ;;  %s76_s14 = int_to_ptr.vmem [resolvable:$true] %s75_s14 }
  0x3a   :  { %s6652_s20 = scalar_lea.hbm %s8167_s2, 16384 }
  0x3b   :  { %p6653_p10 = scmp.ne.s32.totalorder %s8167_s2, %s6652_s20  ;;  %p6656_p11 = scmp.lt.u32.totalorder %s6652_s20, %s8167_s2 }
  0x3d   :  { %p6658_p12 = pnand %p6656_p11, %p6653_p10 }
  0x3f   :  { %6661 = shalt.err (!%p6658_p12)
}
  0x40   :  { %s6662_s0 = scalar_lea.vmem %s52_s17, 16384  ;;  %p6667_p0 = scmp.lt.s32.totalorder %s52_s17, %s52_s17 }
  0x41   :  { %p6663_p13 = scmp.ne.s32.totalorder %s52_s17, %s6662_s0  ;;  %p6668_p1 = scmp.lt.s32.totalorder %s6662_s0, %s6662_s0 }
  0x43   :  { %p6669_p2 = por %p6668_p1, %p6667_p0 }
  0x45   :  { %p6670_p3 = pnand %p6669_p2, %p6663_p13 }
  0x47   :  { %6673 = shalt.err (!%p6670_p3)
}
  0x48   :  { %57 = dma.hbm_to_vmem [thread:$0]  %s8167_s2, 16384, %s52_s17, [#allocation8], %s6797_s23, %s6797_s23, %s6798_s24  }
  0x49   :  { %s6674_s12 = scalar_lea.hbm %s8169_s4, 256 }
  0x4a   :  { %p6675_p4 = scmp.ne.s32.totalorder %s8169_s4, %s6674_s12  ;;  %p6678_p5 = scmp.lt.u32.totalorder %s6674_s12, %s8169_s4 }
  0x4c   :  { %p6680_p6 = pnand %p6678_p5, %p6675_p4 }
  0x4e   :  { %6683 = shalt.err (!%p6680_p6)
}
  0x4f   :  { %s6684_s18 = scalar_lea.vmem %s76_s14, 256  ;;  %p6689_p8 = scmp.lt.s32.totalorder %s76_s14, %s76_s14 }
  0x50   :  { %p6685_p7 = scmp.ne.s32.totalorder %s76_s14, %s6684_s18  ;;  %p6690_p9 = scmp.lt.s32.totalorder %s6684_s18, %s6684_s18 }
  0x52   :  { %p6691_p10 = por %p6690_p9, %p6689_p8 }
  0x54   :  { %p6692_p11 = pnand %p6691_p10, %p6685_p7 }
  0x56   :  { %6695 = shalt.err (!%p6692_p11)
}
  0x57   :  { %81 = dma.hbm_to_vmem [thread:$0]  %s8169_s4, 256, %s76_s14, [#allocation11], %s6803_s3, %s6803_s3, %s6804_s28  }
  0x58   :  { %s6807_s24 = smov [#allocation13]   ;;  %s6696_s22 = scalar_lea.hbm %s8171_s6, 2048 }
  0x59   :  { %s89_s17 = sshll.u32 %s6807_s24, 4  ;;  %p6697_p12 = scmp.ne.s32.totalorder %s8171_s6, %s6696_s22  ;;  %s90_s17 = int_to_ptr.vmem [resolvable:$true] %s89_s17 }
  0x5a   :  { %p6700_p13 = scmp.lt.u32.totalorder %s6696_s22, %s8171_s6 }
  0x5c   :  { %p6702_p0 = pnand %p6700_p13, %p6697_p12 }
  0x5e   :  { %6705 = shalt.err (!%p6702_p0)
}
  0x5f   :  { %s6706_s21 = scalar_lea.vmem %s90_s17, 2048  ;;  %p6711_p2 = scmp.lt.s32.totalorder %s90_s17, %s90_s17 }
  0x60   :  { %p6707_p1 = scmp.ne.s32.totalorder %s90_s17, %s6706_s21  ;;  %p6712_p3 = scmp.lt.s32.totalorder %s6706_s21, %s6706_s21 }
  0x62   :  { %p6713_p4 = por %p6712_p3, %p6711_p2 }
  0x64   :  { %p6714_p5 = pnand %p6713_p4, %p6707_p1 }
  0x66   :  { %6717 = shalt.err (!%p6714_p5)
}
  0x67   :  { %95 = dma.hbm_to_vmem [thread:$0]  %s8171_s6, 2048, %s90_s17, [#allocation14], %s6803_s3, %s6803_s3, %s6804_s28  }
  0x68   :  { %6784 = dma.done.wait [#allocation5], 1024  }
  0x69   :  { %6785 = vsyncadd [#allocation5], 4294966272 }
  0x6a   :  { %6786 = dma.done.wait [#allocation8], 32768  }
  0x6b   :  { %6787 = vsyncadd [#allocation8], 4294934528 }
  0x6c   :  { %6788 = dma.done.wait [#allocation11], 384  }
  0x6d   :  { %6789 = vsyncadd [#allocation11], 4294966912 }
  0x6e   :  { %6790 = dma.done.wait [#allocation14], 2048  }
  0x6f   :  { %6791 = vsyncadd [#allocation14], 4294965248  ;;  %v8180_v0 = vmov 0.0   ;;  %v141_v1 = vld [vmem:[#allocation7 + $0x8] sm:$0xff]  ;;  %v140_v3 = vld [vmem:[#allocation7] sm:$0xff] }
  0x70   :  { %290 = vmatprep.mubr.f32.mxu1 %v8180_v0  ;;  %618 = vmatprep.mubr.f32.mxu0 %v8180_v0  ;;  %v145_v2 = vld [vmem:[#allocation7 + $0x28] sm:$0xff]  ;;  %v144_v5 = vld [vmem:[#allocation7 + $0x20] sm:$0xff] }
  0x71   :  { %v5002_v4 = vpack.c.bf16 %v145_v2, %v141_v1  ;;  %v491_v6 = vld [vmem:[#allocation9 + $0x8] sm:$0xff]  ;;  %v5004_v8 = vpack.c.bf16 %v144_v5, %v140_v3  ;;  %v490_v10 = vld [vmem:[#allocation9] sm:$0xff] }
  0x72   :  { %v495_v7 = vld [vmem:[#allocation9 + $0x28] sm:$0xff]  ;;  %v494_v11 = vld [vmem:[#allocation9 + $0x20] sm:$0xff] }
  0x73   :  { %v6956_v9 = vpack.c.bf16 %v495_v7, %v491_v6  ;;  %v149_v12 = vld [vmem:[#allocation7 + $0x48] sm:$0xff]  ;;  %5003 = vmatprep.subr.bf16.mxu1 %v5002_v4  ;;  %v6958_v13 = vpack.c.bf16 %v494_v11, %v490_v10  ;;  %v148_v15 = vld [vmem:[#allocation7 + $0x40] sm:$0xff] }
  0x74   :  { %v153_v14 = vld [vmem:[#allocation7 + $0x68] sm:$0xff]  ;;  %v152_v16 = vld [vmem:[#allocation7 + $0x60] sm:$0xff]  ;;  %5005 = vmatpush1.bf16.msra.mxu1 %v5004_v8 }
  0x75   :  { %5067 = vmatprep.subr.bf16.mxu0 %v6956_v9  ;;  %v5006_v17 = vpack.c.bf16 %v153_v14, %v149_v12  ;;  %v5008_v18 = vpack.c.bf16 %v152_v16, %v148_v15  ;;  %v499_v19 = vld [vmem:[#allocation9 + $0x48] sm:$0xff]  ;;  %v498_v21 = vld [vmem:[#allocation9 + $0x40] sm:$0xff] }
  0x76   :  { %v503_v20 = vld [vmem:[#allocation9 + $0x68] sm:$0xff]  ;;  %5069 = vmatpush1.bf16.msra.mxu0 %v6958_v13  ;;  %v502_v23 = vld [vmem:[#allocation9 + $0x60] sm:$0xff] }
  0x77   :  { %v6962_v22 = vpack.c.bf16 %v503_v20, %v499_v19  ;;  %v157_v24 = vld [vmem:[#allocation7 + $0x88] sm:$0xff]  ;;  %5007 = vmatprep.subr.bf16.mxu1 %v5006_v17  ;;  %v6964_v26 = vpack.c.bf16 %v502_v23, %v498_v21  ;;  %v156_v28 = vld [vmem:[#allocation7 + $0x80] sm:$0xff] }
  0x78   :  { %v161_v25 = vld [vmem:[#allocation7 + $0xa8] sm:$0xff]  ;;  %v160_v29 = vld [vmem:[#allocation7 + $0xa0] sm:$0xff]  ;;  %5009 = vmatpush1.bf16.msra.mxu1 %v5008_v18 }
  0x79   :  { %v5010_v27 = vpack.c.bf16 %v161_v25, %v157_v24  ;;  %v507_v30 = vld [vmem:[#allocation9 + $0x88] sm:$0xff]  ;;  %5071 = vmatprep.subr.bf16.mxu0 %v6962_v22  ;;  %v506_v32 = vld [vmem:[#allocation9 + $0x80] sm:$0xff]  ;;  %v5012_v34 = vpack.c.bf16 %v160_v29, %v156_v28 }
  0x7a   :  { %v511_v31 = vld [vmem:[#allocation9 + $0xa8] sm:$0xff]  ;;  %v510_v33 = vld [vmem:[#allocation9 + $0xa0] sm:$0xff]  ;;  %5073 = vmatpush1.bf16.msra.mxu0 %v6964_v26 }
  0x7b   :  { %v6967_v35 = vpack.c.bf16 %v511_v31, %v507_v30  ;;  %v165_v36 = vld [vmem:[#allocation7 + $0xc8] sm:$0xff]  ;;  %v164_v38 = vld [vmem:[#allocation7 + $0xc0] sm:$0xff]  ;;  %5011 = vmatprep.subr.bf16.mxu1 %v5010_v27  ;;  %v6970_v39 = vpack.c.bf16 %v510_v33, %v506_v32 }
  0x7c   :  { %v169_v37 = vld [vmem:[#allocation7 + $0xe8] sm:$0xff]  ;;  %v168_v41 = vld [vmem:[#allocation7 + $0xe0] sm:$0xff]  ;;  %5013 = vmatpush1.bf16.msra.mxu1 %v5012_v34 }
  0x7d   :  { %v5014_v40 = vpack.c.bf16 %v169_v37, %v165_v36  ;;  %v515_v42 = vld [vmem:[#allocation9 + $0xc8] sm:$0xff]  ;;  %5075 = vmatprep.subr.bf16.mxu0 %v6967_v35  ;;  %v514_v45 = vld [vmem:[#allocation9 + $0xc0] sm:$0xff]  ;;  %v5016_v49 = vpack.c.bf16 %v168_v41, %v164_v38  ;;  %v143_v37 = vld [vmem:[#allocation7 + $0x18] sm:$0xff] }
  0x7e   :  { %v519_v43 = vld [vmem:[#allocation9 + $0xe8] sm:$0xff]  ;;  %v518_v46 = vld [vmem:[#allocation9 + $0xe0] sm:$0xff]  ;;  %5077 = vmatpush1.bf16.msra.mxu0 %v6970_v39  ;;  %v147_v38 = vld [vmem:[#allocation7 + $0x38] sm:$0xff] }
  0x7f   :  { %v6973_v44 = vpack.c.bf16 %v519_v43, %v515_v42  ;;  %v173_v47 = vld [vmem:[#allocation7 + $0x108] sm:$0xff]  ;;  %5015 = vmatprep.subr.bf16.mxu1 %v5014_v40  ;;  %v6976_v52 = vpack.c.bf16 %v518_v46, %v514_v45  ;;  %v172_v54 = vld [vmem:[#allocation7 + $0x100] sm:$0xff]  ;;  %v5034_v42 = vpack.c.bf16 %v147_v38, %v143_v37  ;;  %v142_v43 = vld [vmem:[#allocation7 + $0x10] sm:$0xff] }
  0x80   :  { %v177_v48 = vld [vmem:[#allocation7 + $0x128] sm:$0xff]  ;;  %v176_v55 = vld [vmem:[#allocation7 + $0x120] sm:$0xff]  ;;  %5017 = vmatpush1.bf16.msra.mxu1 %v5016_v49  ;;  %v146_v45 = vld [vmem:[#allocation7 + $0x30] sm:$0xff] }
  0x81   :  { %v523_v50 = vld [vmem:[#allocation9 + $0x108] sm:$0xff]  ;;  %v5018_v53 = vpack.c.bf16 %v177_v48, %v173_v47  ;;  %v522_v56 = vld [vmem:[#allocation9 + $0x100] sm:$0xff]  ;;  %5079 = vmatprep.subr.bf16.mxu0 %v6973_v44  ;;  %v5020_v63 = vpack.c.bf16 %v176_v55, %v172_v54  ;;  %v151_v46 = vld [vmem:[#allocation7 + $0x58] sm:$0xff]  ;;  %v5036_v49 = vpack.c.bf16 %v146_v45, %v142_v43 }
  0x82   :  { %v527_v51 = vld [vmem:[#allocation9 + $0x128] sm:$0xff]  ;;  %v526_v58 = vld [vmem:[#allocation9 + $0x120] sm:$0xff]  ;;  %5081 = vmatpush1.bf16.msra.mxu0 %v6976_v52  ;;  %v155_v47 = vld [vmem:[#allocation7 + $0x78] sm:$0xff] }
  0x83   :  { %v6979_v57 = vpack.c.bf16 %v527_v51, %v523_v50  ;;  %v181_v59 = vld [vmem:[#allocation7 + $0x148] sm:$0xff]  ;;  %5019 = vmatprep.subr.bf16.mxu1 %v5018_v53  ;;  %v6982_v1 = vpack.c.bf16 %v526_v58, %v522_v56  ;;  %v180_v3 = vld [vmem:[#allocation7 + $0x140] sm:$0xff]  ;;  %v5038_v51 = vpack.c.bf16 %v155_v47, %v151_v46  ;;  %v150_v53 = vld [vmem:[#allocation7 + $0x50] sm:$0xff] }
  0x84   :  { %v185_v60 = vld [vmem:[#allocation7 + $0x168] sm:$0xff]  ;;  %v184_v4 = vld [vmem:[#allocation7 + $0x160] sm:$0xff]  ;;  %5021 = vmatpush1.bf16.msra.mxu1 %v5020_v63  ;;  %v154_v54 = vld [vmem:[#allocation7 + $0x70] sm:$0xff] }
  0x85   :  { %v531_v61 = vld [vmem:[#allocation9 + $0x148] sm:$0xff]  ;;  %v5022_v2 = vpack.c.bf16 %v185_v60, %v181_v59  ;;  %v530_v5 = vld [vmem:[#allocation9 + $0x140] sm:$0xff]  ;;  %5083 = vmatprep.subr.bf16.mxu0 %v6979_v57  ;;  %v5024_v14 = vpack.c.bf16 %v184_v4, %v180_v3  ;;  %v159_v55 = vld [vmem:[#allocation7 + $0x98] sm:$0xff]  ;;  %v5040_v59 = vpack.c.bf16 %v154_v54, %v150_v53 }
  0x86   :  { %v535_v62 = vld [vmem:[#allocation9 + $0x168] sm:$0xff]  ;;  %v534_v7 = vld [vmem:[#allocation9 + $0x160] sm:$0xff]  ;;  %5085 = vmatpush1.bf16.msra.mxu0 %v6982_v1  ;;  %v163_v56 = vld [vmem:[#allocation7 + $0xb8] sm:$0xff] }
  0x87   :  { %v6985_v6 = vpack.c.bf16 %v535_v62, %v531_v61  ;;  %v189_v8 = vld [vmem:[#allocation7 + $0x188] sm:$0xff]  ;;  %5023 = vmatprep.subr.bf16.mxu1 %v5022_v2  ;;  %v6988_v15 = vpack.c.bf16 %v534_v7, %v530_v5  ;;  %v188_v17 = vld [vmem:[#allocation7 + $0x180] sm:$0xff]  ;;  %v5042_v60 = vpack.c.bf16 %v163_v56, %v159_v55  ;;  %v158_v61 = vld [vmem:[#allocation7 + $0x90] sm:$0xff] }
  0x88   :  { %v193_v10 = vld [vmem:[#allocation7 + $0x1a8] sm:$0xff]  ;;  %v192_v18 = vld [vmem:[#allocation7 + $0x1a0] sm:$0xff]  ;;  %5025 = vmatpush1.bf16.msra.mxu1 %v5024_v14  ;;  %v162_v62 = vld [vmem:[#allocation7 + $0xb0] sm:$0xff] }
  0x89   :  { %v539_v11 = vld [vmem:[#allocation9 + $0x188] sm:$0xff]  ;;  %v5026_v16 = vpack.c.bf16 %v193_v10, %v189_v8  ;;  %v538_v19 = vld [vmem:[#allocation9 + $0x180] sm:$0xff]  ;;  %5087 = vmatprep.subr.bf16.mxu0 %v6985_v6  ;;  %v5028_v28 = vpack.c.bf16 %v192_v18, %v188_v17  ;;  %v167_v63 = vld [vmem:[#allocation7 + $0xd8] sm:$0xff]  ;;  %v5044_v3 = vpack.c.bf16 %v162_v62, %v158_v61 }
  0x8a   :  { %v543_v12 = vld [vmem:[#allocation9 + $0x1a8] sm:$0xff]  ;;  %v542_v21 = vld [vmem:[#allocation9 + $0x1a0] sm:$0xff]  ;;  %5089 = vmatpush1.bf16.msra.mxu0 %v6988_v15  ;;  %v171_v2 = vld [vmem:[#allocation7 + $0xf8] sm:$0xff] }
  0x8b   :  { %v6991_v20 = vpack.c.bf16 %v543_v12, %v539_v11  ;;  %v197_v23 = vld [vmem:[#allocation7 + $0x1c8] sm:$0xff]  ;;  %5027 = vmatprep.subr.bf16.mxu1 %v5026_v16  ;;  %v6994_v29 = vpack.c.bf16 %v542_v21, %v538_v19  ;;  %v196_v31 = vld [vmem:[#allocation7 + $0x1c0] sm:$0xff]  ;;  %v5046_v4 = vpack.c.bf16 %v171_v2, %v167_v63  ;;  %v166_v5 = vld [vmem:[#allocation7 + $0xd0] sm:$0xff] }
  0x8c   :  { %v201_v24 = vld [vmem:[#allocation7 + $0x1e8] sm:$0xff]  ;;  %v200_v32 = vld [vmem:[#allocation7 + $0x1e0] sm:$0xff]  ;;  %5029 = vmatpush1.bf16.msra.mxu1 %v5028_v28  ;;  %v170_v7 = vld [vmem:[#allocation7 + $0xf0] sm:$0xff] }
  0x8d   :  { %v547_v25 = vld [vmem:[#allocation9 + $0x1c8] sm:$0xff]  ;;  %v5030_v30 = vpack.c.bf16 %v201_v24, %v197_v23  ;;  %v546_v33 = vld [vmem:[#allocation9 + $0x1c0] sm:$0xff]  ;;  %5091 = vmatprep.subr.bf16.mxu0 %v6991_v20  ;;  %v5032_v40 = vpack.c.bf16 %v200_v32, %v196_v31  ;;  %v175_v8 = vld [vmem:[#allocation7 + $0x118] sm:$0xff] }
  0x8e   :  { %v551_v27 = vld [vmem:[#allocation9 + $0x1e8] sm:$0xff]  ;;  %v550_v36 = vld [vmem:[#allocation9 + $0x1e0] sm:$0xff]  ;;  %5093 = vmatpush1.bf16.msra.mxu0 %v6994_v29  ;;  %v179_v10 = vld [vmem:[#allocation7 + $0x138] sm:$0xff] }
  0x8f   :  { %v6997_v34 = vpack.c.bf16 %v551_v27, %v547_v25  ;;  %5031 = vmatprep.subr.bf16.mxu1 %v5030_v30  ;;  %v7000_v41 = vpack.c.bf16 %v550_v36, %v546_v33  ;;  %v7003_v48 = vld [vmem:[#allocation4] sm:$0xff]  ;;  %v7006_v50 = vld [vmem:[#allocation12] sm:$0xff]  ;;  %v5050_v11 = vpack.c.bf16 %v179_v10, %v175_v8  ;;  %v174_v12 = vld [vmem:[#allocation7 + $0x110] sm:$0xff] }
  0x90   :  { %5033 = vmatpush1.bf16.msra.mxu1 %v5032_v40  ;;  %v7011_v58 = vld [vmem:[#allocation4 + $0x8] sm:$0xff]  ;;  %v178_v14 = vld [vmem:[#allocation7 + $0x130] sm:$0xff]  ;;  %v183_v16 = vld [vmem:[#allocation7 + $0x158] sm:$0xff] }
  0x91   :  { %5095 = vmatprep.subr.bf16.mxu0 %v6997_v34  ;;  %5035 = vmatprep.subr.bf16.mxu1 %v5034_v42  ;;  %v187_v17 = vld [vmem:[#allocation7 + $0x178] sm:$0xff]  ;;  %v182_v19 = vld [vmem:[#allocation7 + $0x150] sm:$0xff] }
  0x92   :  { %5097 = vmatpush1.bf16.msra.mxu0 %v7000_v41  ;;  %v5054_v18 = vpack.c.bf16 %v187_v17, %v183_v16  ;;  %v186_v21 = vld [vmem:[#allocation7 + $0x170] sm:$0xff]  ;;  %v191_v23 = vld [vmem:[#allocation7 + $0x198] sm:$0xff] }
  0x93   :  { %5131 = vmatprep.subr.bf16.mxu0 %v6956_v9  ;;  %291 = vmatmul.mubr.f32.vlgmr.msra.gmra.mrb[0].mxu1 %v7003_v48  ;;  %v7019_v9 = vld [vmem:[#allocation4 + $0x10] sm:$0xff]  ;;  %v195_v24 = vld [vmem:[#allocation7 + $0x1b8] sm:$0xff] }
  0x94   :  { %5037 = vmatpush1.bf16.msra.mxu1 %v5036_v49  ;;  %296 = vmatprep.mubr.f32.mxu1 %v8180_v0  ;;  %v5058_v25 = vpack.c.bf16 %v195_v24, %v191_v23  ;;  %v190_v27 = vld [vmem:[#allocation7 + $0x190] sm:$0xff]  ;;  %v199_v30 = vld [vmem:[#allocation7 + $0x1d8] sm:$0xff] }
  0x95   :  { %619 = vmatmul.mubr.f32.vlgmr.msra.gmra.mrb[0].mxu0 %v7006_v50  ;;  %5039 = vmatprep.subr.bf16.mxu1 %v5038_v51  ;;  %v194_v28 = vld [vmem:[#allocation7 + $0x1b0] sm:$0xff]  ;;  %v203_v31 = vld [vmem:[#allocation7 + $0x1f8] sm:$0xff] }
  0x96   :  { %5133 = vmatpush1.bf16.msra.mxu0 %v6958_v13  ;;  %858 = vmatprep.mubr.f32.mxu0 %v8180_v0  ;;  %v7025_v13 = vld [vmem:[#allocation4 + $0x18] sm:$0xff]  ;;  %v5062_v32 = vpack.c.bf16 %v203_v31, %v199_v30  ;;  %v198_v33 = vld [vmem:[#allocation7 + $0x1d0] sm:$0xff] }
  0x97   :  { %297 = vmatmul.mubr.f32.gmra.mrb[2].mxu1 %v7011_v58  ;;  %5135 = vmatprep.subr.bf16.mxu0 %v6962_v22  ;;  %v5048_v22 = vpack.c.bf16 %v170_v7, %v166_v5  ;;  %v202_v36 = vld [vmem:[#allocation7 + $0x1f0] sm:$0xff]  ;;  %v493_v37 = vld [vmem:[#allocation9 + $0x18] sm:$0xff] }
  0x98   :  { %5041 = vmatpush1.bf16.msra.mxu1 %v5040_v59  ;;  %302 = vmatprep.mubr.f32.mxu1 %v8180_v0  ;;  %v497_v38 = vld [vmem:[#allocation9 + $0x38] sm:$0xff]  ;;  %v492_v42 = vld [vmem:[#allocation9 + $0x10] sm:$0xff] }
  0x99   :  { %5043 = vmatprep.subr.bf16.mxu1 %v5042_v60  ;;  %v7051_v40 = vpack.c.bf16 %v497_v38, %v493_v37  ;;  %v496_v43 = vld [vmem:[#allocation9 + $0x30] sm:$0xff]  ;;  %v501_v45 = vld [vmem:[#allocation9 + $0x58] sm:$0xff] }
  0x9a   :  { %5137 = vmatpush1.bf16.msra.mxu0 %v6964_v26  ;;  %v7031_v26 = vld [vmem:[#allocation4 + $0x20] sm:$0xff]  ;;  %v505_v46 = vld [vmem:[#allocation9 + $0x78] sm:$0xff]  ;;  %v500_v47 = vld [vmem:[#allocation9 + $0x50] sm:$0xff] }
  0x9b   :  { %303 = vmatmul.mubr.f32.gmra.mrb[4].mxu1 %v7019_v9  ;;  %5139 = vmatprep.subr.bf16.mxu0 %v6967_v35  ;;  %v5052_v35 = vpack.c.bf16 %v178_v14, %v174_v12  ;;  %v504_v49 = vld [vmem:[#allocation9 + $0x70] sm:$0xff]  ;;  %v509_v51 = vld [vmem:[#allocation9 + $0x98] sm:$0xff] }
  0x9c   :  { %5045 = vmatpush1.bf16.msra.mxu1 %v5044_v3  ;;  %308 = vmatprep.mubr.f32.mxu1 %v8180_v0  ;;  %v513_v53 = vld [vmem:[#allocation9 + $0xb8] sm:$0xff]  ;;  %v508_v54 = vld [vmem:[#allocation9 + $0x90] sm:$0xff] }
  0x9d   :  { %5047 = vmatprep.subr.bf16.mxu1 %v5046_v4  ;;  %v512_v55 = vld [vmem:[#allocation9 + $0xb0] sm:$0xff]  ;;  %v517_v56 = vld [vmem:[#allocation9 + $0xd8] sm:$0xff] }
  0x9e   :  { %5141 = vmatpush1.bf16.msra.mxu0 %v6970_v39  ;;  %v7037_v39 = vld [vmem:[#allocation4 + $0x28] sm:$0xff]  ;;  %v521_v59 = vld [vmem:[#allocation9 + $0xf8] sm:$0xff]  ;;  %v516_v60 = vld [vmem:[#allocation9 + $0xd0] sm:$0xff] }
  0x9f   :  { %309 = vmatmul.mubr.f32.gmra.mrb[6].mxu1 %v7025_v13  ;;  %5143 = vmatprep.subr.bf16.mxu0 %v6973_v44  ;;  %v5056_v44 = vpack.c.bf16 %v186_v21, %v182_v19  ;;  %v520_v61 = vld [vmem:[#allocation9 + $0xf0] sm:$0xff]  ;;  %v525_v62 = vld [vmem:[#allocation9 + $0x118] sm:$0xff] }
  0xa0   :  { %5049 = vmatpush1.bf16.msra.mxu1 %v5048_v22  ;;  %314 = vmatprep.mubr.f32.mxu1 %v8180_v0  ;;  %v529_v63 = vld [vmem:[#allocation9 + $0x138] sm:$0xff]  ;;  %v524_v3 = vld [vmem:[#allocation9 + $0x110] sm:$0xff] }
  0xa1   :  { %5051 = vmatprep.subr.bf16.mxu1 %v5050_v11  ;;  %v7085_v2 = vpack.c.bf16 %v529_v63, %v525_v62  ;;  %v528_v4 = vld [vmem:[#allocation9 + $0x130] sm:$0xff]  ;;  %v533_v5 = vld [vmem:[#allocation9 + $0x158] sm:$0xff] }
  0xa2   :  { %5145 = vmatpush1.bf16.msra.mxu0 %v6976_v52  ;;  %v7043_v52 = vld [vmem:[#allocation4 + $0x30] sm:$0xff]  ;;  %v537_v7 = vld [vmem:[#allocation9 + $0x178] sm:$0xff] }
  0xa3   :  { %315 = vmatmul.mubr.f32.gmra.mrb[8].mxu1 %v7031_v26  ;;  %5147 = vmatprep.subr.bf16.mxu0 %v6979_v57  ;;  %v5060_v57 = vpack.c.bf16 %v194_v28, %v190_v27  ;;  %v7093_v8 = vpack.c.bf16 %v537_v7, %v533_v5  ;;  %v532_v10 = vld [vmem:[#allocation9 + $0x150] sm:$0xff]  ;;  %v541_v11 = vld [vmem:[#allocation9 + $0x198] sm:$0xff] }
  0xa4   :  { %5053 = vmatpush1.bf16.msra.mxu1 %v5052_v35  ;;  %320 = vmatprep.mubr.f32.mxu1 %v8180_v0  ;;  %v536_v22 = vld [vmem:[#allocation9 + $0x170] sm:$0xff]  ;;  %v545_v12 = vld [vmem:[#allocation9 + $0x1b8] sm:$0xff] }
  0xa5   :  { %5055 = vmatprep.subr.bf16.mxu1 %v5054_v18  ;;  %v7101_v14 = vpack.c.bf16 %v545_v12, %v541_v11  ;;  %v540_v16 = vld [vmem:[#allocation9 + $0x190] sm:$0xff]  ;;  %v549_v35 = vld [vmem:[#allocation9 + $0x1d8] sm:$0xff] }
  0xa6   :  { %5149 = vmatpush1.bf16.msra.mxu0 %v6982_v1  ;;  %v7049_v1 = vld [vmem:[#allocation4 + $0x38] sm:$0xff]  ;;  %v544_v17 = vld [vmem:[#allocation9 + $0x1b0] sm:$0xff] }
  0xa7   :  { %321 = vmatmul.mubr.f32.gmra.mrb[10].mxu1 %v7037_v39  ;;  %5151 = vmatprep.subr.bf16.mxu0 %v6985_v6  ;;  %v5064_v6 = vpack.c.bf16 %v202_v36, %v198_v33  ;;  %v553_v18 = vld [vmem:[#allocation9 + $0x1f8] sm:$0xff]  ;;  %v548_v21 = vld [vmem:[#allocation9 + $0x1d0] sm:$0xff] }
  0xa8   :  { %5057 = vmatpush1.bf16.msra.mxu1 %v5056_v44  ;;  %326 = vmatprep.mubr.f32.mxu1 %v8180_v0  ;;  %v7109_v19 = vpack.c.bf16 %v553_v18, %v549_v35  ;;  %v552_v23 = vld [vmem:[#allocation9 + $0x1f0] sm:$0xff] }
  0xa9   :  { %5059 = vmatprep.subr.bf16.mxu1 %v5058_v25  ;;  %v7114_v24 = vpack.c.bf16 %v552_v23, %v548_v21  ;;  %v204_v25 = vld [vmem:[#allocation10] sm:$0xf] }
  0xaa   :  { %5153 = vmatpush1.bf16.msra.mxu0 %v6988_v15  ;;  %v7057_v15 = vpack.c.bf16 %v496_v43, %v492_v42 }
  0xab   :  { %327 = vmatmul.mubr.f32.gmra.mrb[12].mxu1 %v7043_v52  ;;  %5155 = vmatprep.subr.bf16.mxu0 %v6991_v20  ;;  %v7060_v20 = vpack.c.bf16 %v505_v46, %v501_v45 }
  0xac   :  { %5061 = vmatpush1.bf16.msra.mxu1 %v5060_v57  ;;  %332 = vmatprep.mubr.f32.mxu1 %v8180_v0 }
  0xad   :  { %5063 = vmatprep.subr.bf16.mxu1 %v5062_v32 }
  0xae   :  { %5157 = vmatpush1.bf16.msra.mxu0 %v6994_v29  ;;  %v7066_v29 = vpack.c.bf16 %v504_v49, %v500_v47 }
  0xaf   :  { %333 = vmatmul.mubr.f32.gmra.mrb[14].mxu1 %v7049_v1  ;;  %5159 = vmatprep.subr.bf16.mxu0 %v6997_v34  ;;  %v7069_v34 = vpack.c.bf16 %v513_v53, %v509_v51 }
  0xb0   :  { %5065 = vmatpush1.bf16.msra.mxu1 %v5064_v6  ;;  %403 = vmatprep.mubr.f32.mxu1 %v8180_v0 }
  0xb1   :  { %5099 = vmatprep.subr.bf16.mxu1 %v7051_v40 }
  0xb2   :  { %5161 = vmatpush1.bf16.msra.mxu0 %v7000_v41  ;;  %v7074_v41 = vpack.c.bf16 %v512_v55, %v508_v54 }
  0xb3   :  { %404 = vmatmul.mubr.f32.vlgmr.msra.gmra.mrb[16].mxu1 %v7003_v48  ;;  %v7077_v48 = vpack.c.bf16 %v521_v59, %v517_v56 }
  0xb4   :  { %5101 = vmatpush1.bf16.msra.mxu1 %v7057_v15  ;;  %409 = vmatprep.mubr.f32.mxu1 %v8180_v0 }
  0xb5   :  { %5103 = vmatprep.subr.bf16.mxu1 %v7060_v20 }
  0xb7   :  { %410 = vmatmul.mubr.f32.gmra.mrb[18].mxu1 %v7011_v58  ;;  %v7082_v58 = vpack.c.bf16 %v520_v61, %v516_v60 }
  0xb8   :  { %5105 = vmatpush1.bf16.msra.mxu1 %v7066_v29  ;;  %415 = vmatprep.mubr.f32.mxu1 %v8180_v0 }
  0xb9   :  { %5107 = vmatprep.subr.bf16.mxu1 %v7069_v34 }
  0xbb   :  { %416 = vmatmul.mubr.f32.gmra.mrb[20].mxu1 %v7019_v9  ;;  %v7090_v9 = vpack.c.bf16 %v528_v4, %v524_v3 }
  0xbc   :  { %5109 = vmatpush1.bf16.msra.mxu1 %v7074_v41  ;;  %421 = vmatprep.mubr.f32.mxu1 %v8180_v0 }
  0xbd   :  { %5111 = vmatprep.subr.bf16.mxu1 %v7077_v48 }
  0xbf   :  { %422 = vmatmul.mubr.f32.gmra.mrb[22].mxu1 %v7025_v13  ;;  %v7098_v13 = vpack.c.bf16 %v536_v22, %v532_v10 }
  0xc0   :  { %5113 = vmatpush1.bf16.msra.mxu1 %v7082_v58  ;;  %427 = vmatprep.mubr.f32.mxu1 %v8180_v0 }
  0xc1   :  { %5115 = vmatprep.subr.bf16.mxu1 %v7085_v2 }
  0xc3   :  { %428 = vmatmul.mubr.f32.gmra.mrb[24].mxu1 %v7031_v26  ;;  %v7106_v26 = vpack.c.bf16 %v544_v17, %v540_v16 }
  0xc4   :  { %5117 = vmatpush1.bf16.msra.mxu1 %v7090_v9  ;;  %433 = vmatprep.mubr.f32.mxu1 %v8180_v0 }
  0xc5   :  { %5119 = vmatprep.subr.bf16.mxu1 %v7093_v8 }
  0xc7   :  { %434 = vmatmul.mubr.f32.gmra.mrb[26].mxu1 %v7037_v39 }
  0xc8   :  { %5121 = vmatpush1.bf16.msra.mxu1 %v7098_v13  ;;  %439 = vmatprep.mubr.f32.mxu1 %v8180_v0 }
  0xc9   :  { %5123 = vmatprep.subr.bf16.mxu1 %v7101_v14 }
  0xcb   :  { %440 = vmatmul.mubr.f32.gmra.mrb[28].mxu1 %v7043_v52 }
  0xcc   :  { %5125 = vmatpush1.bf16.msra.mxu1 %v7106_v26  ;;  %445 = vmatprep.mubr.f32.mxu1 %v8180_v0 }
  0xcd   :  { %5127 = vmatprep.subr.bf16.mxu1 %v7109_v19 }
  0xcf   :  { %446 = vmatmul.mubr.f32.gmra.mrb[30].mxu1 %v7049_v1 }
  0xd0   :  { %5129 = vmatpush1.bf16.msra.mxu1 %v7114_v24  ;;  %689 = vmatprep.mubr.f32.mxu1 %v8180_v0 }
  0xd1   :  { %5163 = vmatprep.subr.bf16.mxu1 %v7051_v40 }
  0xd3   :  { %690 = vmatmul.mubr.f32.vlgmr.msra.gmra.mrb[16].mxu1 %v7006_v50  ;;  %v206_v50 = vlaneseq }
  0xd4   :  { %5165 = vmatpush1.bf16.msra.mxu1 %v7057_v15  ;;  %929 = vmatprep.mubr.f32.mxu1 %v8180_v0 }
  0xd5   :  { %5167 = vmatprep.subr.bf16.mxu1 %v7060_v20  ;;  %v7139_v39 = vshrl.u32 %v206_v50, 7 }
  0xd7   :  { %v8179_v44 = vsub.s32 0, %v7139_v39  ;;  %v8178_v27 = vsub.s32 1, %v7139_v39  ;;  %v8176_v21 = vsub.s32 2, %v7139_v39  ;;  %v8177_v50 = vsub.s32 3, %v7139_v39 }
  0xd8   :  { %5169 = vmatpush1.bf16.msra.mxu1 %v7066_v29 }
  0xd9   :  { %5171 = vmatprep.subr.bf16.mxu1 %v7069_v34  ;;  %v209_v28 = vrot.slane %v204_v25, %v8179_v44  ;;  %v213_v30 = vrot.slane %v204_v25, %v8178_v27 }
  0xdc   :  { %5173 = vmatpush1.bf16.msra.mxu1 %v7074_v41 }
  0xdd   :  { %5175 = vmatprep.subr.bf16.mxu1 %v7077_v48 }
  0xe0   :  { %5177 = vmatpush1.bf16.msra.mxu1 %v7082_v58 }
  0xe1   :  { %5179 = vmatprep.subr.bf16.mxu1 %v7085_v2 }
  0xe4   :  { %5181 = vmatpush1.bf16.msra.mxu1 %v7090_v9 }
  0xe5   :  { %5183 = vmatprep.subr.bf16.mxu1 %v7093_v8 }
  0xe8   :  { %5185 = vmatpush1.bf16.msra.mxu1 %v7098_v13 }
  0xe9   :  { %5187 = vmatprep.subr.bf16.mxu1 %v7101_v14 }
  0xec   :  { %5189 = vmatpush1.bf16.msra.mxu1 %v7106_v26 }
  0xed   :  { %5191 = vmatprep.subr.bf16.mxu1 %v7109_v19 }
  0xf0   :  { %5193 = vmatpush1.bf16.msra.mxu1 %v7114_v24 }
  0xf1   :  { %5227 = vmatprep.subr.bf16.mxu1 %v7051_v40 }
 0x166   :  { %v292_v31 = vpop.f32.mrb[0].mxu1 }
 0x167   :  { %v293_v52 = vadd.f32 %v292_v31, %v209_v28  ;;  %v294_v57 = vpop.f32.mrb[1].mxu1 }
 0x168   :  { %v620_v32 = vpop.f32.mrb[0].mxu0  ;;  %v295_v33 = vadd.f32 %v294_v57, %v213_v30  ;;  %v7179_v57 = vrot.slane %v204_v25, %v8176_v21 }
 0x169   :  { %v622_v36 = vpop.f32.mrb[1].mxu0  ;;  %v696_v37 = vadd.f32 %v620_v32, %v293_v52 }
 0x16a   :  { %v697_v38 = vadd.f32 %v622_v36, %v295_v33  ;;  %v298_v1 = vpop.f32.mrb[2].mxu1 }
 0x16b   :  { %v7147_v6 = vadd.f32 %v298_v1, %v209_v28  ;;  %v300_v42 = vpop.f32.mrb[3].mxu1  ;;  %v4884_v18 = vmul.f32 -1.442695, %v696_v37 }
 0x16c   :  { %v7149_v43 = vadd.f32 %v300_v42, %v213_v30  ;;  %v4885_v35 = vmul.f32 -1.442695, %v697_v38  ;;  %v485_v42 = vld [vmem:[%s8170_s5] sm:$0xff] }
 0x16e   :  { %v304_v45 = vpop.f32.mrb[4].mxu1  ;;  %6330 = vpow2.f32 %v4885_v35  ;;  %v971_v35 = vld [vmem:[#allocation9] sm:$0xff] }
 0x16f   :  { %v7151_v46 = vadd.f32 %v304_v45, %v209_v28  ;;  %v306_v47 = vpop.f32.mrb[5].mxu1  ;;  %6332 = vpow2.f32 %v4884_v18  ;;  %v975_v18 = vld [vmem:[#allocation9 + $0x20] sm:$0xff] }
 0x170   :  { %v7153_v49 = vadd.f32 %v306_v47, %v213_v30 }
 0x172   :  { %v310_v51 = vpop.f32.mrb[6].mxu1 }
 0x173   :  { %v7155_v53 = vadd.f32 %v310_v51, %v209_v28  ;;  %v312_v54 = vpop.f32.mrb[7].mxu1 }
 0x174   :  { %v7157_v55 = vadd.f32 %v312_v54, %v213_v30 }
 0x176   :  { %v316_v56 = vpop.f32.mrb[8].mxu1 }
 0x177   :  { %v7159_v59 = vadd.f32 %v316_v56, %v209_v28  ;;  %v318_v60 = vpop.f32.mrb[9].mxu1 }
 0x178   :  { %v7161_v61 = vadd.f32 %v318_v60, %v213_v30  ;;  %v6331_v23 = vpop.eup %6330 }
 0x179   :  { %v6333_v31 = vpop.eup %6332  ;;  %v709_v52 = vadd.f32 1.0, %v6331_v23  ;;  %v7217_v23 = vpack.c.bf16 %v975_v18, %v971_v35  ;;  %v1007_v35 = vld [vmem:[#allocation9 + $0x120] sm:$0xff] }
 0x17a   :  { %v322_v62 = vpop.f32.mrb[10].mxu1 }
 0x17b   :  { %v7163_v63 = vadd.f32 %v322_v62, %v209_v28  ;;  %v324_v3 = vpop.f32.mrb[11].mxu1  ;;  %6334 = vrcp.f32 %v709_v52  ;;  %v984_v52 = vld [vmem:[#allocation9 + $0x68] sm:$0xff] }
 0x17c   :  { %v7165_v4 = vadd.f32 %v324_v3, %v213_v30 }
 0x17e   :  { %v328_v5 = vpop.f32.mrb[12].mxu1 }
 0x17f   :  { %v7167_v7 = vadd.f32 %v328_v5, %v209_v28  ;;  %v330_v10 = vpop.f32.mrb[13].mxu1 }
 0x180   :  { %v7169_v22 = vadd.f32 %v330_v10, %v213_v30  ;;  %v972_v10 = vld [vmem:[#allocation9 + $0x8] sm:$0xff] }
 0x182   :  { %v334_v11 = vpop.f32.mrb[14].mxu1 }
 0x183   :  { %v7171_v12 = vadd.f32 %v334_v11, %v209_v28  ;;  %v336_v16 = vpop.f32.mrb[15].mxu1  ;;  %v703_v28 = vadd.f32 1.0, %v6333_v31  ;;  %v976_v11 = vld [vmem:[#allocation9 + $0x28] sm:$0xff] }
 0x184   :  { %v7173_v17 = vadd.f32 %v336_v16, %v213_v30  ;;  %v7183_v30 = vrot.slane %v204_v25, %v8177_v50  ;;  %v7215_v16 = vpack.c.bf16 %v976_v11, %v972_v10  ;;  %v980_v31 = vld [vmem:[#allocation9 + $0x48] sm:$0xff]  ;;  %v1003_v11 = vld [vmem:[#allocation9 + $0x100] sm:$0xff] }
 0x185   :  { %6336 = vrcp.f32 %v703_v28  ;;  %v6335_v1 = vpop.eup %6334  ;;  %v7221_v28 = vpack.c.bf16 %v984_v52, %v980_v31  ;;  %v7241_v18 = vpack.c.bf16 %v1007_v35, %v1003_v11  ;;  %v1012_v31 = vld [vmem:[#allocation9 + $0x148] sm:$0xff]  ;;  %v1027_v35 = vld [vmem:[#allocation9 + $0x1c0] sm:$0xff] }
 0x186   :  { %v719_v25 = vmul.f32 %v6335_v1, %v485_v42  ;;  %5195 = vmatprep.subr.bf16.mxu0 %v7215_v16  ;;  %v991_v1 = vld [vmem:[#allocation9 + $0xa0] sm:$0xff]  ;;  %v1016_v52 = vld [vmem:[#allocation9 + $0x168] sm:$0xff] }
 0x18f   :  { %v6337_v45 = vpop.eup %6336 }
 0x1a6   :  { %v691_v32 = vpop.f32.mrb[16].mxu1 }
 0x1a7   :  { %v6218_v33 = vadd.f32 %v691_v32, %v7179_v57  ;;  %v693_v36 = vpop.f32.mrb[17].mxu1  ;;  %v979_v32 = vld [vmem:[#allocation9 + $0x40] sm:$0xff] }
 0x1a8   :  { %v6219_v37 = vadd.f32 %v693_v36, %v7183_v30  ;;  %v992_v36 = vld [vmem:[#allocation9 + $0xa8] sm:$0xff] }
 0x1a9   :  { %6338 = vtanh.f32 %v6218_v33 }
 0x1aa   :  { %v4886_v38 = vmul.f32 -1.442695, %v6219_v37 }
 0x1ac   :  { %6340 = vpow2.f32 %v4886_v38  ;;  %v987_v38 = vld [vmem:[#allocation9 + $0x80] sm:$0xff] }
 0x1ad   :  { %v7229_v42 = vpack.c.bf16 %v991_v1, %v987_v38  ;;  %v1024_v38 = vld [vmem:[#allocation9 + $0x1a8] sm:$0xff] }
 0x1b3   :  { %v6339_v47 = vpop.eup %6338 }
 0x1b4   :  { %v720_v51 = vmul.f32 %v6339_v47, %v6337_v45  ;;  %v996_v45 = vld [vmem:[#allocation9 + $0xc8] sm:$0xff] }
 0x1b5   :  { %v1000_v47 = vld [vmem:[#allocation9 + $0xe8] sm:$0xff] }
 0x1b6   :  { %v6341_v54 = vpop.eup %6340  ;;  %v7190_v56 = vadd.f32 %v720_v51, %v719_v25  ;;  %v7233_v25 = vpack.c.bf16 %v1000_v47, %v996_v45  ;;  %v995_v51 = vld [vmem:[#allocation9 + $0xc0] sm:$0xff] }
 0x1b7   :  { %v716_v60 = vadd.f32 1.0, %v6341_v54  ;;  %v999_v54 = vld [vmem:[#allocation9 + $0xe0] sm:$0xff] }
 0x1b8   :  { %6342 = vtanh.f32 %v7190_v56  ;;  %v1019_v47 = vld [vmem:[#allocation9 + $0x180] sm:$0xff] }
 0x1b9   :  { %6344 = vrcp.f32 %v716_v60  ;;  %v7235_v60 = vpack.c.bf16 %v999_v54, %v995_v51  ;;  %v1023_v51 = vld [vmem:[#allocation9 + $0x1a0] sm:$0xff]  ;;  %v1028_v54 = vld [vmem:[#allocation9 + $0x1c8] sm:$0xff] }
 0x1c2   :  { %v6343_v62 = vpop.eup %6342 }
 0x1c3   :  { %v6345_v3 = vpop.eup %6344 }
 0x1c4   :  { %v7193_v5 = vmul.f32 %v6345_v3, %v6343_v62  ;;  %v1004_v62 = vld [vmem:[#allocation9 + $0x108] sm:$0xff] }
 0x1c5   :  { %v1008_v3 = vld [vmem:[#allocation9 + $0x128] sm:$0xff] }
 0x1c6   :  { %859 = vmatmul.mubr.f32.vlgmr.msra.gmra.mrb[2].mxu0 %v7193_v5  ;;  %930 = vmatmul.mubr.f32.vlgmr.msra.gmra.mrb[18].mxu1 %v7193_v5  ;;  %v7239_v10 = vpack.c.bf16 %v1008_v3, %v1004_v62  ;;  %v1032_v62 = vld [vmem:[#allocation9 + $0x1e8] sm:$0xff]  ;;  %v7253_v3 = vpack.c.bf16 %v1023_v51, %v1019_v47 }
 0x1c7   :  { %5229 = vmatpush1.bf16.msra.mxu1 %v7057_v15  ;;  %1099 = vmatprep.mubr.f32.mxu0 %v8180_v0  ;;  %v7256_v11 = vpack.c.bf16 %v1032_v62, %v1028_v54 }
 0x1c8   :  { %5231 = vmatprep.subr.bf16.mxu1 %v7060_v20  ;;  %1170 = vmatprep.mubr.f32.mxu1 %v8180_v0 }
 0x1c9   :  { %5197 = vmatpush1.bf16.msra.mxu0 %v7217_v23 }
 0x1ca   :  { %5199 = vmatprep.subr.bf16.mxu0 %v7221_v28 }
 0x1cb   :  { %5233 = vmatpush1.bf16.msra.mxu1 %v7066_v29 }
 0x1cc   :  { %5235 = vmatprep.subr.bf16.mxu1 %v7069_v34 }
 0x1cf   :  { %5237 = vmatpush1.bf16.msra.mxu1 %v7074_v41 }
 0x1d0   :  { %5239 = vmatprep.subr.bf16.mxu1 %v7077_v48 }
 0x1d3   :  { %5241 = vmatpush1.bf16.msra.mxu1 %v7082_v58 }
 0x1d4   :  { %5243 = vmatprep.subr.bf16.mxu1 %v7085_v2 }
 0x1d7   :  { %5245 = vmatpush1.bf16.msra.mxu1 %v7090_v9 }
 0x1d8   :  { %5247 = vmatprep.subr.bf16.mxu1 %v7093_v8 }
 0x1db   :  { %5249 = vmatpush1.bf16.msra.mxu1 %v7098_v13 }
 0x1dc   :  { %5251 = vmatprep.subr.bf16.mxu1 %v7101_v14 }
 0x1df   :  { %5253 = vmatpush1.bf16.msra.mxu1 %v7106_v26 }
 0x1e0   :  { %5255 = vmatprep.subr.bf16.mxu1 %v7109_v19 }
 0x1e3   :  { %5257 = vmatpush1.bf16.msra.mxu1 %v7114_v24  ;;  %v983_v24 = vld [vmem:[#allocation9 + $0x60] sm:$0xff] }
 0x1e4   :  { %5291 = vmatprep.subr.bf16.mxu1 %v7051_v40  ;;  %v7223_v33 = vpack.c.bf16 %v983_v24, %v979_v32  ;;  %v988_v40 = vld [vmem:[#allocation9 + $0x88] sm:$0xff]  ;;  %v1011_v32 = vld [vmem:[#allocation9 + $0x140] sm:$0xff]  ;;  %v7245_v24 = vpack.c.bf16 %v1016_v52, %v1012_v31 }
 0x1e5   :  { %v7227_v37 = vpack.c.bf16 %v992_v36, %v988_v40  ;;  %v1015_v40 = vld [vmem:[#allocation9 + $0x160] sm:$0xff]  ;;  %v1020_v36 = vld [vmem:[#allocation9 + $0x188] sm:$0xff] }
 0x1e6   :  { %5201 = vmatpush1.bf16.msra.mxu0 %v7223_v33  ;;  %v7247_v1 = vpack.c.bf16 %v1015_v40, %v1011_v32  ;;  %v7249_v45 = vpack.c.bf16 %v1024_v38, %v1020_v36  ;;  %v1031_v31 = vld [vmem:[#allocation9 + $0x1e0] sm:$0xff] }
 0x1e7   :  { %5203 = vmatprep.subr.bf16.mxu0 %v7227_v37  ;;  %v7259_v52 = vpack.c.bf16 %v1031_v31, %v1027_v35 }
 0x1ea   :  { %5205 = vmatpush1.bf16.msra.mxu0 %v7229_v42 }
 0x1eb   :  { %5207 = vmatprep.subr.bf16.mxu0 %v7233_v25 }
 0x1ee   :  { %5209 = vmatpush1.bf16.msra.mxu0 %v7235_v60 }
 0x1ef   :  { %5211 = vmatprep.subr.bf16.mxu0 %v7239_v10 }
 0x1f2   :  { %5213 = vmatpush1.bf16.msra.mxu0 %v7241_v18 }
 0x1f3   :  { %5215 = vmatprep.subr.bf16.mxu0 %v7245_v24 }
 0x1f6   :  { %5217 = vmatpush1.bf16.msra.mxu0 %v7247_v1 }
 0x1f7   :  { %5219 = vmatprep.subr.bf16.mxu0 %v7249_v45 }
 0x1fa   :  { %5221 = vmatpush1.bf16.msra.mxu0 %v7253_v3 }
 0x1fb   :  { %5223 = vmatprep.subr.bf16.mxu0 %v7256_v11 }
 0x1fe   :  { %5225 = vmatpush1.bf16.msra.mxu0 %v7259_v52 }
 0x1ff   :  { %5259 = vmatprep.subr.bf16.mxu0 %v7215_v16 }
 0x299   :  { %v860_v32 = vpop.f32.mrb[2].mxu0  ;;  %v931_v40 = vpop.f32.mrb[18].mxu1 }
 0x29a   :  { %v936_v36 = vadd.f32 %v860_v32, %v7147_v6  ;;  %v862_v38 = vpop.f32.mrb[3].mxu0  ;;  %v933_v47 = vpop.f32.mrb[19].mxu1  ;;  %v6220_v21 = vadd.f32 %v931_v40, %v7179_v57 }
 0x29b   :  { %v937_v51 = vadd.f32 %v862_v38, %v7149_v43  ;;  %v6221_v35 = vadd.f32 %v933_v47, %v7183_v30 }
 0x29c   :  { %v4887_v54 = vmul.f32 -1.442695, %v936_v36 }
 0x29d   :  { %v4888_v62 = vmul.f32 -1.442695, %v937_v51  ;;  %v4889_v31 = vmul.f32 -1.442695, %v6221_v35 }
 0x29e   :  { %6346 = vpow2.f32 %v4887_v54 }
 0x29f   :  { %6348 = vpow2.f32 %v4888_v62 }
 0x2a0   :  { %6350 = vpow2.f32 %v4889_v31 }
 0x2a1   :  { %6352 = vtanh.f32 %v6220_v21 }
 0x2a8   :  { %v6347_v50 = vpop.eup %6346 }
 0x2a9   :  { %v6349_v27 = vpop.eup %6348  ;;  %v943_v44 = vadd.f32 1.0, %v6347_v50 }
 0x2aa   :  { %v949_v0 = vadd.f32 1.0, %v6349_v27  ;;  %v6351_v6 = vpop.eup %6350 }
 0x2ab   :  { %6354 = vrcp.f32 %v943_v44  ;;  %v6353_v32 = vpop.eup %6352  ;;  %v956_v51 = vadd.f32 1.0, %v6351_v6 }
 0x2ac   :  { %6356 = vrcp.f32 %v949_v0  ;;  %v8182_v0 = vmov 0.0  }
 0x2ad   :  { %6358 = vrcp.f32 %v956_v51 }
 0x2b5   :  { %v6355_v43 = vpop.eup %6354 }
 0x2b6   :  { %v6357_v36 = vpop.eup %6356  ;;  %v960_v38 = vmul.f32 %v6355_v43, %v6353_v32 }
 0x2b7   :  { %v959_v54 = vmul.f32 %v6357_v36, %v7190_v56  ;;  %v6359_v40 = vpop.eup %6358 }
 0x2b9   :  { %v7269_v47 = vadd.f32 %v960_v38, %v959_v54 }
 0x2bb   :  { %6360 = vtanh.f32 %v7269_v47 }
 0x2c5   :  { %v6361_v50 = vpop.eup %6360 }
 0x2c6   :  { %v7272_v62 = vmul.f32 %v6361_v50, %v6359_v40  ;;  %v1460_v40 = vld [vmem:[#allocation9 + $0x38] sm:$0xff] }
 0x2c8   :  { %1100 = vmatmul.mubr.f32.vlgmr.msra.gmra.mrb[4].mxu0 %v7272_v62  ;;  %1171 = vmatmul.mubr.f32.vlgmr.msra.gmra.mrb[20].mxu1 %v7272_v62 }
 0x2c9   :  { %5261 = vmatpush1.bf16.msra.mxu0 %v7217_v23  ;;  %5293 = vmatpush1.bf16.msra.mxu1 %v7057_v15  ;;  %v1270_v15 = vld [vmem:[#allocation9 + $0x1d0] sm:$0xff] }
 0x2ca   :  { %5263 = vmatprep.subr.bf16.mxu0 %v7221_v28  ;;  %5295 = vmatprep.subr.bf16.mxu1 %v7060_v20  ;;  %v1274_v20 = vld [vmem:[#allocation9 + $0x1f0] sm:$0xff] }
 0x2cb   :  { %1340 = vmatprep.mubr.f32.mxu0 %v8182_v0  ;;  %1411 = vmatprep.mubr.f32.mxu1 %v8182_v0 }
 0x2cd   :  { %5265 = vmatpush1.bf16.msra.mxu0 %v7223_v33  ;;  %5297 = vmatpush1.bf16.msra.mxu1 %v7066_v29  ;;  %v7308_v29 = vpack.c.bf16 %v1274_v20, %v1270_v15  ;;  %v1455_v15 = vld [vmem:[#allocation9 + $0x10] sm:$0xff] }
 0x2ce   :  { %5267 = vmatprep.subr.bf16.mxu0 %v7227_v37  ;;  %5299 = vmatprep.subr.bf16.mxu1 %v7069_v34  ;;  %v1459_v20 = vld [vmem:[#allocation9 + $0x30] sm:$0xff] }
 0x2d1   :  { %5269 = vmatpush1.bf16.msra.mxu0 %v7229_v42  ;;  %5301 = vmatpush1.bf16.msra.mxu1 %v7074_v41 }
 0x2d2   :  { %5271 = vmatprep.subr.bf16.mxu0 %v7233_v25  ;;  %5303 = vmatprep.subr.bf16.mxu1 %v7077_v48 }
 0x2d5   :  { %5273 = vmatpush1.bf16.msra.mxu0 %v7235_v60  ;;  %5305 = vmatpush1.bf16.msra.mxu1 %v7082_v58 }
 0x2d6   :  { %5275 = vmatprep.subr.bf16.mxu0 %v7239_v10  ;;  %5307 = vmatprep.subr.bf16.mxu1 %v7085_v2 }
 0x2d9   :  { %5277 = vmatpush1.bf16.msra.mxu0 %v7241_v18  ;;  %5309 = vmatpush1.bf16.msra.mxu1 %v7090_v9 }
 0x2da   :  { %5279 = vmatprep.subr.bf16.mxu0 %v7245_v24  ;;  %5311 = vmatprep.subr.bf16.mxu1 %v7093_v8 }
 0x2dd   :  { %5281 = vmatpush1.bf16.msra.mxu0 %v7247_v1  ;;  %5313 = vmatpush1.bf16.msra.mxu1 %v7098_v13 }
 0x2de   :  { %5283 = vmatprep.subr.bf16.mxu0 %v7249_v45  ;;  %5315 = vmatprep.subr.bf16.mxu1 %v7101_v14 }
 0x2e1   :  { %5285 = vmatpush1.bf16.msra.mxu0 %v7253_v3  ;;  %5317 = vmatpush1.bf16.msra.mxu1 %v7106_v26 }
 0x2e2   :  { %5287 = vmatprep.subr.bf16.mxu0 %v7256_v11  ;;  %5319 = vmatprep.subr.bf16.mxu1 %v7109_v19 }
 0x2e5   :  { %5289 = vmatpush1.bf16.msra.mxu0 %v7259_v52  ;;  %5321 = vmatpush1.bf16.msra.mxu1 %v7308_v29 }
 0x2e6   :  { %5323 = vmatprep.subr.bf16.mxu0 %v7215_v16 }
 0x39b   :  { %v1101_v34 = vpop.f32.mrb[4].mxu0  ;;  %v1172_v41 = vpop.f32.mrb[20].mxu1 }
 0x39c   :  { %v1177_v48 = vadd.f32 %v1101_v34, %v7151_v46  ;;  %v1103_v58 = vpop.f32.mrb[5].mxu0  ;;  %v1174_v2 = vpop.f32.mrb[21].mxu1  ;;  %v6222_v19 = vadd.f32 %v1172_v41, %v7179_v57  ;;  %v7343_v34 = vpack.c.bf16 %v1459_v20, %v1455_v15  ;;  %v1464_v41 = vld [vmem:[#allocation9 + $0x58] sm:$0xff]  ;;  %v1495_v15 = vld [vmem:[#allocation9 + $0x150] sm:$0xff] }
 0x39d   :  { %v1178_v9 = vadd.f32 %v1103_v58, %v7153_v49  ;;  %v6223_v14 = vadd.f32 %v1174_v2, %v7183_v30  ;;  %v1463_v2 = vld [vmem:[#allocation9 + $0x50] sm:$0xff] }
 0x39e   :  { %v4890_v8 = vmul.f32 -1.442695, %v1177_v48  ;;  %v1468_v48 = vld [vmem:[#allocation9 + $0x78] sm:$0xff] }
 0x39f   :  { %v4891_v13 = vmul.f32 -1.442695, %v1178_v9  ;;  %v4892_v26 = vmul.f32 -1.442695, %v6223_v14  ;;  %v7347_v58 = vpack.c.bf16 %v1468_v48, %v1464_v41  ;;  %v1467_v9 = vld [vmem:[#allocation9 + $0x70] sm:$0xff]  ;;  %v1504_v48 = vld [vmem:[#allocation9 + $0x198] sm:$0xff] }
 0x3a0   :  { %6362 = vpow2.f32 %v4890_v8  ;;  %v7349_v8 = vpack.c.bf16 %v1467_v9, %v1463_v2  ;;  %v1499_v41 = vld [vmem:[#allocation9 + $0x170] sm:$0xff]  ;;  %v1508_v2 = vld [vmem:[#allocation9 + $0x1b8] sm:$0xff] }
 0x3a1   :  { %6364 = vpow2.f32 %v4891_v13  ;;  %v1476_v13 = vld [vmem:[#allocation9 + $0xb8] sm:$0xff]  ;;  %v7373_v9 = vpack.c.bf16 %v1499_v41, %v1495_v15 }
 0x3a2   :  { %6366 = vpow2.f32 %v4892_v26  ;;  %v1471_v26 = vld [vmem:[#allocation9 + $0x90] sm:$0xff] }
 0x3a3   :  { %6368 = vtanh.f32 %v6222_v19  ;;  %v1475_v19 = vld [vmem:[#allocation9 + $0xb0] sm:$0xff] }
 0x3aa   :  { %v6363_v44 = vpop.eup %6362 }
 0x3ab   :  { %v6365_v27 = vpop.eup %6364  ;;  %v1184_v21 = vadd.f32 1.0, %v6363_v44  ;;  %v7355_v44 = vpack.c.bf16 %v1475_v19, %v1471_v26  ;;  %v1507_v26 = vld [vmem:[#allocation9 + $0x1b0] sm:$0xff]  ;;  %v1512_v19 = vld [vmem:[#allocation9 + $0x1d8] sm:$0xff] }
 0x3ac   :  { %v1190_v56 = vadd.f32 1.0, %v6365_v27  ;;  %v6367_v46 = vpop.eup %6366  ;;  %v1480_v27 = vld [vmem:[#allocation9 + $0xd8] sm:$0xff] }
 0x3ad   :  { %6370 = vrcp.f32 %v1184_v21  ;;  %v6369_v35 = vpop.eup %6368  ;;  %v1197_v32 = vadd.f32 1.0, %v6367_v46  ;;  %v1484_v21 = vld [vmem:[#allocation9 + $0xf8] sm:$0xff]  ;;  %v1479_v46 = vld [vmem:[#allocation9 + $0xd0] sm:$0xff] }
 0x3ae   :  { %6372 = vrcp.f32 %v1190_v56  ;;  %v7359_v56 = vpack.c.bf16 %v1484_v21, %v1480_v27  ;;  %v1516_v27 = vld [vmem:[#allocation9 + $0x1f8] sm:$0xff] }
 0x3af   :  { %6374 = vrcp.f32 %v1197_v32 }
 0x3b7   :  { %v6371_v49 = vpop.eup %6370 }
 0x3b8   :  { %v6373_v31 = vpop.eup %6372  ;;  %v1201_v6 = vmul.f32 %v6371_v49, %v6369_v35  ;;  %v1483_v35 = vld [vmem:[#allocation9 + $0xf0] sm:$0xff] }
 0x3b9   :  { %v1200_v43 = vmul.f32 %v6373_v31, %v7269_v47  ;;  %v6375_v38 = vpop.eup %6374  ;;  %v1456_v47 = vld [vmem:[#allocation9 + $0x18] sm:$0xff]  ;;  %v7361_v49 = vpack.c.bf16 %v1483_v35, %v1479_v46  ;;  %v7382_v46 = vpack.c.bf16 %v1516_v27, %v1512_v19 }
 0x3ba   :  { %v7341_v50 = vpack.c.bf16 %v1460_v40, %v1456_v47  ;;  %v1488_v31 = vld [vmem:[#allocation9 + $0x118] sm:$0xff] }
 0x3bb   :  { %v7316_v36 = vadd.f32 %v1201_v6, %v1200_v43  ;;  %v1492_v6 = vld [vmem:[#allocation9 + $0x138] sm:$0xff]  ;;  %v1487_v43 = vld [vmem:[#allocation9 + $0x110] sm:$0xff] }
 0x3bc   :  { %5355 = vmatprep.subr.bf16.mxu1 %v7341_v50  ;;  %v7365_v32 = vpack.c.bf16 %v1492_v6, %v1488_v31  ;;  %v1496_v47 = vld [vmem:[#allocation9 + $0x158] sm:$0xff] }
 0x3bd   :  { %6376 = vtanh.f32 %v7316_v36  ;;  %v1500_v40 = vld [vmem:[#allocation9 + $0x178] sm:$0xff] }
 0x3be   :  { %v7371_v20 = vpack.c.bf16 %v1500_v40, %v1496_v47 }
 0x3c7   :  { %v6377_v51 = vpop.eup %6376 }
 0x3c8   :  { %v7319_v54 = vmul.f32 %v6377_v51, %v6375_v38  ;;  %v1491_v38 = vld [vmem:[#allocation9 + $0x130] sm:$0xff] }
 0x3c9   :  { %v7367_v51 = vpack.c.bf16 %v1491_v38, %v1487_v43 }
 0x3ca   :  { %1341 = vmatmul.mubr.f32.vlgmr.msra.gmra.mrb[6].mxu0 %v7319_v54  ;;  %1412 = vmatmul.mubr.f32.vlgmr.msra.gmra.mrb[22].mxu1 %v7319_v54 }
 0x3cb   :  { %5325 = vmatpush1.bf16.msra.mxu0 %v7217_v23  ;;  %1581 = vmatprep.mubr.f32.mxu0 %v8182_v0 }
 0x3cc   :  { %5327 = vmatprep.subr.bf16.mxu0 %v7221_v28  ;;  %1652 = vmatprep.mubr.f32.mxu1 %v8182_v0 }
 0x3cd   :  { %5357 = vmatpush1.bf16.msra.mxu1 %v7343_v34 }
 0x3ce   :  { %5359 = vmatprep.subr.bf16.mxu1 %v7347_v58 }
 0x3cf   :  { %5329 = vmatpush1.bf16.msra.mxu0 %v7223_v33 }
 0x3d0   :  { %5331 = vmatprep.subr.bf16.mxu0 %v7227_v37 }
 0x3d1   :  { %5361 = vmatpush1.bf16.msra.mxu1 %v7349_v8 }
 0x3d3   :  { %5333 = vmatpush1.bf16.msra.mxu0 %v7229_v42 }
 0x3d4   :  { %5335 = vmatprep.subr.bf16.mxu0 %v7233_v25 }
 0x3d7   :  { %5337 = vmatpush1.bf16.msra.mxu0 %v7235_v60 }
 0x3d8   :  { %5339 = vmatprep.subr.bf16.mxu0 %v7239_v10 }
 0x3db   :  { %5341 = vmatpush1.bf16.msra.mxu0 %v7241_v18 }
 0x3dc   :  { %5343 = vmatprep.subr.bf16.mxu0 %v7245_v24 }
 0x3df   :  { %5345 = vmatpush1.bf16.msra.mxu0 %v7247_v1 }
 0x3e0   :  { %5347 = vmatprep.subr.bf16.mxu0 %v7249_v45 }
 0x3e3   :  { %5349 = vmatpush1.bf16.msra.mxu0 %v7253_v3 }
 0x3e4   :  { %5351 = vmatprep.subr.bf16.mxu0 %v7256_v11 }
 0x3e7   :  { %5353 = vmatpush1.bf16.msra.mxu0 %v7259_v52 }
 0x3e8   :  { %5387 = vmatprep.subr.bf16.mxu0 %v7215_v16  ;;  %v1472_v16 = vld [vmem:[#allocation9 + $0x98] sm:$0xff] }
 0x3e9   :  { %v7353_v14 = vpack.c.bf16 %v1476_v13, %v1472_v16  ;;  %v7375_v16 = vpack.c.bf16 %v1508_v2, %v1504_v48  ;;  %v1503_v13 = vld [vmem:[#allocation9 + $0x190] sm:$0xff] }
 0x3ea   :  { %v7379_v21 = vpack.c.bf16 %v1507_v26, %v1503_v13 }
 0x3eb   :  { %5363 = vmatprep.subr.bf16.mxu1 %v7353_v14 }
 0x3ec   :  { %5365 = vmatpush1.bf16.msra.mxu1 %v7355_v44 }
 0x3ed   :  { %5367 = vmatprep.subr.bf16.mxu1 %v7359_v56 }
 0x3f0   :  { %5369 = vmatpush1.bf16.msra.mxu1 %v7361_v49 }
 0x3f1   :  { %5371 = vmatprep.subr.bf16.mxu1 %v7365_v32 }
 0x3f4   :  { %5373 = vmatpush1.bf16.msra.mxu1 %v7367_v51 }
 0x3f5   :  { %5375 = vmatprep.subr.bf16.mxu1 %v7371_v20 }
 0x3f8   :  { %5377 = vmatpush1.bf16.msra.mxu1 %v7373_v9 }
 0x3f9   :  { %5379 = vmatprep.subr.bf16.mxu1 %v7375_v16 }
 0x3fc   :  { %5381 = vmatpush1.bf16.msra.mxu1 %v7379_v21 }
 0x3fd   :  { %5383 = vmatprep.subr.bf16.mxu1 %v7382_v46 }
 0x400   :  { %5385 = vmatpush1.bf16.msra.mxu1 %v7308_v29 }
 0x401   :  { %5419 = vmatprep.subr.bf16.mxu1 %v7341_v50 }
 0x49d   :  { %v1342_v35 = vpop.f32.mrb[6].mxu0  ;;  %v1413_v31 = vpop.f32.mrb[22].mxu1 }
 0x49e   :  { %v1418_v6 = vadd.f32 %v1342_v35, %v7155_v53  ;;  %v1344_v43 = vpop.f32.mrb[7].mxu0  ;;  %v1415_v38 = vpop.f32.mrb[23].mxu1  ;;  %v6224_v2 = vadd.f32 %v1413_v31, %v7179_v57 }
 0x49f   :  { %v1419_v47 = vadd.f32 %v1344_v43, %v7157_v55  ;;  %v6225_v41 = vadd.f32 %v1415_v38, %v7183_v30 }
 0x4a0   :  { %v4893_v40 = vmul.f32 -1.442695, %v1418_v6 }
 0x4a1   :  { %v4894_v15 = vmul.f32 -1.442695, %v1419_v47  ;;  %v4895_v48 = vmul.f32 -1.442695, %v6225_v41 }
 0x4a2   :  { %6378 = vpow2.f32 %v4893_v40 }
 0x4a3   :  { %6380 = vpow2.f32 %v4894_v15 }
 0x4a4   :  { %6382 = vpow2.f32 %v4895_v48 }
 0x4a5   :  { %6384 = vtanh.f32 %v6224_v2 }
 0x4ac   :  { %v6379_v13 = vpop.eup %6378 }
 0x4ad   :  { %v6381_v26 = vpop.eup %6380  ;;  %v1425_v19 = vadd.f32 1.0, %v6379_v13 }
 0x4ae   :  { %v1431_v27 = vadd.f32 1.0, %v6381_v26  ;;  %v6383_v53 = vpop.eup %6382 }
 0x4af   :  { %6386 = vrcp.f32 %v1425_v19  ;;  %v6385_v35 = vpop.eup %6384  ;;  %v1438_v47 = vadd.f32 1.0, %v6383_v53 }
 0x4b0   :  { %6388 = vrcp.f32 %v1431_v27 }
 0x4b1   :  { %6390 = vrcp.f32 %v1438_v47  ;;  %v1935_v47 = vld [vmem:[#allocation9] sm:$0xff] }
 0x4b9   :  { %v6387_v55 = vpop.eup %6386 }
 0x4ba   :  { %v6389_v6 = vpop.eup %6388  ;;  %v1442_v43 = vmul.f32 %v6387_v55, %v6385_v35  ;;  %v1936_v55 = vld [vmem:[#allocation9 + $0x8] sm:$0xff] }
 0x4bb   :  { %v1441_v40 = vmul.f32 %v6389_v6, %v7316_v36  ;;  %v6391_v31 = vpop.eup %6390  ;;  %v1940_v6 = vld [vmem:[#allocation9 + $0x28] sm:$0xff] }
 0x4bd   :  { %v7393_v38 = vadd.f32 %v1442_v43, %v1441_v40  ;;  %v5450_v43 = vpack.c.bf16 %v1940_v6, %v1936_v55  ;;  %v1939_v40 = vld [vmem:[#allocation9 + $0x20] sm:$0xff]  ;;  %v1984_v6 = vld [vmem:[#allocation9 + $0x188] sm:$0xff] }
 0x4be   :  { %v1979_v55 = vld [vmem:[#allocation9 + $0x160] sm:$0xff] }
 0x4bf   :  { %6392 = vtanh.f32 %v7393_v38 }
 0x4c9   :  { %v6393_v15 = vpop.eup %6392 }
 0x4ca   :  { %v7396_v41 = vmul.f32 %v6393_v15, %v6391_v31  ;;  %v1944_v31 = vld [vmem:[#allocation9 + $0x48] sm:$0xff] }
 0x4cb   :  { %v1948_v15 = vld [vmem:[#allocation9 + $0x68] sm:$0xff] }
 0x4cc   :  { %1582 = vmatmul.mubr.f32.vlgmr.msra.gmra.mrb[8].mxu0 %v7396_v41  ;;  %1653 = vmatmul.mubr.f32.vlgmr.msra.gmra.mrb[24].mxu1 %v7396_v41 }
 0x4cd   :  { %5389 = vmatpush1.bf16.msra.mxu0 %v7217_v23  ;;  %5421 = vmatpush1.bf16.msra.mxu1 %v7343_v34 }
 0x4ce   :  { %5391 = vmatprep.subr.bf16.mxu0 %v7221_v28  ;;  %5423 = vmatprep.subr.bf16.mxu1 %v7347_v58 }
 0x4cf   :  { %1822 = vmatprep.mubr.f32.mxu0 %v8182_v0  ;;  %1893 = vmatprep.mubr.f32.mxu1 %v8182_v0 }
 0x4d1   :  { %5393 = vmatpush1.bf16.msra.mxu0 %v7223_v33  ;;  %5425 = vmatpush1.bf16.msra.mxu1 %v7349_v8 }
 0x4d2   :  { %5395 = vmatprep.subr.bf16.mxu0 %v7227_v37  ;;  %5427 = vmatprep.subr.bf16.mxu1 %v7353_v14 }
 0x4d5   :  { %5397 = vmatpush1.bf16.msra.mxu0 %v7229_v42  ;;  %5429 = vmatpush1.bf16.msra.mxu1 %v7355_v44 }
 0x4d6   :  { %5399 = vmatprep.subr.bf16.mxu0 %v7233_v25  ;;  %5431 = vmatprep.subr.bf16.mxu1 %v7359_v56 }
 0x4d9   :  { %5401 = vmatpush1.bf16.msra.mxu0 %v7235_v60  ;;  %5433 = vmatpush1.bf16.msra.mxu1 %v7361_v49 }
 0x4da   :  { %5403 = vmatprep.subr.bf16.mxu0 %v7239_v10  ;;  %5435 = vmatprep.subr.bf16.mxu1 %v7365_v32 }
 0x4dd   :  { %5405 = vmatpush1.bf16.msra.mxu0 %v7241_v18  ;;  %5437 = vmatpush1.bf16.msra.mxu1 %v7367_v51 }
 0x4de   :  { %5407 = vmatprep.subr.bf16.mxu0 %v7245_v24  ;;  %5439 = vmatprep.subr.bf16.mxu1 %v7371_v20 }
 0x4e1   :  { %5409 = vmatpush1.bf16.msra.mxu0 %v7247_v1  ;;  %5441 = vmatpush1.bf16.msra.mxu1 %v7373_v9 }
 0x4e2   :  { %5411 = vmatprep.subr.bf16.mxu0 %v7249_v45  ;;  %5443 = vmatprep.subr.bf16.mxu1 %v7375_v16 }
 0x4e5   :  { %5413 = vmatpush1.bf16.msra.mxu0 %v7253_v3  ;;  %5445 = vmatpush1.bf16.msra.mxu1 %v7379_v21 }
 0x4e6   :  { %5415 = vmatprep.subr.bf16.mxu0 %v7256_v11  ;;  %5447 = vmatprep.subr.bf16.mxu1 %v7382_v46 }
 0x4e9   :  { %5417 = vmatpush1.bf16.msra.mxu0 %v7259_v52  ;;  %5449 = vmatpush1.bf16.msra.mxu1 %v7308_v29 }
 0x4ea   :  { %5483 = vmatprep.subr.bf16.mxu1 %v7341_v50  ;;  %5451 = vmatprep.subr.bf16.mxu0 %v5450_v43 }
 0x59f   :  { %v1583_v23 = vpop.f32.mrb[8].mxu0  ;;  %v1654_v28 = vpop.f32.mrb[24].mxu1 }
 0x5a0   :  { %v1659_v33 = vadd.f32 %v1583_v23, %v7159_v59  ;;  %v1585_v37 = vpop.f32.mrb[9].mxu0  ;;  %v1656_v42 = vpop.f32.mrb[25].mxu1  ;;  %v6226_v1 = vadd.f32 %v1654_v28, %v7179_v57  ;;  %v7466_v23 = vpack.c.bf16 %v1948_v15, %v1944_v31  ;;  %v1943_v28 = vld [vmem:[#allocation9 + $0x40] sm:$0xff] }
 0x5a1   :  { %v1660_v25 = vadd.f32 %v1585_v37, %v7161_v61  ;;  %v6227_v18 = vadd.f32 %v1656_v42, %v7183_v30  ;;  %v1983_v15 = vld [vmem:[#allocation9 + $0x180] sm:$0xff] }
 0x5a2   :  { %v4896_v60 = vmul.f32 -1.442695, %v1659_v33  ;;  %v1947_v33 = vld [vmem:[#allocation9 + $0x60] sm:$0xff] }
 0x5a3   :  { %v4897_v10 = vmul.f32 -1.442695, %v1660_v25  ;;  %v4898_v24 = vmul.f32 -1.442695, %v6227_v18  ;;  %v7468_v37 = vpack.c.bf16 %v1947_v33, %v1943_v28  ;;  %v1951_v25 = vld [vmem:[#allocation9 + $0x80] sm:$0xff]  ;;  %v1960_v18 = vld [vmem:[#allocation9 + $0xc8] sm:$0xff] }
 0x5a4   :  { %6394 = vpow2.f32 %v4896_v60  ;;  %v1955_v60 = vld [vmem:[#allocation9 + $0xa0] sm:$0xff]  ;;  %v1992_v33 = vld [vmem:[#allocation9 + $0x1c8] sm:$0xff] }
 0x5a5   :  { %6396 = vpow2.f32 %v4897_v10  ;;  %v7474_v10 = vpack.c.bf16 %v1955_v60, %v1951_v25  ;;  %v1987_v28 = vld [vmem:[#allocation9 + $0x1a0] sm:$0xff] }
 0x5a6   :  { %6398 = vpow2.f32 %v4898_v24  ;;  %v1964_v24 = vld [vmem:[#allocation9 + $0xe8] sm:$0xff]  ;;  %v1991_v60 = vld [vmem:[#allocation9 + $0x1c0] sm:$0xff] }
 0x5a7   :  { %6400 = vtanh.f32 %v6226_v1  ;;  %v7478_v1 = vpack.c.bf16 %v1964_v24, %v1960_v18  ;;  %v1995_v18 = vld [vmem:[#allocation9 + $0x1e0] sm:$0xff] }
 0x5a8   :  { %v7504_v24 = vpack.c.bf16 %v1995_v18, %v1991_v60 }
 0x5ae   :  { %v6395_v45 = vpop.eup %6394 }
 0x5af   :  { %v6397_v3 = vpop.eup %6396  ;;  %v1666_v11 = vadd.f32 1.0, %v6395_v45  ;;  %v1959_v45 = vld [vmem:[#allocation9 + $0xc0] sm:$0xff] }
 0x5b0   :  { %v1672_v52 = vadd.f32 1.0, %v6397_v3  ;;  %v6399_v59 = vpop.eup %6398  ;;  %v1963_v3 = vld [vmem:[#allocation9 + $0xe0] sm:$0xff] }
 0x5b1   :  { %6402 = vrcp.f32 %v1666_v11  ;;  %v6401_v36 = vpop.eup %6400  ;;  %v1679_v13 = vadd.f32 1.0, %v6399_v59  ;;  %v7480_v11 = vpack.c.bf16 %v1963_v3, %v1959_v45  ;;  %v1972_v59 = vld [vmem:[#allocation9 + $0x128] sm:$0xff] }
 0x5b2   :  { %6404 = vrcp.f32 %v1672_v52  ;;  %v1968_v52 = vld [vmem:[#allocation9 + $0x108] sm:$0xff] }
 0x5b3   :  { %6406 = vrcp.f32 %v1679_v13  ;;  %v1976_v13 = vld [vmem:[#allocation9 + $0x148] sm:$0xff] }
 0x5bb   :  { %v6403_v61 = vpop.eup %6402 }
 0x5bc   :  { %v6405_v48 = vpop.eup %6404  ;;  %v1683_v2 = vmul.f32 %v6403_v61, %v6401_v36  ;;  %v7484_v36 = vpack.c.bf16 %v1972_v59, %v1968_v52  ;;  %v1967_v61 = vld [vmem:[#allocation9 + $0x100] sm:$0xff] }
 0x5bd   :  { %v1682_v26 = vmul.f32 %v6405_v48, %v7393_v38  ;;  %v6407_v27 = vpop.eup %6406  ;;  %v7463_v38 = vpack.c.bf16 %v1939_v40, %v1935_v47  ;;  %v1971_v48 = vld [vmem:[#allocation9 + $0x120] sm:$0xff]  ;;  %v1988_v47 = vld [vmem:[#allocation9 + $0x1a8] sm:$0xff] }
 0x5be   :  { %v7494_v31 = vpack.c.bf16 %v1988_v47, %v1984_v6 }
 0x5bf   :  { %v7438_v19 = vadd.f32 %v1683_v2, %v1682_v26  ;;  %v7486_v2 = vpack.c.bf16 %v1971_v48, %v1967_v61  ;;  %v1980_v26 = vld [vmem:[#allocation9 + $0x168] sm:$0xff] }
 0x5c1   :  { %6408 = vtanh.f32 %v7438_v19 }
 0x5cb   :  { %v6409_v53 = vpop.eup %6408 }
 0x5cc   :  { %v7441_v35 = vmul.f32 %v6409_v53, %v6407_v27  ;;  %v1975_v27 = vld [vmem:[#allocation9 + $0x140] sm:$0xff]  ;;  %v7490_v53 = vpack.c.bf16 %v1980_v26, %v1976_v13 }
 0x5cd   :  { %v7492_v40 = vpack.c.bf16 %v1979_v55, %v1975_v27 }
 0x5ce   :  { %1823 = vmatmul.mubr.f32.vlgmr.msra.gmra.mrb[10].mxu0 %v7441_v35  ;;  %1894 = vmatmul.mubr.f32.vlgmr.msra.gmra.mrb[26].mxu1 %v7441_v35 }
 0x5cf   :  { %5485 = vmatpush1.bf16.msra.mxu1 %v7343_v34  ;;  %2063 = vmatprep.mubr.f32.mxu0 %v8182_v0 }
 0x5d0   :  { %5487 = vmatprep.subr.bf16.mxu1 %v7347_v58  ;;  %2134 = vmatprep.mubr.f32.mxu1 %v8182_v0 }
 0x5d1   :  { %5453 = vmatpush1.bf16.msra.mxu0 %v7463_v38 }
 0x5d2   :  { %5455 = vmatprep.subr.bf16.mxu0 %v7466_v23 }
 0x5d3   :  { %5489 = vmatpush1.bf16.msra.mxu1 %v7349_v8 }
 0x5d4   :  { %5491 = vmatprep.subr.bf16.mxu1 %v7353_v14 }
 0x5d5   :  { %5457 = vmatpush1.bf16.msra.mxu0 %v7468_v37 }
 0x5d7   :  { %5493 = vmatpush1.bf16.msra.mxu1 %v7355_v44 }
 0x5d8   :  { %5495 = vmatprep.subr.bf16.mxu1 %v7359_v56 }
 0x5db   :  { %5497 = vmatpush1.bf16.msra.mxu1 %v7361_v49 }
 0x5dc   :  { %5499 = vmatprep.subr.bf16.mxu1 %v7365_v32 }
 0x5df   :  { %5501 = vmatpush1.bf16.msra.mxu1 %v7367_v51 }
 0x5e0   :  { %5503 = vmatprep.subr.bf16.mxu1 %v7371_v20 }
 0x5e3   :  { %5505 = vmatpush1.bf16.msra.mxu1 %v7373_v9 }
 0x5e4   :  { %5507 = vmatprep.subr.bf16.mxu1 %v7375_v16 }
 0x5e7   :  { %5509 = vmatpush1.bf16.msra.mxu1 %v7379_v21 }
 0x5e8   :  { %5511 = vmatprep.subr.bf16.mxu1 %v7382_v46 }
 0x5eb   :  { %5513 = vmatpush1.bf16.msra.mxu1 %v7308_v29  ;;  %v1952_v29 = vld [vmem:[#allocation9 + $0x88] sm:$0xff] }
 0x5ec   :  { %5547 = vmatprep.subr.bf16.mxu1 %v7341_v50  ;;  %v1956_v50 = vld [vmem:[#allocation9 + $0xa8] sm:$0xff] }
 0x5ed   :  { %v7472_v42 = vpack.c.bf16 %v1956_v50, %v1952_v29  ;;  %v1996_v29 = vld [vmem:[#allocation9 + $0x1e8] sm:$0xff]  ;;  %v7498_v50 = vpack.c.bf16 %v1987_v28, %v1983_v15 }
 0x5ee   :  { %v7501_v25 = vpack.c.bf16 %v1996_v29, %v1992_v33 }
 0x5ef   :  { %5459 = vmatprep.subr.bf16.mxu0 %v7472_v42 }
 0x5f0   :  { %5461 = vmatpush1.bf16.msra.mxu0 %v7474_v10 }
 0x5f1   :  { %5463 = vmatprep.subr.bf16.mxu0 %v7478_v1 }
 0x5f4   :  { %5465 = vmatpush1.bf16.msra.mxu0 %v7480_v11 }
 0x5f5   :  { %5467 = vmatprep.subr.bf16.mxu0 %v7484_v36 }
 0x5f8   :  { %5469 = vmatpush1.bf16.msra.mxu0 %v7486_v2 }
 0x5f9   :  { %5471 = vmatprep.subr.bf16.mxu0 %v7490_v53 }
 0x5fc   :  { %5473 = vmatpush1.bf16.msra.mxu0 %v7492_v40 }
 0x5fd   :  { %5475 = vmatprep.subr.bf16.mxu0 %v7494_v31 }
 0x600   :  { %5477 = vmatpush1.bf16.msra.mxu0 %v7498_v50 }
 0x601   :  { %5479 = vmatprep.subr.bf16.mxu0 %v7501_v25 }
 0x604   :  { %5481 = vmatpush1.bf16.msra.mxu0 %v7504_v24 }
 0x605   :  { %5515 = vmatprep.subr.bf16.mxu0 %v5450_v43 }
 0x6a1   :  { %v1824_v45 = vpop.f32.mrb[10].mxu0  ;;  %v1895_v3 = vpop.f32.mrb[26].mxu1 }
 0x6a2   :  { %v1900_v52 = vadd.f32 %v1824_v45, %v7163_v63  ;;  %v1826_v59 = vpop.f32.mrb[11].mxu0  ;;  %v1897_v61 = vpop.f32.mrb[27].mxu1  ;;  %v6228_v6 = vadd.f32 %v1895_v3, %v7179_v57 }
 0x6a3   :  { %v1901_v48 = vadd.f32 %v1826_v59, %v7165_v4  ;;  %v6229_v27 = vadd.f32 %v1897_v61, %v7183_v30 }
 0x6a4   :  { %v4899_v13 = vmul.f32 -1.442695, %v1900_v52 }
 0x6a5   :  { %v4900_v26 = vmul.f32 -1.442695, %v1901_v48  ;;  %v4901_v55 = vmul.f32 -1.442695, %v6229_v27  ;;  %v2423_v48 = vld [vmem:[#allocation7 + $0x200] sm:$0xff]  ;;  %v2429_v27 = vld [vmem:[#allocation7 + $0x230] sm:$0xff] }
 0x6a6   :  { %6410 = vpow2.f32 %v4899_v13  ;;  %v2427_v13 = vld [vmem:[#allocation7 + $0x220] sm:$0xff] }
 0x6a7   :  { %6412 = vpow2.f32 %v4900_v26  ;;  %v2425_v26 = vld [vmem:[#allocation7 + $0x210] sm:$0xff] }
 0x6a8   :  { %6414 = vpow2.f32 %v4901_v55  ;;  %v2432_v55 = vld [vmem:[#allocation7 + $0x248] sm:$0xff] }
 0x6a9   :  { %6416 = vtanh.f32 %v6228_v6  ;;  %v2436_v6 = vld [vmem:[#allocation7 + $0x268] sm:$0xff] }
 0x6b0   :  { %v6411_v47 = vpop.eup %6410 }
 0x6b1   :  { %v6413_v15 = vpop.eup %6412  ;;  %v1907_v43 = vadd.f32 1.0, %v6411_v47  ;;  %v2434_v47 = vld [vmem:[#allocation7 + $0x258] sm:$0xff] }
 0x6b2   :  { %v1913_v28 = vadd.f32 1.0, %v6413_v15  ;;  %v6415_v63 = vpop.eup %6414  ;;  %v2438_v15 = vld [vmem:[#allocation7 + $0x278] sm:$0xff] }
 0x6b3   :  { %6418 = vrcp.f32 %v1907_v43  ;;  %v6417_v33 = vpop.eup %6416  ;;  %v1920_v18 = vadd.f32 1.0, %v6415_v63  ;;  %v5580_v63 = vpack.c.bf16 %v2427_v13, %v2423_v48 }
 0x6b4   :  { %6420 = vrcp.f32 %v1913_v28 }
 0x6b5   :  { %6422 = vrcp.f32 %v1920_v18  ;;  %v5582_v18 = vpack.c.bf16 %v2436_v6, %v2432_v55  ;;  %v2464_v55 = vld [vmem:[#allocation7 + $0x348] sm:$0xff] }
 0x6b6   :  { %v2468_v6 = vld [vmem:[#allocation7 + $0x368] sm:$0xff] }
 0x6bd   :  { %v6419_v4 = vpop.eup %6418 }
 0x6be   :  { %v6421_v29 = vpop.eup %6420  ;;  %v1924_v60 = vmul.f32 %v6419_v4, %v6417_v33  ;;  %v5612_v33 = vpack.c.bf16 %v2429_v27, %v2425_v26  ;;  %v2431_v4 = vld [vmem:[#allocation7 + $0x240] sm:$0xff]  ;;  %v2457_v26 = vld [vmem:[#allocation7 + $0x310] sm:$0xff] }
 0x6bf   :  { %v1923_v45 = vmul.f32 %v6421_v29, %v7438_v19  ;;  %v6423_v3 = vpop.eup %6422  ;;  %v2435_v29 = vld [vmem:[#allocation7 + $0x260] sm:$0xff]  ;;  %v2461_v27 = vld [vmem:[#allocation7 + $0x330] sm:$0xff] }
 0x6c1   :  { %v7513_v52 = vadd.f32 %v1924_v60, %v1923_v45  ;;  %v5614_v45 = vpack.c.bf16 %v2438_v15, %v2434_v47  ;;  %v2466_v47 = vld [vmem:[#allocation7 + $0x358] sm:$0xff] }
 0x6c2   :  { %v2470_v15 = vld [vmem:[#allocation7 + $0x378] sm:$0xff] }
 0x6c3   :  { %6424 = vtanh.f32 %v7513_v52 }
 0x6cd   :  { %v6425_v59 = vpop.eup %6424 }
 0x6ce   :  { %v7516_v61 = vmul.f32 %v6425_v59, %v6423_v3  ;;  %v2437_v3 = vld [vmem:[#allocation7 + $0x270] sm:$0xff]  ;;  %v2440_v59 = vld [vmem:[#allocation7 + $0x288] sm:$0xff] }
 0x6d0   :  { %2064 = vmatmul.mubr.f32.vlgmr.msra.gmra.mrb[12].mxu0 %v7516_v61  ;;  %2135 = vmatmul.mubr.f32.vlgmr.msra.gmra.mrb[28].mxu1 %v7516_v61 }
 0x6d1   :  { %5517 = vmatpush1.bf16.msra.mxu0 %v7463_v38  ;;  %5549 = vmatpush1.bf16.msra.mxu1 %v7343_v34  ;;  %v2234_v34 = vld [vmem:[#allocation9 + $0x1d0] sm:$0xff] }
 0x6d2   :  { %5519 = vmatprep.subr.bf16.mxu0 %v7466_v23  ;;  %5551 = vmatprep.subr.bf16.mxu1 %v7347_v58  ;;  %v2238_v58 = vld [vmem:[#allocation9 + $0x1f0] sm:$0xff] }
 0x6d3   :  { %2304 = vmatprep.mubr.f32.mxu0 %v8182_v0  ;;  %2375 = vmatprep.mubr.f32.mxu1 %v8182_v0 }
 0x6d5   :  { %5521 = vmatpush1.bf16.msra.mxu0 %v7468_v37  ;;  %5553 = vmatpush1.bf16.msra.mxu1 %v7349_v8  ;;  %v2424_v8 = vld [vmem:[#allocation7 + $0x208] sm:$0xff] }
 0x6d6   :  { %5523 = vmatprep.subr.bf16.mxu0 %v7472_v42  ;;  %5555 = vmatprep.subr.bf16.mxu1 %v7353_v14  ;;  %v5576_v14 = vpack.c.bf16 %v2238_v58, %v2234_v34  ;;  %v2444_v34 = vld [vmem:[#allocation7 + $0x2a8] sm:$0xff]  ;;  %v2442_v58 = vld [vmem:[#allocation7 + $0x298] sm:$0xff] }
 0x6d9   :  { %5525 = vmatpush1.bf16.msra.mxu0 %v7474_v10  ;;  %5557 = vmatpush1.bf16.msra.mxu1 %v7355_v44  ;;  %v2428_v44 = vld [vmem:[#allocation7 + $0x228] sm:$0xff] }
 0x6da   :  { %5527 = vmatprep.subr.bf16.mxu0 %v7478_v1  ;;  %5559 = vmatprep.subr.bf16.mxu1 %v7359_v56  ;;  %v2426_v56 = vld [vmem:[#allocation7 + $0x218] sm:$0xff] }
 0x6dd   :  { %5529 = vmatpush1.bf16.msra.mxu0 %v7480_v11  ;;  %5561 = vmatpush1.bf16.msra.mxu1 %v7361_v49  ;;  %v2430_v49 = vld [vmem:[#allocation7 + $0x238] sm:$0xff] }
 0x6de   :  { %5531 = vmatprep.subr.bf16.mxu0 %v7484_v36  ;;  %5563 = vmatprep.subr.bf16.mxu1 %v7365_v32  ;;  %v5578_v32 = vpack.c.bf16 %v2428_v44, %v2424_v8  ;;  %v2446_v8 = vld [vmem:[#allocation7 + $0x2b8] sm:$0xff] }
 0x6e1   :  { %5533 = vmatpush1.bf16.msra.mxu0 %v7486_v2  ;;  %5565 = vmatpush1.bf16.msra.mxu1 %v7367_v51  ;;  %v5610_v51 = vpack.c.bf16 %v2430_v49, %v2426_v56  ;;  %v2439_v56 = vld [vmem:[#allocation7 + $0x280] sm:$0xff] }
 0x6e2   :  { %5535 = vmatprep.subr.bf16.mxu0 %v7490_v53  ;;  %5567 = vmatprep.subr.bf16.mxu1 %v7371_v20  ;;  %v2443_v49 = vld [vmem:[#allocation7 + $0x2a0] sm:$0xff] }
 0x6e5   :  { %5537 = vmatpush1.bf16.msra.mxu0 %v7492_v40  ;;  %5569 = vmatpush1.bf16.msra.mxu1 %v7373_v9 }
 0x6e6   :  { %5539 = vmatprep.subr.bf16.mxu0 %v7494_v31  ;;  %5571 = vmatprep.subr.bf16.mxu1 %v7375_v16 }
 0x6e9   :  { %5541 = vmatpush1.bf16.msra.mxu0 %v7498_v50  ;;  %5573 = vmatpush1.bf16.msra.mxu1 %v7379_v21 }
 0x6ea   :  { %5543 = vmatprep.subr.bf16.mxu0 %v7501_v25  ;;  %5575 = vmatprep.subr.bf16.mxu1 %v7382_v46 }
 0x6ed   :  { %5545 = vmatpush1.bf16.msra.mxu0 %v7504_v24  ;;  %5577 = vmatpush1.bf16.msra.mxu1 %v5576_v14  ;;  %v5584_v14 = vpack.c.bf16 %v2435_v29, %v2431_v4  ;;  %v5598_v4 = vpack.c.bf16 %v2468_v6, %v2464_v55  ;;  %v5630_v29 = vpack.c.bf16 %v2470_v15, %v2466_v47  ;;  %v2787_v47 = vld [vmem:[#allocation9 + $0x250] sm:$0xff] }
 0x6ee   :  { %5579 = vmatprep.subr.bf16.mxu0 %v5578_v32  ;;  %5611 = vmatprep.subr.bf16.mxu1 %v5610_v51  ;;  %v5586_v32 = vpack.c.bf16 %v2444_v34, %v2440_v59  ;;  %v5618_v51 = vpack.c.bf16 %v2446_v8, %v2442_v58  ;;  %v2474_v59 = vld [vmem:[#allocation7 + $0x398] sm:$0xff]  ;;  %v2791_v15 = vld [vmem:[#allocation9 + $0x270] sm:$0xff] }
 0x6ef   :  { %v2478_v34 = vld [vmem:[#allocation7 + $0x3b8] sm:$0xff] }
 0x7a3   :  { %v2065_v20 = vpop.f32.mrb[12].mxu0  ;;  %v2136_v9 = vpop.f32.mrb[28].mxu1 }
 0x7a4   :  { %v2141_v16 = vadd.f32 %v2065_v20, %v7167_v7  ;;  %v2067_v21 = vpop.f32.mrb[13].mxu0  ;;  %v2138_v46 = vpop.f32.mrb[29].mxu1  ;;  %v6230_v10 = vadd.f32 %v2136_v9, %v7179_v57  ;;  %v2441_v20 = vld [vmem:[#allocation7 + $0x290] sm:$0xff] }
 0x7a5   :  { %v2142_v19 = vadd.f32 %v2067_v21, %v7169_v22  ;;  %v6231_v37 = vadd.f32 %v2138_v46, %v7183_v30  ;;  %v2445_v9 = vld [vmem:[#allocation7 + $0x2b0] sm:$0xff]  ;;  %v2452_v21 = vld [vmem:[#allocation7 + $0x2e8] sm:$0xff]  ;;  %v2450_v46 = vld [vmem:[#allocation7 + $0x2d8] sm:$0xff] }
 0x7a6   :  { %v4902_v38 = vmul.f32 -1.442695, %v2141_v16  ;;  %v2448_v16 = vld [vmem:[#allocation7 + $0x2c8] sm:$0xff] }
 0x7a7   :  { %v4903_v23 = vmul.f32 -1.442695, %v2142_v19  ;;  %v4904_v42 = vmul.f32 -1.442695, %v6231_v37  ;;  %v2454_v19 = vld [vmem:[#allocation7 + $0x2f8] sm:$0xff]  ;;  %v2447_v37 = vld [vmem:[#allocation7 + $0x2c0] sm:$0xff] }
 0x7a8   :  { %6426 = vpow2.f32 %v4902_v38  ;;  %v5588_v38 = vpack.c.bf16 %v2443_v49, %v2439_v56  ;;  %v5634_v49 = vpack.c.bf16 %v2478_v34, %v2474_v59  ;;  %v2795_v59 = vld [vmem:[#allocation9 + $0x290] sm:$0xff] }
 0x7a9   :  { %6428 = vpow2.f32 %v4903_v23  ;;  %v5620_v23 = vpack.c.bf16 %v2445_v9, %v2441_v20  ;;  %v2480_v20 = vld [vmem:[#allocation7 + $0x3c8] sm:$0xff]  ;;  %v2799_v34 = vld [vmem:[#allocation9 + $0x2b0] sm:$0xff] }
 0x7aa   :  { %6430 = vpow2.f32 %v4904_v42  ;;  %v2451_v42 = vld [vmem:[#allocation7 + $0x2e0] sm:$0xff]  ;;  %v2484_v9 = vld [vmem:[#allocation7 + $0x3e8] sm:$0xff] }
 0x7ab   :  { %6432 = vtanh.f32 %v6230_v10  ;;  %v5590_v10 = vpack.c.bf16 %v2452_v21, %v2448_v16  ;;  %v2482_v16 = vld [vmem:[#allocation7 + $0x3d8] sm:$0xff] }
 0x7ac   :  { %v2486_v21 = vld [vmem:[#allocation7 + $0x3f8] sm:$0xff] }
 0x7b2   :  { %v6427_v1 = vpop.eup %6426 }
 0x7b3   :  { %v6429_v11 = vpop.eup %6428  ;;  %v2148_v36 = vadd.f32 1.0, %v6427_v1  ;;  %v5622_v1 = vpack.c.bf16 %v2454_v19, %v2450_v46 }
 0x7b4   :  { %v2154_v2 = vadd.f32 1.0, %v6429_v11  ;;  %v6431_v7 = vpop.eup %6430  ;;  %v2449_v11 = vld [vmem:[#allocation7 + $0x2d0] sm:$0xff] }
 0x7b5   :  { %6434 = vrcp.f32 %v2148_v36  ;;  %v6433_v53 = vpop.eup %6432  ;;  %v2161_v50 = vadd.f32 1.0, %v6431_v7  ;;  %v2453_v36 = vld [vmem:[#allocation7 + $0x2f0] sm:$0xff]  ;;  %v2460_v7 = vld [vmem:[#allocation7 + $0x328] sm:$0xff] }
 0x7b6   :  { %6436 = vrcp.f32 %v2154_v2  ;;  %v2456_v2 = vld [vmem:[#allocation7 + $0x308] sm:$0xff] }
 0x7b7   :  { %6438 = vrcp.f32 %v2161_v50  ;;  %v2455_v50 = vld [vmem:[#allocation7 + $0x300] sm:$0xff]  ;;  %v5594_v48 = vpack.c.bf16 %v2460_v7, %v2456_v2 }
 0x7b8   :  { %v2777_v2 = vld [vmem:[#allocation9 + $0x200] sm:$0xff] }
 0x7bf   :  { %v6435_v22 = vpop.eup %6434 }
 0x7c0   :  { %v6437_v40 = vpop.eup %6436  ;;  %v2165_v31 = vmul.f32 %v6435_v22, %v6433_v53  ;;  %v2458_v53 = vld [vmem:[#allocation7 + $0x318] sm:$0xff] }
 0x7c1   :  { %v2164_v25 = vmul.f32 %v6437_v40, %v7513_v52  ;;  %v6439_v43 = vpop.eup %6438  ;;  %v2433_v52 = vld [vmem:[#allocation7 + $0x250] sm:$0xff]  ;;  %v2462_v22 = vld [vmem:[#allocation7 + $0x338] sm:$0xff]  ;;  %v5592_v40 = vpack.c.bf16 %v2451_v42, %v2447_v37  ;;  %v5638_v37 = vpack.c.bf16 %v2486_v21, %v2482_v16  ;;  %v2483_v42 = vld [vmem:[#allocation7 + $0x3e0] sm:$0xff] }
 0x7c2   :  { %v5616_v44 = vpack.c.bf16 %v2437_v3, %v2433_v52  ;;  %v5626_v13 = vpack.c.bf16 %v2462_v22, %v2458_v53  ;;  %v2472_v52 = vld [vmem:[#allocation7 + $0x388] sm:$0xff]  ;;  %v2779_v22 = vld [vmem:[#allocation9 + $0x210] sm:$0xff] }
 0x7c3   :  { %v7556_v24 = vadd.f32 %v2165_v31, %v2164_v25  ;;  %v5624_v31 = vpack.c.bf16 %v2453_v36, %v2449_v11  ;;  %v2459_v25 = vld [vmem:[#allocation7 + $0x320] sm:$0xff]  ;;  %v2476_v3 = vld [vmem:[#allocation7 + $0x3a8] sm:$0xff]  ;;  %v2803_v16 = vld [vmem:[#allocation9 + $0x2d0] sm:$0xff] }
 0x7c4   :  { %v5602_v56 = vpack.c.bf16 %v2476_v3, %v2472_v52  ;;  %v2807_v21 = vld [vmem:[#allocation9 + $0x2f0] sm:$0xff] }
 0x7c5   :  { %6440 = vtanh.f32 %v7556_v24 }
 0x7cf   :  { %v6441_v28 = vpop.eup %6440 }
 0x7d0   :  { %v7559_v60 = vmul.f32 %v6441_v28, %v6439_v43  ;;  %v5596_v43 = vpack.c.bf16 %v2459_v25, %v2455_v50  ;;  %v5628_v28 = vpack.c.bf16 %v2461_v27, %v2457_v26  ;;  %v2790_v50 = vld [vmem:[#allocation9 + $0x268] sm:$0xff]  ;;  %v2788_v25 = vld [vmem:[#allocation9 + $0x258] sm:$0xff]  ;;  %v2785_v26 = vld [vmem:[#allocation9 + $0x240] sm:$0xff] }
 0x7d1   :  { %v2789_v27 = vld [vmem:[#allocation9 + $0x260] sm:$0xff] }
 0x7d2   :  { %2305 = vmatmul.mubr.f32.vlgmr.msra.gmra.mrb[14].mxu0 %v7559_v60  ;;  %2376 = vmatmul.mubr.f32.vlgmr.msra.gmra.mrb[30].mxu1 %v7559_v60  ;;  %v7609_v6 = vpack.c.bf16 %v2789_v27, %v2785_v26  ;;  %v2823_v26 = vld [vmem:[#allocation9 + $0x370] sm:$0xff] }
 0x7d3   :  { %5581 = vmatpush1.bf16.msra.mxu0 %v5580_v63  ;;  %5613 = vmatpush1.bf16.msra.mxu1 %v5612_v33  ;;  %v2463_v63 = vld [vmem:[#allocation7 + $0x340] sm:$0xff] }
 0x7d4   :  { %5583 = vmatprep.subr.bf16.mxu0 %v5582_v18  ;;  %5615 = vmatprep.subr.bf16.mxu1 %v5614_v45  ;;  %v2467_v33 = vld [vmem:[#allocation7 + $0x360] sm:$0xff]  ;;  %v2465_v18 = vld [vmem:[#allocation7 + $0x350] sm:$0xff] }
 0x7d5   :  { %2574 = vmatprep.mubr.f32.mxu0 %v8182_v0  ;;  %2687 = vmatprep.mubr.f32.mxu1 %v8182_v0  ;;  %v2469_v45 = vld [vmem:[#allocation7 + $0x370] sm:$0xff]  ;;  %v5600_v58 = vpack.c.bf16 %v2467_v33, %v2463_v63  ;;  %v2798_v63 = vld [vmem:[#allocation9 + $0x2a8] sm:$0xff]  ;;  %v2796_v33 = vld [vmem:[#allocation9 + $0x298] sm:$0xff] }
 0x7d6   :  { %v5632_v8 = vpack.c.bf16 %v2469_v45, %v2465_v18  ;;  %v2793_v18 = vld [vmem:[#allocation9 + $0x280] sm:$0xff] }
 0x7d7   :  { %5585 = vmatpush1.bf16.msra.mxu0 %v5584_v14  ;;  %5617 = vmatpush1.bf16.msra.mxu1 %v5616_v44  ;;  %v2471_v14 = vld [vmem:[#allocation7 + $0x380] sm:$0xff] }
 0x7d8   :  { %5587 = vmatprep.subr.bf16.mxu0 %v5586_v32  ;;  %5619 = vmatprep.subr.bf16.mxu1 %v5618_v51  ;;  %v2475_v44 = vld [vmem:[#allocation7 + $0x3a0] sm:$0xff]  ;;  %v2473_v32 = vld [vmem:[#allocation7 + $0x390] sm:$0xff] }
 0x7d9   :  { %v2477_v51 = vld [vmem:[#allocation7 + $0x3b0] sm:$0xff]  ;;  %v5604_v46 = vpack.c.bf16 %v2475_v44, %v2471_v14  ;;  %v2797_v45 = vld [vmem:[#allocation9 + $0x2a0] sm:$0xff]  ;;  %v2806_v14 = vld [vmem:[#allocation9 + $0x2e8] sm:$0xff] }
 0x7da   :  { %v5636_v19 = vpack.c.bf16 %v2477_v51, %v2473_v32  ;;  %v7621_v3 = vpack.c.bf16 %v2797_v45, %v2793_v18  ;;  %v2804_v44 = vld [vmem:[#allocation9 + $0x2d8] sm:$0xff]  ;;  %v2801_v32 = vld [vmem:[#allocation9 + $0x2c0] sm:$0xff] }
 0x7db   :  { %5589 = vmatpush1.bf16.msra.mxu0 %v5588_v38  ;;  %5621 = vmatpush1.bf16.msra.mxu1 %v5620_v23  ;;  %v2479_v38 = vld [vmem:[#allocation7 + $0x3c0] sm:$0xff]  ;;  %v5606_v23 = vpack.c.bf16 %v2484_v9, %v2480_v20 }
 0x7dc   :  { %5591 = vmatprep.subr.bf16.mxu0 %v5590_v10  ;;  %5623 = vmatprep.subr.bf16.mxu1 %v5622_v1  ;;  %v2481_v10 = vld [vmem:[#allocation7 + $0x3d0] sm:$0xff]  ;;  %v5608_v11 = vpack.c.bf16 %v2483_v42, %v2479_v38  ;;  %v2805_v51 = vld [vmem:[#allocation9 + $0x2e0] sm:$0xff]  ;;  %v2814_v38 = vld [vmem:[#allocation9 + $0x328] sm:$0xff] }
 0x7dd   :  { %v2485_v1 = vld [vmem:[#allocation7 + $0x3f0] sm:$0xff]  ;;  %v7633_v9 = vpack.c.bf16 %v2805_v51, %v2801_v32  ;;  %v2825_v18 = vld [vmem:[#allocation9 + $0x380] sm:$0xff]  ;;  %v2838_v32 = vld [vmem:[#allocation9 + $0x3e8] sm:$0xff] }
 0x7de   :  { %v5640_v36 = vpack.c.bf16 %v2485_v1, %v2481_v10  ;;  %v2809_v1 = vld [vmem:[#allocation9 + $0x300] sm:$0xff]  ;;  %v2836_v51 = vld [vmem:[#allocation9 + $0x3d8] sm:$0xff] }
 0x7df   :  { %5593 = vmatpush1.bf16.msra.mxu0 %v5592_v40  ;;  %5625 = vmatpush1.bf16.msra.mxu1 %v5624_v31  ;;  %v2783_v40 = vld [vmem:[#allocation9 + $0x230] sm:$0xff]  ;;  %v2786_v31 = vld [vmem:[#allocation9 + $0x248] sm:$0xff]  ;;  %v2829_v45 = vld [vmem:[#allocation9 + $0x3a0] sm:$0xff] }
 0x7e0   :  { %5595 = vmatprep.subr.bf16.mxu0 %v5594_v48  ;;  %5627 = vmatprep.subr.bf16.mxu1 %v5626_v13  ;;  %v7605_v48 = vpack.c.bf16 %v2790_v50, %v2786_v31  ;;  %v2792_v13 = vld [vmem:[#allocation9 + $0x278] sm:$0xff]  ;;  %v2817_v31 = vld [vmem:[#allocation9 + $0x340] sm:$0xff] }
 0x7e1   :  { %v7607_v55 = vpack.c.bf16 %v2792_v13, %v2788_v25  ;;  %v2821_v25 = vld [vmem:[#allocation9 + $0x360] sm:$0xff]  ;;  %v2819_v13 = vld [vmem:[#allocation9 + $0x350] sm:$0xff] }
 0x7e2   :  { %v7656_v27 = vpack.c.bf16 %v2821_v25, %v2817_v31 }
 0x7e3   :  { %5597 = vmatpush1.bf16.msra.mxu0 %v5596_v43  ;;  %5629 = vmatpush1.bf16.msra.mxu1 %v5628_v28  ;;  %v7612_v43 = vpack.c.bf16 %v2791_v15, %v2787_v47  ;;  %v2794_v28 = vld [vmem:[#allocation9 + $0x288] sm:$0xff] }
 0x7e4   :  { %5599 = vmatprep.subr.bf16.mxu0 %v5598_v4  ;;  %5631 = vmatprep.subr.bf16.mxu1 %v5630_v29  ;;  %v7617_v4 = vpack.c.bf16 %v2798_v63, %v2794_v28  ;;  %v2800_v29 = vld [vmem:[#allocation9 + $0x2b8] sm:$0xff]  ;;  %v2826_v47 = vld [vmem:[#allocation9 + $0x388] sm:$0xff]  ;;  %v7660_v63 = vpack.c.bf16 %v2823_v26, %v2819_v13 }
 0x7e5   :  { %v7619_v52 = vpack.c.bf16 %v2800_v29, %v2796_v33  ;;  %v2830_v15 = vld [vmem:[#allocation9 + $0x3a8] sm:$0xff]  ;;  %v2828_v28 = vld [vmem:[#allocation9 + $0x398] sm:$0xff] }
 0x7e6   :  { %v7662_v33 = vpack.c.bf16 %v2830_v15, %v2826_v47  ;;  %v2832_v29 = vld [vmem:[#allocation9 + $0x3b8] sm:$0xff] }
 0x7e7   :  { %5601 = vmatpush1.bf16.msra.mxu0 %v5600_v58  ;;  %5633 = vmatpush1.bf16.msra.mxu1 %v5632_v8  ;;  %v7624_v58 = vpack.c.bf16 %v2799_v34, %v2795_v59  ;;  %v2802_v8 = vld [vmem:[#allocation9 + $0x2c8] sm:$0xff]  ;;  %v7665_v59 = vpack.c.bf16 %v2832_v29, %v2828_v28  ;;  %v2827_v34 = vld [vmem:[#allocation9 + $0x390] sm:$0xff] }
 0x7e8   :  { %5603 = vmatprep.subr.bf16.mxu0 %v5602_v56  ;;  %5635 = vmatprep.subr.bf16.mxu1 %v5634_v49  ;;  %v7629_v56 = vpack.c.bf16 %v2806_v14, %v2802_v8  ;;  %v2808_v49 = vld [vmem:[#allocation9 + $0x2f8] sm:$0xff]  ;;  %v2831_v8 = vld [vmem:[#allocation9 + $0x3b0] sm:$0xff]  ;;  %v7668_v14 = vpack.c.bf16 %v2829_v45, %v2825_v18 }
 0x7e9   :  { %v7631_v20 = vpack.c.bf16 %v2808_v49, %v2804_v44  ;;  %v7672_v44 = vpack.c.bf16 %v2831_v8, %v2827_v34  ;;  %v2834_v49 = vld [vmem:[#allocation9 + $0x3c8] sm:$0xff] }
 0x7eb   :  { %5605 = vmatpush1.bf16.msra.mxu0 %v5604_v46  ;;  %5637 = vmatpush1.bf16.msra.mxu1 %v5636_v19  ;;  %v2810_v46 = vld [vmem:[#allocation9 + $0x308] sm:$0xff]  ;;  %v7636_v19 = vpack.c.bf16 %v2807_v21, %v2803_v16  ;;  %v7677_v16 = vpack.c.bf16 %v2838_v32, %v2834_v49  ;;  %v2840_v21 = vld [vmem:[#allocation9 + $0x3f8] sm:$0xff] }
 0x7ec   :  { %5607 = vmatprep.subr.bf16.mxu0 %v5606_v23  ;;  %5639 = vmatprep.subr.bf16.mxu1 %v5638_v37  ;;  %v2812_v23 = vld [vmem:[#allocation9 + $0x318] sm:$0xff]  ;;  %v7640_v42 = vpack.c.bf16 %v2814_v38, %v2810_v46  ;;  %v2833_v46 = vld [vmem:[#allocation9 + $0x3c0] sm:$0xff] }
 0x7ed   :  { %v2816_v37 = vld [vmem:[#allocation9 + $0x338] sm:$0xff]  ;;  %v2837_v38 = vld [vmem:[#allocation9 + $0x3e0] sm:$0xff] }
 0x7ee   :  { %v7642_v10 = vpack.c.bf16 %v2816_v37, %v2812_v23  ;;  %v7679_v23 = vpack.c.bf16 %v2840_v21, %v2836_v51  ;;  %v7681_v37 = vpack.c.bf16 %v2837_v38, %v2833_v46  ;;  %v2769_v38 = vld [vmem:[#allocation12 + $0x8] sm:$0xff] }
 0x7ef   :  { %5609 = vmatpush1.bf16.msra.mxu0 %v5608_v11  ;;  %5641 = vmatpush1.bf16.msra.mxu1 %v5640_v36  ;;  %v2813_v11 = vld [vmem:[#allocation9 + $0x320] sm:$0xff]  ;;  %v2811_v36 = vld [vmem:[#allocation9 + $0x310] sm:$0xff] }
 0x7f2   :  { %2575 = vmatmul.mubr.f32.vlgmr.msra.gmra.mrb[16].mxu0 %v7193_v5  ;;  %2688 = vmatmul.mubr.f32.vlgmr.msra.gmra.mrb[32].mxu1 %v7193_v5  ;;  %v2778_v5 = vld [vmem:[#allocation9 + $0x208] sm:$0xff] }
 0x7f3   :  { %2580 = vmatprep.mubr.f32.mxu0 %v8182_v0  ;;  %2693 = vmatprep.mubr.f32.mxu1 %v8182_v0 }
 0x7f6   :  { %2581 = vmatmul.mubr.f32.gmra.mrb[18].mxu0 %v7272_v62  ;;  %2694 = vmatmul.mubr.f32.gmra.mrb[34].mxu1 %v7272_v62  ;;  %v2782_v62 = vld [vmem:[#allocation9 + $0x228] sm:$0xff] }
 0x7f7   :  { %2586 = vmatprep.mubr.f32.mxu0 %v8182_v0  ;;  %2699 = vmatprep.mubr.f32.mxu1 %v8182_v0 }
 0x7fa   :  { %2587 = vmatmul.mubr.f32.gmra.mrb[20].mxu0 %v7319_v54  ;;  %2700 = vmatmul.mubr.f32.gmra.mrb[36].mxu1 %v7319_v54  ;;  %v2780_v54 = vld [vmem:[#allocation9 + $0x218] sm:$0xff] }
 0x7fb   :  { %2592 = vmatprep.mubr.f32.mxu0 %v8182_v0  ;;  %2705 = vmatprep.mubr.f32.mxu1 %v8182_v0 }
 0x7fe   :  { %2593 = vmatmul.mubr.f32.gmra.mrb[22].mxu0 %v7396_v41  ;;  %2706 = vmatmul.mubr.f32.gmra.mrb[38].mxu1 %v7396_v41  ;;  %v7593_v41 = vpack.c.bf16 %v2782_v62, %v2778_v5  ;;  %v7645_v5 = vpack.c.bf16 %v2813_v11, %v2809_v1  ;;  %v2815_v62 = vld [vmem:[#allocation9 + $0x330] sm:$0xff] }
 0x7ff   :  { %2598 = vmatprep.mubr.f32.mxu0 %v8182_v0  ;;  %2711 = vmatprep.mubr.f32.mxu1 %v8182_v0  ;;  %v2835_v1 = vld [vmem:[#allocation9 + $0x3d0] sm:$0xff] }
 0x800   :  { %5643 = vmatprep.subr.bf16.mxu0 %v7593_v41  ;;  %v2839_v11 = vld [vmem:[#allocation9 + $0x3f0] sm:$0xff] }
 0x802   :  { %2599 = vmatmul.mubr.f32.gmra.mrb[24].mxu0 %v7441_v35  ;;  %2712 = vmatmul.mubr.f32.gmra.mrb[40].mxu1 %v7441_v35  ;;  %v2784_v35 = vld [vmem:[#allocation9 + $0x238] sm:$0xff] }
 0x803   :  { %2604 = vmatprep.mubr.f32.mxu0 %v8182_v0  ;;  %2717 = vmatprep.mubr.f32.mxu1 %v8182_v0  ;;  %v7595_v7 = vpack.c.bf16 %v2784_v35, %v2780_v54  ;;  %v2818_v54 = vld [vmem:[#allocation9 + $0x348] sm:$0xff] }
 0x804   :  { %v2822_v35 = vld [vmem:[#allocation9 + $0x368] sm:$0xff] }
 0x805   :  { %5675 = vmatprep.subr.bf16.mxu1 %v7595_v7 }
 0x806   :  { %2605 = vmatmul.mubr.f32.gmra.mrb[26].mxu0 %v7516_v61  ;;  %2718 = vmatmul.mubr.f32.gmra.mrb[42].mxu1 %v7516_v61  ;;  %v2781_v61 = vld [vmem:[#allocation9 + $0x220] sm:$0xff] }
 0x807   :  { %2610 = vmatprep.mubr.f32.mxu0 %v8182_v0  ;;  %2723 = vmatprep.mubr.f32.mxu1 %v8182_v0  ;;  %v7597_v53 = vpack.c.bf16 %v2781_v61, %v2777_v2  ;;  %v7649_v2 = vpack.c.bf16 %v2815_v62, %v2811_v36  ;;  %v7651_v61 = vpack.c.bf16 %v2822_v35, %v2818_v54 }
 0x808   :  { %v7684_v36 = vpack.c.bf16 %v2839_v11, %v2835_v1  ;;  %v8183_v1 = vsub.s32 0, %v7139_v39 }
 0x809   :  { %5645 = vmatpush1.bf16.msra.mxu0 %v7597_v53 }
 0x80a   :  { %2611 = vmatmul.mubr.f32.gmra.mrb[28].mxu0 %v7559_v60  ;;  %2724 = vmatmul.mubr.f32.gmra.mrb[44].mxu1 %v7559_v60  ;;  %v7600_v60 = vpack.c.bf16 %v2783_v40, %v2779_v22  ;;  %v2820_v22 = vld [vmem:[#allocation9 + $0x358] sm:$0xff] }
 0x80b   :  { %2616 = vmatprep.mubr.f32.mxu0 %v8182_v0  ;;  %2729 = vmatprep.mubr.f32.mxu1 %v8182_v0  ;;  %v2824_v40 = vld [vmem:[#allocation9 + $0x378] sm:$0xff] }
 0x80c   :  { %5677 = vmatpush1.bf16.msra.mxu1 %v7600_v60  ;;  %5647 = vmatprep.subr.bf16.mxu0 %v7605_v48  ;;  %v7653_v50 = vpack.c.bf16 %v2824_v40, %v2820_v22 }
 0x80d   :  { %5679 = vmatprep.subr.bf16.mxu1 %v7607_v55  ;;  %5649 = vmatpush1.bf16.msra.mxu0 %v7609_v6 }
 0x80e   :  { %5651 = vmatprep.subr.bf16.mxu0 %v7617_v4 }
 0x810   :  { %5681 = vmatpush1.bf16.msra.mxu1 %v7612_v43 }
 0x811   :  { %5683 = vmatprep.subr.bf16.mxu1 %v7619_v52  ;;  %5653 = vmatpush1.bf16.msra.mxu0 %v7621_v3 }
 0x812   :  { %5655 = vmatprep.subr.bf16.mxu0 %v7629_v56 }
 0x814   :  { %5685 = vmatpush1.bf16.msra.mxu1 %v7624_v58 }
 0x815   :  { %5687 = vmatprep.subr.bf16.mxu1 %v7631_v20  ;;  %5657 = vmatpush1.bf16.msra.mxu0 %v7633_v9 }
 0x816   :  { %5659 = vmatprep.subr.bf16.mxu0 %v7640_v42 }
 0x818   :  { %5689 = vmatpush1.bf16.msra.mxu1 %v7636_v19 }
 0x819   :  { %5691 = vmatprep.subr.bf16.mxu1 %v7642_v10  ;;  %5661 = vmatpush1.bf16.msra.mxu0 %v7645_v5 }
 0x81a   :  { %5663 = vmatprep.subr.bf16.mxu0 %v7651_v61 }
 0x81c   :  { %5693 = vmatpush1.bf16.msra.mxu1 %v7649_v2 }
 0x81d   :  { %5695 = vmatprep.subr.bf16.mxu1 %v7653_v50  ;;  %5665 = vmatpush1.bf16.msra.mxu0 %v7656_v27 }
 0x81e   :  { %5667 = vmatprep.subr.bf16.mxu0 %v7662_v33 }
 0x820   :  { %5697 = vmatpush1.bf16.msra.mxu1 %v7660_v63 }
 0x821   :  { %5699 = vmatprep.subr.bf16.mxu1 %v7665_v59  ;;  %5669 = vmatpush1.bf16.msra.mxu0 %v7668_v14 }
 0x822   :  { %5671 = vmatprep.subr.bf16.mxu0 %v7677_v16 }
 0x824   :  { %5701 = vmatpush1.bf16.msra.mxu1 %v7672_v44 }
 0x825   :  { %5703 = vmatprep.subr.bf16.mxu1 %v7679_v23  ;;  %5673 = vmatpush1.bf16.msra.mxu0 %v7681_v37 }
 0x826   :  { %5707 = vmatprep.subr.bf16.mxu0 %v7593_v41 }
 0x828   :  { %5705 = vmatpush1.bf16.msra.mxu1 %v7684_v36 }
 0x829   :  { %5739 = vmatprep.subr.bf16.mxu1 %v7595_v7 }
 0x8a5   :  { %v2306_v62 = vpop.f32.mrb[14].mxu0  ;;  %v2377_v54 = vpop.f32.mrb[30].mxu1 }
 0x8a6   :  { %v2382_v35 = vadd.f32 %v2306_v62, %v7171_v12  ;;  %v2308_v22 = vpop.f32.mrb[15].mxu0  ;;  %v2379_v40 = vpop.f32.mrb[31].mxu1  ;;  %v6232_v15 = vadd.f32 %v2377_v54, %v7179_v57  ;;  %v8184_v62 = vsub.s32 1, %v7139_v39 }
 0x8a7   :  { %v2383_v31 = vadd.f32 %v2308_v22, %v7173_v17  ;;  %v6233_v26 = vadd.f32 %v2379_v40, %v7183_v30 }
 0x8a8   :  { %v4905_v25 = vmul.f32 -1.442695, %v2382_v35 }
 0x8a9   :  { %v4906_v13 = vmul.f32 -1.442695, %v2383_v31  ;;  %v4907_v47 = vmul.f32 -1.442695, %v6233_v26 }
 0x8aa   :  { %6442 = vpow2.f32 %v4905_v25 }
 0x8ab   :  { %6444 = vpow2.f32 %v4906_v13 }
 0x8ac   :  { %6446 = vpow2.f32 %v4907_v47 }
 0x8ad   :  { %6448 = vtanh.f32 %v6232_v15  ;;  %v8185_v15 = vsub.s32 3, %v7139_v39 }
 0x8b4   :  { %v6443_v28 = vpop.eup %6442 }
 0x8b5   :  { %v6445_v29 = vpop.eup %6444  ;;  %v2389_v18 = vadd.f32 1.0, %v6443_v28 }
 0x8b6   :  { %v2395_v45 = vadd.f32 1.0, %v6445_v29  ;;  %v6447_v12 = vpop.eup %6446 }
 0x8b7   :  { %6450 = vrcp.f32 %v2389_v18  ;;  %v6449_v34 = vpop.eup %6448  ;;  %v2402_v32 = vadd.f32 1.0, %v6447_v12  ;;  %v8186_v18 = vsub.s32 2, %v7139_v39 }
 0x8b8   :  { %6452 = vrcp.f32 %v2395_v45 }
 0x8b9   :  { %6454 = vrcp.f32 %v2402_v32 }
 0x8c1   :  { %v6451_v17 = vpop.eup %6450 }
 0x8c2   :  { %v6453_v8 = vpop.eup %6452  ;;  %v2406_v49 = vmul.f32 %v6451_v17, %v6449_v34 }
 0x8c3   :  { %v2405_v51 = vmul.f32 %v6453_v8, %v7556_v24  ;;  %v6455_v57 = vpop.eup %6454  ;;  %v2488_v24 = vld [vmem:[#allocation10 + $0x4] sm:$0xf] }
 0x8c4   :  { %v7734_v11 = vrot.slane %v2488_v24, %v8183_v1  ;;  %v7738_v54 = vrot.slane %v2488_v24, %v8184_v62  ;;  %v7744_v28 = vrot.slane %v2488_v24, %v8185_v15  ;;  %v7749_v45 = vrot.slane %v2488_v24, %v8186_v18 }
 0x8c5   :  { %v2407_v30 = vadd.f32 %v2406_v49, %v2405_v51 }
 0x8c7   :  { %6456 = vtanh.f32 %v2407_v30  ;;  %2413 = vst [vmem:[#allocation18] sm:$0xff] %v2407_v30 }
 0x8d1   :  { %v6457_v21 = vpop.eup %6456 }
 0x8d2   :  { %v2409_v46 = vmul.f32 %v6457_v21, %v6455_v57  ;;  %v4908_v57 = vld [vmem:[%s8170_s5 + $0x8] sm:$0xff] }
 0x8d4   :  { %2617 = vmatmul.mubr.f32.gmra.mrb[30].mxu0 %v2409_v46  ;;  %2412 = vst [vmem:[#allocation16] sm:$0xff] %v2409_v46  ;;  %2730 = vmatmul.mubr.f32.gmra.mrb[46].mxu1 %v2409_v46 }
 0x8d5   :  { %2905 = vmatprep.mubr.f32.mxu0 %v8182_v0  ;;  %2976 = vmatprep.mubr.f32.mxu1 %v8182_v0 }
 0x8d8   :  { %2906 = vmatmul.mubr.f32.vlgmr.msra.gmra.mrb[16].mxu0 %v2769_v38  ;;  %2977 = vmatmul.mubr.f32.vlgmr.msra.gmra.mrb[32].mxu1 %v2769_v38 }
 0x8d9   :  { %5709 = vmatpush1.bf16.msra.mxu0 %v7597_v53  ;;  %5741 = vmatpush1.bf16.msra.mxu1 %v7600_v60 }
 0x8da   :  { %5711 = vmatprep.subr.bf16.mxu0 %v7605_v48  ;;  %5743 = vmatprep.subr.bf16.mxu1 %v7607_v55 }
 0x8db   :  { %3144 = vmatprep.mubr.f32.mxu0 %v8182_v0  ;;  %3215 = vmatprep.mubr.f32.mxu1 %v8182_v0 }
 0x8dd   :  { %5713 = vmatpush1.bf16.msra.mxu0 %v7609_v6  ;;  %5745 = vmatpush1.bf16.msra.mxu1 %v7612_v43 }
 0x8de   :  { %5715 = vmatprep.subr.bf16.mxu0 %v7617_v4  ;;  %5747 = vmatprep.subr.bf16.mxu1 %v7619_v52 }
 0x8e1   :  { %5717 = vmatpush1.bf16.msra.mxu0 %v7621_v3  ;;  %5749 = vmatpush1.bf16.msra.mxu1 %v7624_v58 }
 0x8e2   :  { %5719 = vmatprep.subr.bf16.mxu0 %v7629_v56  ;;  %5751 = vmatprep.subr.bf16.mxu1 %v7631_v20 }
 0x8e5   :  { %5721 = vmatpush1.bf16.msra.mxu0 %v7633_v9  ;;  %5753 = vmatpush1.bf16.msra.mxu1 %v7636_v19 }
 0x8e6   :  { %5723 = vmatprep.subr.bf16.mxu0 %v7640_v42  ;;  %5755 = vmatprep.subr.bf16.mxu1 %v7642_v10 }
 0x8e9   :  { %5725 = vmatpush1.bf16.msra.mxu0 %v7645_v5  ;;  %5757 = vmatpush1.bf16.msra.mxu1 %v7649_v2 }
 0x8ea   :  { %5727 = vmatprep.subr.bf16.mxu0 %v7651_v61  ;;  %5759 = vmatprep.subr.bf16.mxu1 %v7653_v50 }
 0x8ed   :  { %5729 = vmatpush1.bf16.msra.mxu0 %v7656_v27  ;;  %5761 = vmatpush1.bf16.msra.mxu1 %v7660_v63 }
 0x8ee   :  { %5731 = vmatprep.subr.bf16.mxu0 %v7662_v33  ;;  %5763 = vmatprep.subr.bf16.mxu1 %v7665_v59 }
 0x8f1   :  { %5733 = vmatpush1.bf16.msra.mxu0 %v7668_v14  ;;  %5765 = vmatpush1.bf16.msra.mxu1 %v7672_v44 }
 0x8f2   :  { %5735 = vmatprep.subr.bf16.mxu0 %v7677_v16  ;;  %5767 = vmatprep.subr.bf16.mxu1 %v7679_v23 }
 0x8f5   :  { %5737 = vmatpush1.bf16.msra.mxu0 %v7681_v37  ;;  %5769 = vmatpush1.bf16.msra.mxu1 %v7684_v36 }
 0x8f6   :  { %5771 = vmatprep.subr.bf16.mxu0 %v7593_v41  ;;  %5803 = vmatprep.subr.bf16.mxu1 %v7595_v7 }
 0x9ab   :  { %v2907_v35 = vpop.f32.mrb[16].mxu0  ;;  %v2978_v22 = vpop.f32.mrb[32].mxu1 }
 0x9ac   :  { %v6234_v40 = vadd.f32 %v2907_v35, %v7734_v11  ;;  %v2909_v31 = vpop.f32.mrb[17].mxu0  ;;  %v2980_v25 = vpop.f32.mrb[33].mxu1  ;;  %v6250_v34 = vadd.f32 %v2978_v22, %v7749_v45 }
 0x9ad   :  { %v6235_v13 = vadd.f32 %v2909_v31, %v7738_v54  ;;  %v6251_v29 = vadd.f32 %v2980_v25, %v7744_v28 }
 0x9ae   :  { %v4909_v26 = vmul.f32 -1.442695, %v6234_v40 }
 0x9af   :  { %v4910_v47 = vmul.f32 -1.442695, %v6235_v13  ;;  %v4911_v12 = vmul.f32 -1.442695, %v6251_v29 }
 0x9b0   :  { %6458 = vpow2.f32 %v4909_v26 }
 0x9b1   :  { %6460 = vpow2.f32 %v4910_v47 }
 0x9b2   :  { %6462 = vpow2.f32 %v4911_v12 }
 0x9b3   :  { %6464 = vtanh.f32 %v6250_v34 }
 0x9ba   :  { %v6459_v17 = vpop.eup %6458 }
 0x9bb   :  { %v6461_v8 = vpop.eup %6460  ;;  %v2990_v49 = vadd.f32 1.0, %v6459_v17 }
 0x9bc   :  { %v2996_v32 = vadd.f32 1.0, %v6461_v8  ;;  %v6463_v51 = vpop.eup %6462 }
 0x9bd   :  { %6466 = vrcp.f32 %v2990_v49  ;;  %v6465_v30 = vpop.eup %6464  ;;  %v3003_v38 = vadd.f32 1.0, %v6463_v51 }
 0x9be   :  { %6468 = vrcp.f32 %v2996_v32 }
 0x9bf   :  { %6470 = vrcp.f32 %v3003_v38 }
 0x9c7   :  { %v6467_v39 = vpop.eup %6466 }
 0x9c8   :  { %v6469_v21 = vpop.eup %6468  ;;  %v3007_v46 = vmul.f32 %v6467_v39, %v6465_v30 }
 0x9c9   :  { %v3006_v24 = vmul.f32 %v6469_v21, %v4908_v57  ;;  %v6471_v62 = vpop.eup %6470 }
 0x9cb   :  { %v7755_v1 = vadd.f32 %v3007_v46, %v3006_v24 }
 0x9cd   :  { %6472 = vtanh.f32 %v7755_v1 }
 0x9d7   :  { %v6473_v35 = vpop.eup %6472 }
 0x9d8   :  { %v7758_v22 = vmul.f32 %v6473_v35, %v6471_v62  ;;  %v3733_v35 = vld [vmem:[#allocation9 + $0x200] sm:$0xff] }
 0x9da   :  { %3145 = vmatmul.mubr.f32.vlgmr.msra.gmra.mrb[18].mxu0 %v7758_v22  ;;  %3216 = vmatmul.mubr.f32.vlgmr.msra.gmra.mrb[34].mxu1 %v7758_v22 }
 0x9db   :  { %5773 = vmatpush1.bf16.msra.mxu0 %v7597_v53  ;;  %5805 = vmatpush1.bf16.msra.mxu1 %v7600_v60 }
 0x9dc   :  { %5775 = vmatprep.subr.bf16.mxu0 %v7605_v48  ;;  %5807 = vmatprep.subr.bf16.mxu1 %v7607_v55 }
 0x9dd   :  { %3383 = vmatprep.mubr.f32.mxu0 %v8182_v0  ;;  %3454 = vmatprep.mubr.f32.mxu1 %v8182_v0 }
 0x9df   :  { %5777 = vmatpush1.bf16.msra.mxu0 %v7609_v6  ;;  %5809 = vmatpush1.bf16.msra.mxu1 %v7612_v43 }
 0x9e0   :  { %5779 = vmatprep.subr.bf16.mxu0 %v7617_v4  ;;  %5811 = vmatprep.subr.bf16.mxu1 %v7619_v52 }
 0x9e3   :  { %5781 = vmatpush1.bf16.msra.mxu0 %v7621_v3  ;;  %5813 = vmatpush1.bf16.msra.mxu1 %v7624_v58 }
 0x9e4   :  { %5783 = vmatprep.subr.bf16.mxu0 %v7629_v56  ;;  %5815 = vmatprep.subr.bf16.mxu1 %v7631_v20 }
 0x9e7   :  { %5785 = vmatpush1.bf16.msra.mxu0 %v7633_v9  ;;  %5817 = vmatpush1.bf16.msra.mxu1 %v7636_v19 }
 0x9e8   :  { %5787 = vmatprep.subr.bf16.mxu0 %v7640_v42  ;;  %5819 = vmatprep.subr.bf16.mxu1 %v7642_v10 }
 0x9eb   :  { %5789 = vmatpush1.bf16.msra.mxu0 %v7645_v5  ;;  %5821 = vmatpush1.bf16.msra.mxu1 %v7649_v2 }
 0x9ec   :  { %5791 = vmatprep.subr.bf16.mxu0 %v7651_v61  ;;  %5823 = vmatprep.subr.bf16.mxu1 %v7653_v50 }
 0x9ef   :  { %5793 = vmatpush1.bf16.msra.mxu0 %v7656_v27  ;;  %5825 = vmatpush1.bf16.msra.mxu1 %v7660_v63 }
 0x9f0   :  { %5795 = vmatprep.subr.bf16.mxu0 %v7662_v33  ;;  %5827 = vmatprep.subr.bf16.mxu1 %v7665_v59 }
 0x9f3   :  { %5797 = vmatpush1.bf16.msra.mxu0 %v7668_v14  ;;  %5829 = vmatpush1.bf16.msra.mxu1 %v7672_v44 }
 0x9f4   :  { %5799 = vmatprep.subr.bf16.mxu0 %v7677_v16  ;;  %5831 = vmatprep.subr.bf16.mxu1 %v7679_v23 }
 0x9f7   :  { %5801 = vmatpush1.bf16.msra.mxu0 %v7681_v37  ;;  %5833 = vmatpush1.bf16.msra.mxu1 %v7684_v36 }
 0x9f8   :  { %5835 = vmatprep.subr.bf16.mxu0 %v7593_v41  ;;  %5867 = vmatprep.subr.bf16.mxu1 %v7595_v7 }
 0xaad   :  { %v3146_v40 = vpop.f32.mrb[18].mxu0  ;;  %v3217_v31 = vpop.f32.mrb[34].mxu1 }
 0xaae   :  { %v6236_v25 = vadd.f32 %v3146_v40, %v7734_v11  ;;  %v3148_v13 = vpop.f32.mrb[19].mxu0  ;;  %v3219_v26 = vpop.f32.mrb[35].mxu1  ;;  %v6252_v34 = vadd.f32 %v3217_v31, %v7749_v45  ;;  %v3737_v40 = vld [vmem:[#allocation9 + $0x220] sm:$0xff] }
 0xaaf   :  { %v6237_v47 = vadd.f32 %v3148_v13, %v7738_v54  ;;  %v6253_v18 = vadd.f32 %v3219_v26, %v7744_v28  ;;  %v3735_v13 = vld [vmem:[#allocation9 + $0x210] sm:$0xff] }
 0xab0   :  { %v4912_v15 = vmul.f32 -1.442695, %v6236_v25  ;;  %v7858_v25 = vpack.c.bf16 %v3737_v40, %v3733_v35  ;;  %v3739_v26 = vld [vmem:[#allocation9 + $0x230] sm:$0xff]  ;;  %v3774_v40 = vld [vmem:[#allocation9 + $0x348] sm:$0xff] }
 0xab1   :  { %v4913_v29 = vmul.f32 -1.442695, %v6237_v47  ;;  %v4914_v12 = vmul.f32 -1.442695, %v6253_v18  ;;  %v7861_v47 = vpack.c.bf16 %v3739_v26, %v3735_v13  ;;  %v3744_v18 = vld [vmem:[#allocation9 + $0x258] sm:$0xff]  ;;  %v3778_v13 = vld [vmem:[#allocation9 + $0x368] sm:$0xff] }
 0xab2   :  { %6474 = vpow2.f32 %v4912_v15  ;;  %v3742_v15 = vld [vmem:[#allocation9 + $0x248] sm:$0xff]  ;;  %v3776_v26 = vld [vmem:[#allocation9 + $0x358] sm:$0xff] }
 0xab3   :  { %6476 = vpow2.f32 %v4913_v29  ;;  %v3746_v29 = vld [vmem:[#allocation9 + $0x268] sm:$0xff] }
 0xab4   :  { %6478 = vpow2.f32 %v4914_v12  ;;  %v7866_v12 = vpack.c.bf16 %v3746_v29, %v3742_v15  ;;  %v7913_v15 = vpack.c.bf16 %v3778_v13, %v3774_v40  ;;  %v3780_v29 = vld [vmem:[#allocation9 + $0x378] sm:$0xff] }
 0xab5   :  { %6480 = vtanh.f32 %v6252_v34  ;;  %v3748_v34 = vld [vmem:[#allocation9 + $0x278] sm:$0xff] }
 0xabc   :  { %v6475_v41 = vpop.eup %6474 }
 0xabd   :  { %v6477_v17 = vpop.eup %6476  ;;  %v3229_v7 = vadd.f32 1.0, %v6475_v41  ;;  %v3741_v41 = vld [vmem:[#allocation9 + $0x240] sm:$0xff] }
 0xabe   :  { %v3235_v8 = vadd.f32 1.0, %v6477_v17  ;;  %v6479_v49 = vpop.eup %6478  ;;  %v3745_v17 = vld [vmem:[#allocation9 + $0x260] sm:$0xff] }
 0xabf   :  { %6482 = vrcp.f32 %v3229_v7  ;;  %v6481_v32 = vpop.eup %6480  ;;  %v3242_v39 = vadd.f32 1.0, %v6479_v49  ;;  %v7868_v7 = vpack.c.bf16 %v3748_v34, %v3744_v18  ;;  %v3743_v49 = vld [vmem:[#allocation9 + $0x250] sm:$0xff]  ;;  %v3773_v18 = vld [vmem:[#allocation9 + $0x340] sm:$0xff] }
 0xac0   :  { %6484 = vrcp.f32 %v3235_v8  ;;  %v7870_v8 = vpack.c.bf16 %v3745_v17, %v3741_v41  ;;  %v3777_v34 = vld [vmem:[#allocation9 + $0x360] sm:$0xff]  ;;  %v7916_v41 = vpack.c.bf16 %v3780_v29, %v3776_v26 }
 0xac1   :  { %6486 = vrcp.f32 %v3242_v39  ;;  %v3752_v39 = vld [vmem:[#allocation9 + $0x298] sm:$0xff]  ;;  %v7918_v17 = vpack.c.bf16 %v3777_v34, %v3773_v18 }
 0xac9   :  { %v6483_v51 = vpop.eup %6482 }
 0xaca   :  { %v6485_v30 = vpop.eup %6484  ;;  %v3246_v57 = vmul.f32 %v6483_v51, %v6481_v32  ;;  %v3747_v32 = vld [vmem:[#allocation9 + $0x270] sm:$0xff] }
 0xacb   :  { %v3245_v21 = vmul.f32 %v6485_v30, %v7755_v1  ;;  %v6487_v38 = vpop.eup %6486  ;;  %v3740_v1 = vld [vmem:[#allocation9 + $0x238] sm:$0xff]  ;;  %v7873_v51 = vpack.c.bf16 %v3747_v32, %v3743_v49  ;;  %v3750_v30 = vld [vmem:[#allocation9 + $0x288] sm:$0xff]  ;;  %v3775_v49 = vld [vmem:[#allocation9 + $0x350] sm:$0xff] }
 0xacc   :  { %v3779_v32 = vld [vmem:[#allocation9 + $0x370] sm:$0xff] }
 0xacd   :  { %v7801_v46 = vadd.f32 %v3246_v57, %v3245_v21  ;;  %v3754_v57 = vld [vmem:[#allocation9 + $0x2a8] sm:$0xff] }
 0xace   :  { %v7878_v21 = vpack.c.bf16 %v3754_v57, %v3750_v30  ;;  %v3782_v30 = vld [vmem:[#allocation9 + $0x388] sm:$0xff]  ;;  %v7921_v57 = vpack.c.bf16 %v3779_v32, %v3775_v49 }
 0xacf   :  { %6488 = vtanh.f32 %v7801_v46 }
 0xad9   :  { %v6489_v24 = vpop.eup %6488 }
 0xada   :  { %v7804_v62 = vmul.f32 %v6489_v24, %v6487_v38  ;;  %v3749_v38 = vld [vmem:[#allocation9 + $0x280] sm:$0xff] }
 0xadb   :  { %v3753_v24 = vld [vmem:[#allocation9 + $0x2a0] sm:$0xff] }
 0xadc   :  { %3384 = vmatmul.mubr.f32.vlgmr.msra.gmra.mrb[20].mxu0 %v7804_v62  ;;  %3455 = vmatmul.mubr.f32.vlgmr.msra.gmra.mrb[36].mxu1 %v7804_v62 }
 0xadd   :  { %5837 = vmatpush1.bf16.msra.mxu0 %v7597_v53  ;;  %5869 = vmatpush1.bf16.msra.mxu1 %v7600_v60 }
 0xade   :  { %5839 = vmatprep.subr.bf16.mxu0 %v7605_v48  ;;  %5871 = vmatprep.subr.bf16.mxu1 %v7607_v55 }
 0xadf   :  { %3622 = vmatprep.mubr.f32.mxu0 %v8182_v0  ;;  %3693 = vmatprep.mubr.f32.mxu1 %v8182_v0 }
 0xae1   :  { %5841 = vmatpush1.bf16.msra.mxu0 %v7609_v6  ;;  %5873 = vmatpush1.bf16.msra.mxu1 %v7612_v43 }
 0xae2   :  { %5843 = vmatprep.subr.bf16.mxu0 %v7617_v4  ;;  %5875 = vmatprep.subr.bf16.mxu1 %v7619_v52 }
 0xae5   :  { %5845 = vmatpush1.bf16.msra.mxu0 %v7621_v3  ;;  %5877 = vmatpush1.bf16.msra.mxu1 %v7624_v58 }
 0xae6   :  { %5847 = vmatprep.subr.bf16.mxu0 %v7629_v56  ;;  %5879 = vmatprep.subr.bf16.mxu1 %v7631_v20 }
 0xae9   :  { %5849 = vmatpush1.bf16.msra.mxu0 %v7633_v9  ;;  %5881 = vmatpush1.bf16.msra.mxu1 %v7636_v19 }
 0xaea   :  { %5851 = vmatprep.subr.bf16.mxu0 %v7640_v42  ;;  %5883 = vmatprep.subr.bf16.mxu1 %v7642_v10 }
 0xaed   :  { %5853 = vmatpush1.bf16.msra.mxu0 %v7645_v5  ;;  %5885 = vmatpush1.bf16.msra.mxu1 %v7649_v2 }
 0xaee   :  { %5855 = vmatprep.subr.bf16.mxu0 %v7651_v61  ;;  %5887 = vmatprep.subr.bf16.mxu1 %v7653_v50 }
 0xaf1   :  { %5857 = vmatpush1.bf16.msra.mxu0 %v7656_v27  ;;  %5889 = vmatpush1.bf16.msra.mxu1 %v7660_v63 }
 0xaf2   :  { %5859 = vmatprep.subr.bf16.mxu0 %v7662_v33  ;;  %5891 = vmatprep.subr.bf16.mxu1 %v7665_v59 }
 0xaf5   :  { %5861 = vmatpush1.bf16.msra.mxu0 %v7668_v14  ;;  %5893 = vmatpush1.bf16.msra.mxu1 %v7672_v44 }
 0xaf6   :  { %5863 = vmatprep.subr.bf16.mxu0 %v7677_v16  ;;  %5895 = vmatprep.subr.bf16.mxu1 %v7679_v23  ;;  %v3734_v16 = vld [vmem:[#allocation9 + $0x208] sm:$0xff] }
 0xaf7   :  { %v3738_v23 = vld [vmem:[#allocation9 + $0x228] sm:$0xff] }
 0xaf9   :  { %5865 = vmatpush1.bf16.msra.mxu0 %v7681_v37  ;;  %5897 = vmatpush1.bf16.msra.mxu1 %v7684_v36  ;;  %v3736_v37 = vld [vmem:[#allocation9 + $0x218] sm:$0xff]  ;;  %v7854_v36 = vpack.c.bf16 %v3738_v23, %v3734_v16 }
 0xafa   :  { %v7856_v31 = vpack.c.bf16 %v3740_v1, %v3736_v37  ;;  %v3767_v37 = vld [vmem:[#allocation9 + $0x310] sm:$0xff] }
 0xafb   :  { %5899 = vmatprep.subr.bf16.mxu0 %v7854_v36  ;;  %v3771_v1 = vld [vmem:[#allocation9 + $0x330] sm:$0xff] }
 0xafc   :  { %5931 = vmatprep.subr.bf16.mxu1 %v7856_v31  ;;  %v7909_v35 = vpack.c.bf16 %v3771_v1, %v3767_v37  ;;  %v3795_v37 = vld [vmem:[#allocation9 + $0x3f0] sm:$0xff] }
 0xbaf   :  { %v3385_v53 = vpop.f32.mrb[20].mxu0  ;;  %v3456_v60 = vpop.f32.mrb[36].mxu1 }
 0xbb0   :  { %v6238_v48 = vadd.f32 %v3385_v53, %v7734_v11  ;;  %v3387_v55 = vpop.f32.mrb[21].mxu0  ;;  %v3458_v6 = vpop.f32.mrb[37].mxu1  ;;  %v6254_v56 = vadd.f32 %v3456_v60, %v7749_v45  ;;  %v7882_v60 = vpack.c.bf16 %v3753_v24, %v3749_v38  ;;  %v3788_v38 = vld [vmem:[#allocation9 + $0x3b8] sm:$0xff] }
 0xbb1   :  { %v6239_v43 = vadd.f32 %v3387_v55, %v7738_v54  ;;  %v6255_v3 = vadd.f32 %v3458_v6, %v7744_v28  ;;  %v3755_v55 = vld [vmem:[#allocation9 + $0x2b0] sm:$0xff] }
 0xbb2   :  { %v4915_v4 = vmul.f32 -1.442695, %v6238_v48  ;;  %v3751_v48 = vld [vmem:[#allocation9 + $0x290] sm:$0xff] }
 0xbb3   :  { %v4916_v52 = vmul.f32 -1.442695, %v6239_v43  ;;  %v4917_v58 = vmul.f32 -1.442695, %v6255_v3  ;;  %v7885_v6 = vpack.c.bf16 %v3755_v55, %v3751_v48  ;;  %v3758_v43 = vld [vmem:[#allocation9 + $0x2c8] sm:$0xff]  ;;  %v3781_v55 = vld [vmem:[#allocation9 + $0x380] sm:$0xff] }
 0xbb4   :  { %6490 = vpow2.f32 %v4915_v4  ;;  %v3762_v4 = vld [vmem:[#allocation9 + $0x2e8] sm:$0xff] }
 0xbb5   :  { %6492 = vpow2.f32 %v4916_v52  ;;  %v3760_v52 = vld [vmem:[#allocation9 + $0x2d8] sm:$0xff]  ;;  %v7890_v3 = vpack.c.bf16 %v3762_v4, %v3758_v43  ;;  %v3785_v43 = vld [vmem:[#allocation9 + $0x3a0] sm:$0xff]  ;;  %v3783_v4 = vld [vmem:[#allocation9 + $0x390] sm:$0xff] }
 0xbb6   :  { %6494 = vpow2.f32 %v4917_v58  ;;  %v3764_v58 = vld [vmem:[#allocation9 + $0x2f8] sm:$0xff] }
 0xbb7   :  { %6496 = vtanh.f32 %v6254_v56  ;;  %v3757_v56 = vld [vmem:[#allocation9 + $0x2c0] sm:$0xff] }
 0xbbe   :  { %v6491_v20 = vpop.eup %6490 }
 0xbbf   :  { %v6493_v9 = vpop.eup %6492  ;;  %v3468_v19 = vadd.f32 1.0, %v6491_v20  ;;  %v3761_v20 = vld [vmem:[#allocation9 + $0x2e0] sm:$0xff] }
 0xbc0   :  { %v3474_v42 = vadd.f32 1.0, %v6493_v9  ;;  %v6495_v10 = vpop.eup %6494  ;;  %v7892_v9 = vpack.c.bf16 %v3764_v58, %v3760_v52  ;;  %v7929_v52 = vpack.c.bf16 %v3785_v43, %v3781_v55  ;;  %v3787_v58 = vld [vmem:[#allocation9 + $0x3b0] sm:$0xff] }
 0xbc1   :  { %6498 = vrcp.f32 %v3468_v19  ;;  %v6497_v5 = vpop.eup %6496  ;;  %v3481_v27 = vadd.f32 1.0, %v6495_v10  ;;  %v7894_v19 = vpack.c.bf16 %v3761_v20, %v3757_v56  ;;  %v3763_v10 = vld [vmem:[#allocation9 + $0x2f0] sm:$0xff]  ;;  %v3790_v56 = vld [vmem:[#allocation9 + $0x3c8] sm:$0xff] }
 0xbc2   :  { %6500 = vrcp.f32 %v3474_v42  ;;  %v3759_v42 = vld [vmem:[#allocation9 + $0x2d0] sm:$0xff]  ;;  %v3794_v20 = vld [vmem:[#allocation9 + $0x3e8] sm:$0xff] }
 0xbc3   :  { %6502 = vrcp.f32 %v3481_v27 }
 0xbcb   :  { %v6499_v2 = vpop.eup %6498 }
 0xbcc   :  { %v6501_v61 = vpop.eup %6500  ;;  %v3485_v50 = vmul.f32 %v6499_v2, %v6497_v5  ;;  %v7897_v5 = vpack.c.bf16 %v3763_v10, %v3759_v42  ;;  %v3766_v2 = vld [vmem:[#allocation9 + $0x308] sm:$0xff]  ;;  %v7933_v42 = vpack.c.bf16 %v3787_v58, %v3783_v4  ;;  %v7935_v10 = vpack.c.bf16 %v3794_v20, %v3790_v56 }
 0xbcd   :  { %v3484_v63 = vmul.f32 %v6501_v61, %v7801_v46  ;;  %v6503_v59 = vpop.eup %6502  ;;  %v3756_v46 = vld [vmem:[#allocation9 + $0x2b8] sm:$0xff]  ;;  %v3770_v61 = vld [vmem:[#allocation9 + $0x328] sm:$0xff] }
 0xbce   :  { %v7880_v53 = vpack.c.bf16 %v3756_v46, %v3752_v39  ;;  %v7902_v27 = vpack.c.bf16 %v3770_v61, %v3766_v2  ;;  %v3786_v39 = vld [vmem:[#allocation9 + $0x3a8] sm:$0xff]  ;;  %v3784_v46 = vld [vmem:[#allocation9 + $0x398] sm:$0xff] }
 0xbcf   :  { %v7845_v33 = vadd.f32 %v3485_v50, %v3484_v63  ;;  %v3768_v50 = vld [vmem:[#allocation9 + $0x318] sm:$0xff]  ;;  %v7924_v24 = vpack.c.bf16 %v3786_v39, %v3782_v30  ;;  %v7926_v48 = vpack.c.bf16 %v3788_v38, %v3784_v46 }
 0xbd0   :  { %v3772_v63 = vld [vmem:[#allocation9 + $0x338] sm:$0xff] }
 0xbd1   :  { %6504 = vtanh.f32 %v7845_v33  ;;  %v7904_v16 = vpack.c.bf16 %v3772_v63, %v3768_v50  ;;  %v3792_v2 = vld [vmem:[#allocation9 + $0x3d8] sm:$0xff]  ;;  %v3789_v50 = vld [vmem:[#allocation9 + $0x3c0] sm:$0xff] }
 0xbd2   :  { %v3796_v61 = vld [vmem:[#allocation9 + $0x3f8] sm:$0xff] }
 0xbd3   :  { %v7938_v63 = vpack.c.bf16 %v3796_v61, %v3792_v2 }
 0xbdb   :  { %v6505_v14 = vpop.eup %6504 }
 0xbdc   :  { %v7848_v44 = vmul.f32 %v6505_v14, %v6503_v59  ;;  %v3765_v59 = vld [vmem:[#allocation9 + $0x300] sm:$0xff] }
 0xbdd   :  { %v3769_v14 = vld [vmem:[#allocation9 + $0x320] sm:$0xff] }
 0xbde   :  { %3623 = vmatmul.mubr.f32.vlgmr.msra.gmra.mrb[22].mxu0 %v7848_v44  ;;  %3694 = vmatmul.mubr.f32.vlgmr.msra.gmra.mrb[38].mxu1 %v7848_v44  ;;  %v7906_v23 = vpack.c.bf16 %v3769_v14, %v3765_v59  ;;  %v3793_v59 = vld [vmem:[#allocation9 + $0x3e0] sm:$0xff]  ;;  %v3791_v14 = vld [vmem:[#allocation9 + $0x3d0] sm:$0xff] }
 0xbdf   :  { %3861 = vmatprep.mubr.f32.mxu0 %v8182_v0  ;;  %3932 = vmatprep.mubr.f32.mxu1 %v8182_v0  ;;  %v7941_v1 = vpack.c.bf16 %v3793_v59, %v3789_v50  ;;  %v7945_v40 = vpack.c.bf16 %v3795_v37, %v3791_v14 }
 0xbe0   :  { %5901 = vmatpush1.bf16.msra.mxu0 %v7858_v25  ;;  %5933 = vmatpush1.bf16.msra.mxu1 %v7861_v47 }
 0xbe1   :  { %5903 = vmatprep.subr.bf16.mxu0 %v7866_v12  ;;  %5935 = vmatprep.subr.bf16.mxu1 %v7868_v7 }
 0xbe4   :  { %5905 = vmatpush1.bf16.msra.mxu0 %v7870_v8  ;;  %5937 = vmatpush1.bf16.msra.mxu1 %v7873_v51 }
 0xbe5   :  { %5907 = vmatprep.subr.bf16.mxu0 %v7878_v21  ;;  %5939 = vmatprep.subr.bf16.mxu1 %v7880_v53 }
 0xbe8   :  { %5909 = vmatpush1.bf16.msra.mxu0 %v7882_v60  ;;  %5941 = vmatpush1.bf16.msra.mxu1 %v7885_v6 }
 0xbe9   :  { %5911 = vmatprep.subr.bf16.mxu0 %v7890_v3  ;;  %5943 = vmatprep.subr.bf16.mxu1 %v7892_v9 }
 0xbec   :  { %5913 = vmatpush1.bf16.msra.mxu0 %v7894_v19  ;;  %5945 = vmatpush1.bf16.msra.mxu1 %v7897_v5 }
 0xbed   :  { %5915 = vmatprep.subr.bf16.mxu0 %v7902_v27  ;;  %5947 = vmatprep.subr.bf16.mxu1 %v7904_v16 }
 0xbf0   :  { %5917 = vmatpush1.bf16.msra.mxu0 %v7906_v23  ;;  %5949 = vmatpush1.bf16.msra.mxu1 %v7909_v35 }
 0xbf1   :  { %5919 = vmatprep.subr.bf16.mxu0 %v7913_v15  ;;  %5951 = vmatprep.subr.bf16.mxu1 %v7916_v41 }
 0xbf4   :  { %5921 = vmatpush1.bf16.msra.mxu0 %v7918_v17  ;;  %5953 = vmatpush1.bf16.msra.mxu1 %v7921_v57 }
 0xbf5   :  { %5923 = vmatprep.subr.bf16.mxu0 %v7924_v24  ;;  %5955 = vmatprep.subr.bf16.mxu1 %v7926_v48 }
 0xbf8   :  { %5925 = vmatpush1.bf16.msra.mxu0 %v7929_v52  ;;  %5957 = vmatpush1.bf16.msra.mxu1 %v7933_v42 }
 0xbf9   :  { %5927 = vmatprep.subr.bf16.mxu0 %v7935_v10  ;;  %5959 = vmatprep.subr.bf16.mxu1 %v7938_v63 }
 0xbfc   :  { %5929 = vmatpush1.bf16.msra.mxu0 %v7941_v1  ;;  %5961 = vmatpush1.bf16.msra.mxu1 %v7945_v40 }
 0xbfd   :  { %5963 = vmatprep.subr.bf16.mxu0 %v7854_v36  ;;  %5995 = vmatprep.subr.bf16.mxu1 %v7856_v31 }
 0xcb1   :  { %v3624_v13 = vpop.f32.mrb[22].mxu0  ;;  %v3695_v26 = vpop.f32.mrb[38].mxu1 }
 0xcb2   :  { %v6240_v29 = vadd.f32 %v3624_v13, %v7734_v11  ;;  %v3626_v18 = vpop.f32.mrb[23].mxu0  ;;  %v3697_v34 = vpop.f32.mrb[39].mxu1  ;;  %v6256_v38 = vadd.f32 %v3695_v26, %v7749_v45 }
 0xcb3   :  { %v6241_v49 = vadd.f32 %v3626_v18, %v7738_v54  ;;  %v6257_v39 = vadd.f32 %v3697_v34, %v7744_v28 }
 0xcb4   :  { %v4918_v32 = vmul.f32 -1.442695, %v6240_v29 }
 0xcb5   :  { %v4919_v30 = vmul.f32 -1.442695, %v6241_v49  ;;  %v4920_v46 = vmul.f32 -1.442695, %v6257_v39 }
 0xcb6   :  { %6506 = vpow2.f32 %v4918_v32 }
 0xcb7   :  { %6508 = vpow2.f32 %v4919_v30 }
 0xcb8   :  { %6510 = vpow2.f32 %v4920_v46 }
 0xcb9   :  { %6512 = vtanh.f32 %v6256_v38 }
 0xcc0   :  { %v6507_v55 = vpop.eup %6506 }
 0xcc1   :  { %v6509_v43 = vpop.eup %6508  ;;  %v3707_v4 = vadd.f32 1.0, %v6507_v55 }
 0xcc2   :  { %v3713_v58 = vadd.f32 1.0, %v6509_v43  ;;  %v6511_v56 = vpop.eup %6510 }
 0xcc3   :  { %6514 = vrcp.f32 %v3707_v4  ;;  %v6513_v20 = vpop.eup %6512  ;;  %v3720_v59 = vadd.f32 1.0, %v6511_v56 }
 0xcc4   :  { %6516 = vrcp.f32 %v3713_v58 }
 0xcc5   :  { %6518 = vrcp.f32 %v3720_v59 }
 0xccd   :  { %v6515_v2 = vpop.eup %6514 }
 0xcce   :  { %v6517_v61 = vpop.eup %6516  ;;  %v3724_v50 = vmul.f32 %v6515_v2, %v6513_v20 }
 0xccf   :  { %v3723_v14 = vmul.f32 %v6517_v61, %v7845_v33  ;;  %v6519_v13 = vpop.eup %6518 }
 0xcd1   :  { %v7957_v37 = vadd.f32 %v3724_v50, %v3723_v14 }
 0xcd3   :  { %6520 = vtanh.f32 %v7957_v37 }
 0xcdd   :  { %v6521_v26 = vpop.eup %6520 }
 0xcde   :  { %v7960_v29 = vmul.f32 %v6521_v26, %v6519_v13 }
 0xce0   :  { %3862 = vmatmul.mubr.f32.vlgmr.msra.gmra.mrb[24].mxu0 %v7960_v29  ;;  %3933 = vmatmul.mubr.f32.vlgmr.msra.gmra.mrb[40].mxu1 %v7960_v29 }
 0xce1   :  { %5965 = vmatpush1.bf16.msra.mxu0 %v7858_v25  ;;  %5997 = vmatpush1.bf16.msra.mxu1 %v7861_v47 }
 0xce2   :  { %5967 = vmatprep.subr.bf16.mxu0 %v7866_v12  ;;  %5999 = vmatprep.subr.bf16.mxu1 %v7868_v7 }
 0xce3   :  { %4100 = vmatprep.mubr.f32.mxu0 %v8182_v0  ;;  %4171 = vmatprep.mubr.f32.mxu1 %v8182_v0 }
 0xce5   :  { %5969 = vmatpush1.bf16.msra.mxu0 %v7870_v8  ;;  %6001 = vmatpush1.bf16.msra.mxu1 %v7873_v51 }
 0xce6   :  { %5971 = vmatprep.subr.bf16.mxu0 %v7878_v21  ;;  %6003 = vmatprep.subr.bf16.mxu1 %v7880_v53 }
 0xce9   :  { %5973 = vmatpush1.bf16.msra.mxu0 %v7882_v60  ;;  %6005 = vmatpush1.bf16.msra.mxu1 %v7885_v6 }
 0xcea   :  { %5975 = vmatprep.subr.bf16.mxu0 %v7890_v3  ;;  %6007 = vmatprep.subr.bf16.mxu1 %v7892_v9 }
 0xced   :  { %5977 = vmatpush1.bf16.msra.mxu0 %v7894_v19  ;;  %6009 = vmatpush1.bf16.msra.mxu1 %v7897_v5 }
 0xcee   :  { %5979 = vmatprep.subr.bf16.mxu0 %v7902_v27  ;;  %6011 = vmatprep.subr.bf16.mxu1 %v7904_v16 }
 0xcf1   :  { %5981 = vmatpush1.bf16.msra.mxu0 %v7906_v23  ;;  %6013 = vmatpush1.bf16.msra.mxu1 %v7909_v35 }
 0xcf2   :  { %5983 = vmatprep.subr.bf16.mxu0 %v7913_v15  ;;  %6015 = vmatprep.subr.bf16.mxu1 %v7916_v41 }
 0xcf5   :  { %5985 = vmatpush1.bf16.msra.mxu0 %v7918_v17  ;;  %6017 = vmatpush1.bf16.msra.mxu1 %v7921_v57 }
 0xcf6   :  { %5987 = vmatprep.subr.bf16.mxu0 %v7924_v24  ;;  %6019 = vmatprep.subr.bf16.mxu1 %v7926_v48 }
 0xcf9   :  { %5989 = vmatpush1.bf16.msra.mxu0 %v7929_v52  ;;  %6021 = vmatpush1.bf16.msra.mxu1 %v7933_v42 }
 0xcfa   :  { %5991 = vmatprep.subr.bf16.mxu0 %v7935_v10  ;;  %6023 = vmatprep.subr.bf16.mxu1 %v7938_v63 }
 0xcfd   :  { %5993 = vmatpush1.bf16.msra.mxu0 %v7941_v1  ;;  %6025 = vmatpush1.bf16.msra.mxu1 %v7945_v40 }
 0xcfe   :  { %6027 = vmatprep.subr.bf16.mxu0 %v7854_v36  ;;  %6059 = vmatprep.subr.bf16.mxu1 %v7856_v31 }
 0xdb3   :  { %v3863_v33 = vpop.f32.mrb[24].mxu0  ;;  %v3934_v18 = vpop.f32.mrb[40].mxu1 }
 0xdb4   :  { %v6242_v34 = vadd.f32 %v3863_v33, %v7734_v11  ;;  %v3865_v49 = vpop.f32.mrb[25].mxu0  ;;  %v3936_v32 = vpop.f32.mrb[41].mxu1  ;;  %v6258_v43 = vadd.f32 %v3934_v18, %v7749_v45 }
 0xdb5   :  { %v6243_v30 = vadd.f32 %v3865_v49, %v7738_v54  ;;  %v6259_v38 = vadd.f32 %v3936_v32, %v7744_v28 }
 0xdb6   :  { %v4921_v39 = vmul.f32 -1.442695, %v6242_v34 }
 0xdb7   :  { %v4922_v46 = vmul.f32 -1.442695, %v6243_v30  ;;  %v4923_v55 = vmul.f32 -1.442695, %v6259_v38 }
 0xdb8   :  { %6522 = vpow2.f32 %v4921_v39 }
 0xdb9   :  { %6524 = vpow2.f32 %v4922_v46 }
 0xdba   :  { %6526 = vpow2.f32 %v4923_v55 }
 0xdbb   :  { %6528 = vtanh.f32 %v6258_v43 }
 0xdc2   :  { %v6523_v4 = vpop.eup %6522 }
 0xdc3   :  { %v6525_v58 = vpop.eup %6524  ;;  %v3946_v56 = vadd.f32 1.0, %v6523_v4 }
 0xdc4   :  { %v3952_v20 = vadd.f32 1.0, %v6525_v58  ;;  %v6527_v2 = vpop.eup %6526 }
 0xdc5   :  { %6530 = vrcp.f32 %v3946_v56  ;;  %v6529_v61 = vpop.eup %6528  ;;  %v3959_v13 = vadd.f32 1.0, %v6527_v2 }
 0xdc6   :  { %6532 = vrcp.f32 %v3952_v20 }
 0xdc7   :  { %6534 = vrcp.f32 %v3959_v13 }
 0xdcf   :  { %v6531_v50 = vpop.eup %6530 }
 0xdd0   :  { %v6533_v59 = vpop.eup %6532  ;;  %v3963_v14 = vmul.f32 %v6531_v50, %v6529_v61 }
 0xdd1   :  { %v3962_v26 = vmul.f32 %v6533_v59, %v7957_v37  ;;  %v6535_v18 = vpop.eup %6534 }
 0xdd3   :  { %v8003_v33 = vadd.f32 %v3963_v14, %v3962_v26 }
 0xdd5   :  { %6536 = vtanh.f32 %v8003_v33 }
 0xddf   :  { %v6537_v34 = vpop.eup %6536 }
 0xde0   :  { %v8006_v49 = vmul.f32 %v6537_v34, %v6535_v18 }
 0xde2   :  { %4101 = vmatmul.mubr.f32.vlgmr.msra.gmra.mrb[26].mxu0 %v8006_v49  ;;  %4172 = vmatmul.mubr.f32.vlgmr.msra.gmra.mrb[42].mxu1 %v8006_v49 }
 0xde3   :  { %6029 = vmatpush1.bf16.msra.mxu0 %v7858_v25  ;;  %6061 = vmatpush1.bf16.msra.mxu1 %v7861_v47 }
 0xde4   :  { %6031 = vmatprep.subr.bf16.mxu0 %v7866_v12  ;;  %6063 = vmatprep.subr.bf16.mxu1 %v7868_v7 }
 0xde5   :  { %4339 = vmatprep.mubr.f32.mxu0 %v8182_v0  ;;  %4410 = vmatprep.mubr.f32.mxu1 %v8182_v0 }
 0xde7   :  { %6033 = vmatpush1.bf16.msra.mxu0 %v7870_v8  ;;  %6065 = vmatpush1.bf16.msra.mxu1 %v7873_v51 }
 0xde8   :  { %6035 = vmatprep.subr.bf16.mxu0 %v7878_v21  ;;  %6067 = vmatprep.subr.bf16.mxu1 %v7880_v53 }
 0xdeb   :  { %6037 = vmatpush1.bf16.msra.mxu0 %v7882_v60  ;;  %6069 = vmatpush1.bf16.msra.mxu1 %v7885_v6 }
 0xdec   :  { %6039 = vmatprep.subr.bf16.mxu0 %v7890_v3  ;;  %6071 = vmatprep.subr.bf16.mxu1 %v7892_v9 }
 0xdef   :  { %6041 = vmatpush1.bf16.msra.mxu0 %v7894_v19  ;;  %6073 = vmatpush1.bf16.msra.mxu1 %v7897_v5 }
 0xdf0   :  { %6043 = vmatprep.subr.bf16.mxu0 %v7902_v27  ;;  %6075 = vmatprep.subr.bf16.mxu1 %v7904_v16 }
 0xdf3   :  { %6045 = vmatpush1.bf16.msra.mxu0 %v7906_v23  ;;  %6077 = vmatpush1.bf16.msra.mxu1 %v7909_v35 }
 0xdf4   :  { %6047 = vmatprep.subr.bf16.mxu0 %v7913_v15  ;;  %6079 = vmatprep.subr.bf16.mxu1 %v7916_v41 }
 0xdf7   :  { %6049 = vmatpush1.bf16.msra.mxu0 %v7918_v17  ;;  %6081 = vmatpush1.bf16.msra.mxu1 %v7921_v57 }
 0xdf8   :  { %6051 = vmatprep.subr.bf16.mxu0 %v7924_v24  ;;  %6083 = vmatprep.subr.bf16.mxu1 %v7926_v48 }
 0xdfb   :  { %6053 = vmatpush1.bf16.msra.mxu0 %v7929_v52  ;;  %6085 = vmatpush1.bf16.msra.mxu1 %v7933_v42 }
 0xdfc   :  { %6055 = vmatprep.subr.bf16.mxu0 %v7935_v10  ;;  %6087 = vmatprep.subr.bf16.mxu1 %v7938_v63 }
 0xdff   :  { %6057 = vmatpush1.bf16.msra.mxu0 %v7941_v1  ;;  %6089 = vmatpush1.bf16.msra.mxu1 %v7945_v40 }
 0xe00   :  { %6091 = vmatprep.subr.bf16.mxu0 %v7854_v36  ;;  %6123 = vmatprep.subr.bf16.mxu1 %v7856_v31 }
 0xeb5   :  { %v4102_v37 = vpop.f32.mrb[26].mxu0  ;;  %v4173_v32 = vpop.f32.mrb[42].mxu1 }
 0xeb6   :  { %v6244_v30 = vadd.f32 %v4102_v37, %v7734_v11  ;;  %v4104_v39 = vpop.f32.mrb[27].mxu0  ;;  %v4175_v46 = vpop.f32.mrb[43].mxu1  ;;  %v6260_v56 = vadd.f32 %v4173_v32, %v7749_v45 }
 0xeb7   :  { %v6245_v38 = vadd.f32 %v4104_v39, %v7738_v54  ;;  %v6261_v4 = vadd.f32 %v4175_v46, %v7744_v28  ;;  %v4701_v39 = vld [vmem:[#allocation13 + $0x20] sm:$0xff]  ;;  %v4702_v46 = vld [vmem:[#allocation13 + $0x28] sm:$0xff] }
 0xeb8   :  { %v4924_v55 = vmul.f32 -1.442695, %v6244_v30 }
 0xeb9   :  { %v4925_v43 = vmul.f32 -1.442695, %v6245_v38  ;;  %v4926_v58 = vmul.f32 -1.442695, %v6261_v4  ;;  %v6162_v38 = vpack.c.bf16 %v4702_v46, %v4701_v39 }
 0xeba   :  { %6538 = vpow2.f32 %v4924_v55  ;;  %v4703_v55 = vld [vmem:[#allocation13 + $0x30] sm:$0xff] }
 0xebb   :  { %6540 = vpow2.f32 %v4925_v43  ;;  %v4704_v43 = vld [vmem:[#allocation13 + $0x38] sm:$0xff] }
 0xebc   :  { %6542 = vpow2.f32 %v4926_v58  ;;  %v6166_v4 = vpack.c.bf16 %v4704_v43, %v4703_v55  ;;  %v4705_v58 = vld [vmem:[#allocation13 + $0x40] sm:$0xff] }
 0xebd   :  { %6544 = vtanh.f32 %v6260_v56  ;;  %v4706_v56 = vld [vmem:[#allocation13 + $0x48] sm:$0xff] }
 0xec4   :  { %v6539_v36 = vpop.eup %6538 }
 0xec5   :  { %v6541_v20 = vpop.eup %6540  ;;  %v4185_v31 = vadd.f32 1.0, %v6539_v36  ;;  %v6170_v36 = vpack.c.bf16 %v4706_v56, %v4705_v58 }
 0xec6   :  { %v4191_v2 = vadd.f32 1.0, %v6541_v20  ;;  %v6543_v61 = vpop.eup %6542  ;;  %v4707_v20 = vld [vmem:[#allocation13 + $0x50] sm:$0xff] }
 0xec7   :  { %6546 = vrcp.f32 %v4185_v31  ;;  %v6545_v50 = vpop.eup %6544  ;;  %v4198_v26 = vadd.f32 1.0, %v6543_v61  ;;  %v4708_v31 = vld [vmem:[#allocation13 + $0x58] sm:$0xff]  ;;  %v4709_v61 = vld [vmem:[#allocation13 + $0x60] sm:$0xff] }
 0xec8   :  { %6548 = vrcp.f32 %v4191_v2  ;;  %v6174_v2 = vpack.c.bf16 %v4708_v31, %v4707_v20 }
 0xec9   :  { %6550 = vrcp.f32 %v4198_v26 }
 0xed1   :  { %v6547_v59 = vpop.eup %6546 }
 0xed2   :  { %v6549_v14 = vpop.eup %6548  ;;  %v4202_v13 = vmul.f32 %v6547_v59, %v6545_v50  ;;  %v4710_v50 = vld [vmem:[#allocation13 + $0x68] sm:$0xff]  ;;  %v4711_v59 = vld [vmem:[#allocation13 + $0x70] sm:$0xff] }
 0xed3   :  { %v4201_v18 = vmul.f32 %v6549_v14, %v8003_v33  ;;  %v6551_v37 = vpop.eup %6550  ;;  %v4712_v14 = vld [vmem:[#allocation13 + $0x78] sm:$0xff] }
 0xed5   :  { %v8049_v34 = vadd.f32 %v4202_v13, %v4201_v18  ;;  %v6182_v13 = vpack.c.bf16 %v4712_v14, %v4711_v59 }
 0xed7   :  { %6552 = vtanh.f32 %v8049_v34 }
 0xee1   :  { %v6553_v32 = vpop.eup %6552 }
 0xee2   :  { %v8052_v30 = vmul.f32 %v6553_v32, %v6551_v37 }
 0xee4   :  { %4340 = vmatmul.mubr.f32.vlgmr.msra.gmra.mrb[28].mxu0 %v8052_v30  ;;  %4411 = vmatmul.mubr.f32.vlgmr.msra.gmra.mrb[44].mxu1 %v8052_v30 }
 0xee5   :  { %6093 = vmatpush1.bf16.msra.mxu0 %v7858_v25  ;;  %6125 = vmatpush1.bf16.msra.mxu1 %v7861_v47  ;;  %v4698_v25 = vld [vmem:[#allocation13 + $0x8] sm:$0xff] }
 0xee6   :  { %6095 = vmatprep.subr.bf16.mxu0 %v7866_v12  ;;  %6127 = vmatprep.subr.bf16.mxu1 %v7868_v7 }
 0xee7   :  { %4578 = vmatprep.mubr.f32.mxu0 %v8182_v0  ;;  %4649 = vmatprep.mubr.f32.mxu1 %v8182_v0  ;;  %v4697_v0 = vld [vmem:[#allocation13] sm:$0xff] }
 0xee8   :  { %v6154_v47 = vpack.c.bf16 %v4698_v25, %v4697_v0 }
 0xee9   :  { %6097 = vmatpush1.bf16.msra.mxu0 %v7870_v8  ;;  %6129 = vmatpush1.bf16.msra.mxu1 %v7873_v51 }
 0xeea   :  { %6099 = vmatprep.subr.bf16.mxu0 %v7878_v21  ;;  %6131 = vmatprep.subr.bf16.mxu1 %v7880_v53 }
 0xeed   :  { %6101 = vmatpush1.bf16.msra.mxu0 %v7882_v60  ;;  %6133 = vmatpush1.bf16.msra.mxu1 %v7885_v6 }
 0xeee   :  { %6103 = vmatprep.subr.bf16.mxu0 %v7890_v3  ;;  %6135 = vmatprep.subr.bf16.mxu1 %v7892_v9 }
 0xef1   :  { %6105 = vmatpush1.bf16.msra.mxu0 %v7894_v19  ;;  %6137 = vmatpush1.bf16.msra.mxu1 %v7897_v5 }
 0xef2   :  { %6107 = vmatprep.subr.bf16.mxu0 %v7902_v27  ;;  %6139 = vmatprep.subr.bf16.mxu1 %v7904_v16 }
 0xef5   :  { %6109 = vmatpush1.bf16.msra.mxu0 %v7906_v23  ;;  %6141 = vmatpush1.bf16.msra.mxu1 %v7909_v35 }
 0xef6   :  { %6111 = vmatprep.subr.bf16.mxu0 %v7913_v15  ;;  %6143 = vmatprep.subr.bf16.mxu1 %v7916_v41 }
 0xef9   :  { %6113 = vmatpush1.bf16.msra.mxu0 %v7918_v17  ;;  %6145 = vmatpush1.bf16.msra.mxu1 %v7921_v57 }
 0xefa   :  { %6115 = vmatprep.subr.bf16.mxu0 %v7924_v24  ;;  %6147 = vmatprep.subr.bf16.mxu1 %v7926_v48 }
 0xefd   :  { %6117 = vmatpush1.bf16.msra.mxu0 %v7929_v52  ;;  %6149 = vmatpush1.bf16.msra.mxu1 %v7933_v42  ;;  %v4699_v42 = vld [vmem:[#allocation13 + $0x10] sm:$0xff] }
 0xefe   :  { %6119 = vmatprep.subr.bf16.mxu0 %v7935_v10  ;;  %6151 = vmatprep.subr.bf16.mxu1 %v7938_v63  ;;  %v4700_v10 = vld [vmem:[#allocation13 + $0x18] sm:$0xff] }
 0xeff   :  { %v6158_v33 = vpack.c.bf16 %v4700_v10, %v4699_v42 }
 0xf01   :  { %6121 = vmatpush1.bf16.msra.mxu0 %v7941_v1  ;;  %6153 = vmatpush1.bf16.msra.mxu1 %v7945_v40 }
 0xf02   :  { %6155 = vmatprep.subr.bf16.mxu0 %v6154_v47 }
 0xfb7   :  { %v4341_v12 = vpop.f32.mrb[28].mxu0  ;;  %v4412_v7 = vpop.f32.mrb[44].mxu1 }
 0xfb8   :  { %v6246_v8 = vadd.f32 %v4341_v12, %v7734_v11  ;;  %v4343_v51 = vpop.f32.mrb[29].mxu0  ;;  %v4414_v21 = vpop.f32.mrb[45].mxu1  ;;  %v6262_v19 = vadd.f32 %v4412_v7, %v7749_v45 }
 0xfb9   :  { %v6247_v53 = vadd.f32 %v4343_v51, %v7738_v54  ;;  %v6263_v3 = vadd.f32 %v4414_v21, %v7744_v28 }
 0xfba   :  { %v4927_v60 = vmul.f32 -1.442695, %v6246_v8 }
 0xfbb   :  { %v4928_v6 = vmul.f32 -1.442695, %v6247_v53  ;;  %v4929_v9 = vmul.f32 -1.442695, %v6263_v3 }
 0xfbc   :  { %6554 = vpow2.f32 %v4927_v60 }
 0xfbd   :  { %6556 = vpow2.f32 %v4928_v6 }
 0xfbe   :  { %6558 = vpow2.f32 %v4929_v9 }
 0xfbf   :  { %6560 = vtanh.f32 %v6262_v19 }
 0xfc6   :  { %v6555_v5 = vpop.eup %6554 }
 0xfc7   :  { %v6557_v27 = vpop.eup %6556  ;;  %v4424_v16 = vadd.f32 1.0, %v6555_v5 }
 0xfc8   :  { %v4430_v23 = vadd.f32 1.0, %v6557_v27  ;;  %v6559_v35 = vpop.eup %6558 }
 0xfc9   :  { %6562 = vrcp.f32 %v4424_v16  ;;  %v6561_v15 = vpop.eup %6560  ;;  %v4437_v24 = vadd.f32 1.0, %v6559_v35 }
 0xfca   :  { %6564 = vrcp.f32 %v4430_v23 }
 0xfcb   :  { %6566 = vrcp.f32 %v4437_v24 }
 0xfd3   :  { %v6563_v41 = vpop.eup %6562 }
 0xfd4   :  { %v6565_v17 = vpop.eup %6564  ;;  %v4441_v57 = vmul.f32 %v6563_v41, %v6561_v15 }
 0xfd5   :  { %v4440_v48 = vmul.f32 %v6565_v17, %v8049_v34  ;;  %v6567_v63 = vpop.eup %6566 }
 0xfd7   :  { %v8093_v52 = vadd.f32 %v4441_v57, %v4440_v48 }
 0xfd9   :  { %6568 = vtanh.f32 %v8093_v52 }
 0xfe3   :  { %v6569_v1 = vpop.eup %6568 }
 0xfe4   :  { %v4444_v40 = vmul.f32 %v6569_v1, %v6567_v63 }
 0xfe6   :  { %4579 = vmatmul.mubr.f32.vlgmr.msra.gmra.mrb[30].mxu0 %v4444_v40  ;;  %4650 = vmatmul.mubr.f32.vlgmr.msra.gmra.mrb[46].mxu1 %v4444_v40 }
 0xfe7   :  { %6157 = vmatpush3.bf16.msra.mxu0 %v6154_v47  ;;  %4990 = vmatprep.mubr.f32.mxu0 %v7758_v22  ;;  %v6178_v22 = vpack.c.bf16 %v4710_v50, %v4709_v61 }
 0xfe8   :  { %6159 = vmatprep.subr.bf16.mxu0 %v6158_v33 }
 0xfeb   :  { %6161 = vmatpush3.bf16.msra.mxu0 %v6158_v33 }
 0xfec   :  { %6163 = vmatprep.subr.bf16.mxu0 %v6162_v38 }
 0xfef   :  { %6165 = vmatpush3.bf16.msra.mxu0 %v6162_v38 }
 0xff0   :  { %6167 = vmatprep.subr.bf16.mxu0 %v6166_v4 }
 0xff3   :  { %6169 = vmatpush3.bf16.msra.mxu0 %v6166_v4 }
 0xff4   :  { %6171 = vmatprep.subr.bf16.mxu0 %v6170_v36 }
 0xff7   :  { %6173 = vmatpush3.bf16.msra.mxu0 %v6170_v36 }
 0xff8   :  { %6175 = vmatprep.subr.bf16.mxu0 %v6174_v2 }
 0xffb   :  { %6177 = vmatpush3.bf16.msra.mxu0 %v6174_v2 }
 0xffc   :  { %6179 = vmatprep.subr.bf16.mxu0 %v6178_v22 }
 0xfff   :  { %6181 = vmatpush3.bf16.msra.mxu0 %v6178_v22 }
0x1000   :  { %6183 = vmatprep.subr.bf16.mxu0 %v6182_v13 }
0x1003   :  { %6185 = vmatpush3.bf16.msra.mxu0 %v6182_v13 }
0x1006   :  { %4991 = vmatmul.mubr.f32.vlgmr.msra.gmra.mrb[32].mxu0 %v7804_v62 }
0x1007   :  { %4993 = vmatprep.mubr.f32.mxu0 %v7848_v44 }
0x100a   :  { %4994 = vmatmul.mubr.f32.gmra.mrb[34].mxu0 %v7960_v29 }
0x100b   :  { %4996 = vmatprep.mubr.f32.mxu0 %v8006_v49 }
0x100e   :  { %4997 = vmatmul.mubr.f32.gmra.mrb[36].mxu0 %v8052_v30 }
0x100f   :  { %4999 = vmatprep.mubr.f32.mxu0 %v4444_v40 }
0x10b9   :  { %v4580_v26 = vpop.f32.mrb[30].mxu0  ;;  %v4651_v18 = vpop.f32.mrb[46].mxu1 }
0x10ba   :  { %v6248_v34 = vadd.f32 %v4580_v26, %v7734_v11  ;;  %v4582_v37 = vpop.f32.mrb[31].mxu0  ;;  %v4653_v32 = vpop.f32.mrb[47].mxu1  ;;  %v6264_v29 = vadd.f32 %v4651_v18, %v7749_v45 }
0x10bb   :  { %v6249_v0 = vadd.f32 %v4582_v37, %v7738_v54  ;;  %v6265_v62 = vadd.f32 %v4653_v32, %v7744_v28  ;;  %v8110_v28 = vld [vmem:[%s8172_s7] ss:$0 sm:$0xff]  ;;  %s6809_s7 = smov [#allocation16]  }
0x10bc   :  { %v4930_v25 = vmul.f32 -1.442695, %v6248_v34  ;;  %s4850_s13 = sshll.u32 %s6809_s7, 4  ;;  %s4851_s13 = int_to_ptr.vmem [resolvable:$true] %s4850_s13 }
0x10bd   :  { %v4931_v47 = vmul.f32 -1.442695, %v6249_v0  ;;  %v4932_v44 = vmul.f32 -1.442695, %v6265_v62  ;;  %s6718_s15 = scalar_lea.vmem %s4851_s13, 256  ;;  %p6723_p7 = scmp.lt.s32.totalorder %s4851_s13, %s4851_s13 }
0x10be   :  { %6570 = vpow2.f32 %v4930_v25  ;;  %p6719_p6 = scmp.ne.s32.totalorder %s4851_s13, %s6718_s15  ;;  %p6724_p8 = scmp.lt.s32.totalorder %s6718_s15, %s6718_s15 }
0x10bf   :  { %6572 = vpow2.f32 %v4931_v47 }
0x10c0   :  { %6574 = vpow2.f32 %v4932_v44  ;;  %p6725_p9 = por %p6724_p8, %p6723_p7 }
0x10c1   :  { %6576 = vtanh.f32 %v6264_v29 }
0x10c2   :  { %p6726_p10 = pnand %p6725_p9, %p6719_p6 }
0x10c8   :  { %v6571_v49 = vpop.eup %6570 }
0x10c9   :  { %v6573_v30 = vpop.eup %6572  ;;  %v4663_v12 = vadd.f32 1.0, %v6571_v49 }
0x10ca   :  { %v4669_v7 = vadd.f32 1.0, %v6573_v30  ;;  %v6575_v11 = vpop.eup %6574 }
0x10cb   :  { %6578 = vrcp.f32 %v4663_v12  ;;  %v6577_v8 = vpop.eup %6576  ;;  %v4676_v53 = vadd.f32 1.0, %v6575_v11 }
0x10cc   :  { %6580 = vrcp.f32 %v4669_v7 }
0x10cd   :  { %6582 = vrcp.f32 %v4676_v53 }
0x10d5   :  { %v6579_v54 = vpop.eup %6578 }
0x10d6   :  { %v6581_v51 = vpop.eup %6580  ;;  %v4680_v21 = vmul.f32 %v6579_v54, %v6577_v8 }
0x10d7   :  { %v4679_v60 = vmul.f32 %v6581_v51, %v8093_v52  ;;  %v6583_v57 = vpop.eup %6582 }
0x10d9   :  { %v4992_v45 = vpop.f32.mrb[32].mxu0  ;;  %v4681_v6 = vadd.f32 %v4680_v21, %v4679_v60 }
0x10da   :  { %v4792_v3 = vadd.f32 %v4992_v45, %v8110_v28  ;;  %v4786_v9 = vpop.f32.mrb[33].mxu0 }
0x10db   :  { %v4787_v19 = vadd.f32 %v8110_v28, %v4786_v9  ;;  %6584 = vtanh.f32 %v4681_v6  ;;  %4688 = vst [vmem:[#allocation18 + $0x8] sm:$0xff] %v4681_v6 }
0x10dc   :  { %4826 = vst [vmem:[#allocation15 + $0x8] sm:$0xff] %v4792_v3 }
0x10dd   :  { %4825 = vst [vmem:[#allocation15] sm:$0xff] %v4787_v19  ;;  %v4995_v5 = vpop.f32.mrb[34].mxu0 }
0x10de   :  { %v4802_v27 = vadd.f32 %v4995_v5, %v8110_v28  ;;  %v4796_v16 = vpop.f32.mrb[35].mxu0 }
0x10df   :  { %v4797_v23 = vadd.f32 %v8110_v28, %v4796_v16 }
0x10e0   :  { %4828 = vst [vmem:[#allocation15 + $0x18] sm:$0xff] %v4802_v27 }
0x10e1   :  { %4827 = vst [vmem:[#allocation15 + $0x10] sm:$0xff] %v4797_v23  ;;  %v4998_v35 = vpop.f32.mrb[36].mxu0 }
0x10e2   :  { %v4812_v15 = vadd.f32 %v4998_v35, %v8110_v28  ;;  %v4806_v41 = vpop.f32.mrb[37].mxu0 }
0x10e3   :  { %v4807_v17 = vadd.f32 %v8110_v28, %v4806_v41 }
0x10e4   :  { %4830 = vst [vmem:[#allocation15 + $0x28] sm:$0xff] %v4812_v15 }
0x10e5   :  { %v6585_v24 = vpop.eup %6584  ;;  %4829 = vst [vmem:[#allocation15 + $0x20] sm:$0xff] %v4807_v17 }
0x10e6   :  { %v4683_v48 = vmul.f32 %v6585_v24, %v6583_v57 }
0x10e8   :  { %5000 = vmatmul.mubr.f32.gmra.mrb[38].mxu0 %v4683_v48  ;;  %4686 = vst [vmem:[#allocation16 + $0x8] sm:$0xff] %v4683_v48 }
0x10e9   :  { %6729 = shalt.err (!%p6726_p10)
}
0x10ea   :  { %s6730_s18 = scalar_lea.hbm %s8174_s9, 256 }
0x10eb   :  { %p6731_p11 = scmp.ne.s32.totalorder %s8174_s9, %s6730_s18  ;;  %p6734_p12 = scmp.lt.u32.totalorder %s6730_s18, %s8174_s9 }
0x10ed   :  { %p6736_p13 = pnand %p6734_p12, %p6731_p11 }
0x10ef   :  { %6739 = shalt.err (!%p6736_p13)
}
0x10f0   :  { %4856 = dma.vmem_to_hbm [thread:$0]  %s4851_s13, 256, %s8174_s9, [#allocation17], %s6803_s3, %s6803_s3, %s6804_s28  }
0x10f1   :  { %s6810_s22 = smov [#allocation18]  }
0x10f2   :  { %s4862_s25 = sshll.u32 %s6810_s22, 4  ;;  %s4863_s25 = int_to_ptr.vmem [resolvable:$true] %s4862_s25 }
0x10f3   :  { %s6740_s26 = scalar_lea.vmem %s4863_s25, 256  ;;  %p6745_p1 = scmp.lt.s32.totalorder %s4863_s25, %s4863_s25 }
0x10f4   :  { %p6741_p0 = scmp.ne.s32.totalorder %s4863_s25, %s6740_s26  ;;  %p6746_p2 = scmp.lt.s32.totalorder %s6740_s26, %s6740_s26 }
0x10f6   :  { %p6747_p3 = por %p6746_p2, %p6745_p1 }
0x10f8   :  { %p6748_p4 = pnand %p6747_p3, %p6741_p0 }
0x10fa   :  { %6751 = shalt.err (!%p6748_p4)
}
0x10fb   :  { %s6752_s21 = scalar_lea.hbm %s8175_s10, 256 }
0x10fc   :  { %p6753_p5 = scmp.ne.s32.totalorder %s8175_s10, %s6752_s21  ;;  %p6756_p6 = scmp.lt.u32.totalorder %s6752_s21, %s8175_s10 }
0x10fe   :  { %p6758_p7 = pnand %p6756_p6, %p6753_p5 }
0x1100   :  { %6761 = shalt.err (!%p6758_p7)
}
0x1101   :  { %4868 = dma.vmem_to_hbm [thread:$0]  %s4863_s25, 256, %s8175_s10, [#allocation17], %s6803_s3, %s6803_s3, %s6804_s28  }
0x1102   :  { %s6811_s11 = smov [#allocation15]  }
0x1103   :  { %s4838_s5 = sshll.u32 %s6811_s11, 4  ;;  %s4839_s5 = int_to_ptr.vmem [resolvable:$true] %s4838_s5 }
0x1104   :  { %s6762_s12 = scalar_lea.vmem %s4839_s5, 1024  ;;  %p6767_p9 = scmp.lt.s32.totalorder %s4839_s5, %s4839_s5 }
0x1105   :  { %p6763_p8 = scmp.ne.s32.totalorder %s4839_s5, %s6762_s12  ;;  %p6768_p10 = scmp.lt.s32.totalorder %s6762_s12, %s6762_s12 }
0x1107   :  { %p6769_p11 = por %p6768_p10, %p6767_p9 }
0x1109   :  { %p6770_p12 = pnand %p6769_p11, %p6763_p8 }
0x11bb   :  { %v5001_v52 = vpop.f32.mrb[38].mxu0 }
0x11bc   :  { %v4822_v42 = vadd.f32 %v5001_v52, %v8110_v28  ;;  %v4816_v10 = vpop.f32.mrb[39].mxu0 }
0x11bd   :  { %v4817_v63 = vadd.f32 %v8110_v28, %v4816_v10 }
0x11be   :  { %4832 = vst [vmem:[#allocation15 + $0x38] sm:$0xff] %v4822_v42 }
0x11bf   :  { %4831 = vst [vmem:[#allocation15 + $0x30] sm:$0xff] %v4817_v63 }
0x11c0   :  { %6773 = shalt.err (!%p6770_p12)
}
0x11c1   :  { %s6774_s13 = scalar_lea.hbm %s8173_s8, 1024 }
0x11c2   :  { %p6775_p13 = scmp.ne.s32.totalorder %s8173_s8, %s6774_s13  ;;  %p6778_p0 = scmp.lt.u32.totalorder %s6774_s13, %s8173_s8 }
0x11c4   :  { %p6780_p1 = pnand %p6778_p0, %p6775_p13 }
0x11c6   :  { %6783 = shalt.err (!%p6780_p1)
}
0x11c7   :  { %4844 = dma.vmem_to_hbm [thread:$0]  %s4839_s5, 1024, %s8173_s8, [#allocation6], %s6803_s3, %s6803_s3, %s6804_s28  }
0x11c8   :  { %6792 = dma.done.wait [#allocation6], 1024  }
0x11c9   :  { %6793 = vsyncadd [#allocation6], 4294966272 }
0x11ca   :  { %6794 = dma.done.wait [#allocation17], 512  }
0x11cb   :  { %6795 = vsyncadd [#allocation17], 4294966784 }
0x11cc   :  { %4878 = vsyncpa [#allocation5], 1 }
0x11cd   :  { %4879 = vsyncpa [#allocation8], 1 }
0x11ce   :  { %4880 = vsyncpa [#allocation11], 1 }
0x11cf   :  { %4881 = vsyncpa [#allocation14], 1 }
0x11d0   :  { %4882 = vsyncpa [#allocation6], 1 }
0x11d1   :  { %4883 = vsyncpa [#allocation17], 1 }

</bundles_post_ra>
